<compile_context>
chip_gen: v6e
topology: v6e:2x2x1
jax: 0.10.0
libtpu: 0.0.40
codegen_flags: <defaults>
</compile_context>

<pallas_src>
import jax
import jax.numpy as jnp
from jax.experimental import pallas as pl
from jax.experimental.pallas import tpu as pltpu

N_HID = 2            # number of hidden Linear+LeakyReLU blocks
HID_NODES = 10       # must be 10 for the torch module's shapes to compose
IN_FEATURES = 2
LEAKY_SLOPE = 0.01   # torch.nn.LeakyReLU default
TILE_B = 1024        # batch tile on the lane axis; (10, TILE_B) f32 ~ 40 KiB


def _sigmoid(x):
    # exp and approximate reciprocal both issue on the EUP slot (no VALU divide).
    return pl.reciprocal(1.0 + jnp.exp(-x), approx=True)


def _fma_layer(get_col, n_in, h, b):
    """y = W @ h + b as unrolled VPU broadcast-FMAs (no MXU).

    get_col(k) -> (out, 1) column of W (lane-0 resident); h is (in, TB) and
    h[k:k+1, :] is a (1, TB) sublane slice; their product broadcasts to
    (out, TB)."""
    acc = get_col(0) * h[0:1, :]
    for k in range(1, n_in):
        acc = acc + get_col(k) * h[k:k + 1, :]
    return acc + b


def xornet_kernel(x_ref, w1_ref, b1_ref, wh_ref, bh_ref, w2_ref, b2_ref, o_ref):
    x = x_ref[...]                                              # (2, TB) lane-dense

    # Input layer: Linear(2, 10) + Sigmoid  (2 FMAs)
    h = _sigmoid(_fma_layer(lambda k: w1_ref[k, :, :], IN_FEATURES, x,
                            b1_ref[...]))

    # Hidden blocks: Linear(10, 10) + LeakyReLU  (10 FMAs each, fully unrolled)
    for i in range(N_HID):
        z = _fma_layer(lambda k: wh_ref[i, k, :, :], HID_NODES, h,
                       bh_ref[i, :, :])
        h = jnp.where(z > 0, z, LEAKY_SLOPE * z)

    # Output layer: Linear(10, 1) + Sigmoid  (10 FMAs into a (1, TB) row)
    y = _fma_layer(lambda k: w2_ref[k, :, :], HID_NODES, h, b2_ref[...])
    o_ref[...] = _sigmoid(y)                                    # lane-dense store


def _cols(w):
    """torch-layout (out, in) weight -> (in, out, 1): column k sits at lane 0."""
    return jnp.transpose(w, (1, 0))[:, :, None]


def xornet_forward(x, params, *, tile_b=TILE_B):
    """x: (B, 2) -> (B, 1). params use torch.nn.Linear (out, in) weight layout."""
    w1, b1, wh, bh, w2, b2 = params
    B = x.shape[0]
    num_tiles = pl.cdiv(B, tile_b)
    bp = num_tiles * tile_b

    # Lane-dense (features, batch) activations, batch padded to a tile multiple.
    xt = jnp.pad(x.astype(jnp.float32).T, ((0, 0), (0, bp - B)))

    w1e = _cols(w1)                                   # (2, 10, 1)
    whe = jnp.transpose(wh, (0, 2, 1))[..., None]     # (N_HID, 10, 10, 1)
    w2e = _cols(w2)                                   # (10, 1, 1)

    const2 = lambda i: (0, 0)
    const3 = lambda i: (0, 0, 0)
    const4 = lambda i: (0, 0, 0, 0)

    out_t = pl.pallas_call(
        xornet_kernel,
        out_shape=jax.ShapeDtypeStruct((1, bp), jnp.float32),
        grid=(num_tiles,),
        in_specs=[
            pl.BlockSpec((IN_FEATURES, tile_b), lambda i: (0, i)),  # x tile
            pl.BlockSpec(w1e.shape, const3),                        # resident weights
            pl.BlockSpec(b1.shape, const2),
            pl.BlockSpec(whe.shape, const4),
            pl.BlockSpec(bh.shape, const3),
            pl.BlockSpec(w2e.shape, const3),
            pl.BlockSpec(b2.shape, const2),
        ],
        out_specs=pl.BlockSpec((1, tile_b), lambda i: (0, i)),
        compiler_params=pltpu.CompilerParams(
            dimension_semantics=("parallel",)),
    )(xt, w1e, b1, whe, bh, w2e, b2)

    return out_t[:, :B].T                             # back to (B, 1)


def init_params(key):
    """Deterministic init (uniform, torch-like scale); torch (out, in) layouts."""
    ks = jax.random.split(key, 6)

    def u(k, shape, fan_in):
        bound = 1.0 / (fan_in ** 0.5)
        return jax.random.uniform(k, shape, jnp.float32, -bound, bound)

    w1 = u(ks[0], (HID_NODES, IN_FEATURES), IN_FEATURES)   # Linear(2, 10)
    b1 = u(ks[1], (HID_NODES, 1), IN_FEATURES)
    wh = u(ks[2], (N_HID, HID_NODES, HID_NODES), HID_NODES)
    bh = u(ks[3], (N_HID, HID_NODES, 1), HID_NODES)
    w2 = u(ks[4], (1, HID_NODES), HID_NODES)               # Linear(10, 1)
    b2 = u(ks[5], (1, 1), HID_NODES)
    return (w1, b1, wh, bh, w2, b2)


def reference_forward(x, params):
    """Plain-JAX reference for validation (exact sigmoid)."""
    w1, b1, wh, bh, w2, b2 = params
    h = jax.nn.sigmoid(x @ w1.T + b1[:, 0])
    for i in range(N_HID):
        z = h @ wh[i].T + bh[i, :, 0]
        h = jnp.where(z > 0, z, LEAKY_SLOPE * z)
    return jax.nn.sigmoid(h @ w2.T + b2[:, 0])


if __name__ == "__main__":
    key = jax.random.PRNGKey(0)
    k_x, k_p = jax.random.split(key)

    batch = 8
    x = jax.random.normal(k_x, (batch, IN_FEATURES), jnp.float32)
    params = init_params(k_p)

    out = jax.block_until_ready(xornet_forward(x, params))
    ref = reference_forward(x, params)

    assert out.shape == (batch, 1)
    # Kernel uses the EUP approximate reciprocal inside sigmoid (~1e-4 rel err).
    assert jnp.allclose(out, ref, atol=2e-3, rtol=2e-3), "mismatch vs reference"

    print("KERNEL_OK")
</pallas_src>

<mosaic_0001>
module attributes {stable_mosaic.version = 11 : i64} {
  func.func @xornet_kernel(%arg0: i32, %arg1: memref<2x1024xf32, #tpu.memory_space<vmem>>, %arg2: memref<2x10x1xf32, #tpu.memory_space<vmem>>, %arg3: memref<10x1xf32, #tpu.memory_space<vmem>>, %arg4: memref<2x10x10x1xf32, #tpu.memory_space<vmem>>, %arg5: memref<2x10x1xf32, #tpu.memory_space<vmem>>, %arg6: memref<10x1x1xf32, #tpu.memory_space<vmem>>, %arg7: memref<1x1xf32, #tpu.memory_space<vmem>>, %arg8: memref<1x1024xf32, #tpu.memory_space<vmem>>) attributes {dimension_semantics = [#tpu.dimension_semantics<parallel>], iteration_bounds = array<i64: 1>, scalar_prefetch = 0 : i64, scratch_operands = 0 : i64, tpu.core_type = #tpu.core_type<tc>, window_params = [{transform_indices = @transform_0, window_bounds = array<i64: 2, 1024>}, {pipeline_mode = #tpu.pipeline_mode<synchronous>, transform_indices = @transform_1, window_bounds = array<i64: 2, 10, 1>}, {pipeline_mode = #tpu.pipeline_mode<synchronous>, transform_indices = @transform_2, window_bounds = array<i64: 10, 1>}, {pipeline_mode = #tpu.pipeline_mode<synchronous>, transform_indices = @transform_3, window_bounds = array<i64: 2, 10, 10, 1>}, {pipeline_mode = #tpu.pipeline_mode<synchronous>, transform_indices = @transform_4, window_bounds = array<i64: 2, 10, 1>}, {pipeline_mode = #tpu.pipeline_mode<synchronous>, transform_indices = @transform_5, window_bounds = array<i64: 10, 1, 1>}, {pipeline_mode = #tpu.pipeline_mode<synchronous>, transform_indices = @transform_6, window_bounds = array<i64: 1, 1>}, {transform_indices = @transform_7, window_bounds = array<i64: 1, 1024>}]} {
    %c0 = arith.constant 0 : index
    %c0_0 = arith.constant 0 : index
    %0 = vector.load %arg1[%c0, %c0_0] : memref<2x1024xf32, #tpu.memory_space<vmem>>, vector<2x1024xf32>
    %c0_1 = arith.constant 0 : index
    %c0_2 = arith.constant 0 : index
    %1 = vector.load %arg3[%c0_1, %c0_2] : memref<10x1xf32, #tpu.memory_space<vmem>>, vector<10x1xf32>
    %c0_3 = arith.constant 0 : index
    %c0_4 = arith.constant 0 : index
    %c0_5 = arith.constant 0 : index
    %2 = vector.load %arg2[%c0_3, %c0_4, %c0_5] : memref<2x10x1xf32, #tpu.memory_space<vmem>>, vector<1x10x1xf32>
    %3 = vector.shape_cast %2 : vector<1x10x1xf32> to vector<10x1xf32>
    %4 = vector.extract_strided_slice %0 {offsets = [0, 0], sizes = [1, 1024], strides = [1, 1]} : vector<2x1024xf32> to vector<1x1024xf32>
    %5 = vector.broadcast %3 : vector<10x1xf32> to vector<10x1024xf32>
    %6 = vector.broadcast %4 : vector<1x1024xf32> to vector<10x1024xf32>
    %7 = arith.mulf %5, %6 : vector<10x1024xf32>
    %c1 = arith.constant 1 : index
    %c0_6 = arith.constant 0 : index
    %c0_7 = arith.constant 0 : index
    %8 = vector.load %arg2[%c1, %c0_6, %c0_7] : memref<2x10x1xf32, #tpu.memory_space<vmem>>, vector<1x10x1xf32>
    %9 = vector.shape_cast %8 : vector<1x10x1xf32> to vector<10x1xf32>
    %10 = vector.extract_strided_slice %0 {offsets = [1, 0], sizes = [1, 1024], strides = [1, 1]} : vector<2x1024xf32> to vector<1x1024xf32>
    %11 = vector.broadcast %9 : vector<10x1xf32> to vector<10x1024xf32>
    %12 = vector.broadcast %10 : vector<1x1024xf32> to vector<10x1024xf32>
    %13 = arith.mulf %11, %12 : vector<10x1024xf32>
    %14 = arith.addf %7, %13 : vector<10x1024xf32>
    %15 = vector.broadcast %1 : vector<10x1xf32> to vector<10x1024xf32>
    %16 = arith.addf %14, %15 : vector<10x1024xf32>
    %cst = arith.constant 0.000000e+00 : f32
    %17 = vector.broadcast %cst : f32 to vector<10x1024xf32>
    %18 = arith.subf %17, %16 : vector<10x1024xf32>
    %19 = math.exp %18 : vector<10x1024xf32>
    %cst_8 = arith.constant 1.000000e+00 : f32
    %20 = vector.broadcast %cst_8 : f32 to vector<10x1024xf32>
    %21 = arith.addf %20, %19 : vector<10x1024xf32>
    %22 = tpu.reciprocal %21 {approx = true} : vector<10x1024xf32> -> vector<10x1024xf32>
    %c0_9 = arith.constant 0 : index
    %c0_10 = arith.constant 0 : index
    %c0_11 = arith.constant 0 : index
    %23 = vector.load %arg5[%c0_9, %c0_10, %c0_11] : memref<2x10x1xf32, #tpu.memory_space<vmem>>, vector<1x10x1xf32>
    %24 = vector.shape_cast %23 : vector<1x10x1xf32> to vector<10x1xf32>
    %c0_12 = arith.constant 0 : index
    %c0_13 = arith.constant 0 : index
    %c0_14 = arith.constant 0 : index
    %c0_15 = arith.constant 0 : index
    %25 = vector.load %arg4[%c0_12, %c0_13, %c0_14, %c0_15] : memref<2x10x10x1xf32, #tpu.memory_space<vmem>>, vector<1x1x10x1xf32>
    %26 = vector.shape_cast %25 : vector<1x1x10x1xf32> to vector<10x1xf32>
    %27 = vector.extract_strided_slice %22 {offsets = [0, 0], sizes = [1, 1024], strides = [1, 1]} : vector<10x1024xf32> to vector<1x1024xf32>
    %28 = vector.broadcast %26 : vector<10x1xf32> to vector<10x1024xf32>
    %29 = vector.broadcast %27 : vector<1x1024xf32> to vector<10x1024xf32>
    %30 = arith.mulf %28, %29 : vector<10x1024xf32>
    %c0_16 = arith.constant 0 : index
    %c1_17 = arith.constant 1 : index
    %c0_18 = arith.constant 0 : index
    %c0_19 = arith.constant 0 : index
    %31 = vector.load %arg4[%c0_16, %c1_17, %c0_18, %c0_19] : memref<2x10x10x1xf32, #tpu.memory_space<vmem>>, vector<1x1x10x1xf32>
    %32 = vector.shape_cast %31 : vector<1x1x10x1xf32> to vector<10x1xf32>
    %33 = vector.extract_strided_slice %22 {offsets = [1, 0], sizes = [1, 1024], strides = [1, 1]} : vector<10x1024xf32> to vector<1x1024xf32>
    %34 = vector.broadcast %32 : vector<10x1xf32> to vector<10x1024xf32>
    %35 = vector.broadcast %33 : vector<1x1024xf32> to vector<10x1024xf32>
    %36 = arith.mulf %34, %35 : vector<10x1024xf32>
    %37 = arith.addf %30, %36 : vector<10x1024xf32>
    %c0_20 = arith.constant 0 : index
    %c2 = arith.constant 2 : index
    %c0_21 = arith.constant 0 : index
    %c0_22 = arith.constant 0 : index
    %38 = vector.load %arg4[%c0_20, %c2, %c0_21, %c0_22] : memref<2x10x10x1xf32, #tpu.memory_space<vmem>>, vector<1x1x10x1xf32>
    %39 = vector.shape_cast %38 : vector<1x1x10x1xf32> to vector<10x1xf32>
    %40 = vector.extract_strided_slice %22 {offsets = [2, 0], sizes = [1, 1024], strides = [1, 1]} : vector<10x1024xf32> to vector<1x1024xf32>
    %41 = vector.broadcast %39 : vector<10x1xf32> to vector<10x1024xf32>
    %42 = vector.broadcast %40 : vector<1x1024xf32> to vector<10x1024xf32>
    %43 = arith.mulf %41, %42 : vector<10x1024xf32>
    %44 = arith.addf %37, %43 : vector<10x1024xf32>
    %c0_23 = arith.constant 0 : index
    %c3 = arith.constant 3 : index
    %c0_24 = arith.constant 0 : index
    %c0_25 = arith.constant 0 : index
    %45 = vector.load %arg4[%c0_23, %c3, %c0_24, %c0_25] : memref<2x10x10x1xf32, #tpu.memory_space<vmem>>, vector<1x1x10x1xf32>
    %46 = vector.shape_cast %45 : vector<1x1x10x1xf32> to vector<10x1xf32>
    %47 = vector.extract_strided_slice %22 {offsets = [3, 0], sizes = [1, 1024], strides = [1, 1]} : vector<10x1024xf32> to vector<1x1024xf32>
    %48 = vector.broadcast %46 : vector<10x1xf32> to vector<10x1024xf32>
    %49 = vector.broadcast %47 : vector<1x1024xf32> to vector<10x1024xf32>
    %50 = arith.mulf %48, %49 : vector<10x1024xf32>
    %51 = arith.addf %44, %50 : vector<10x1024xf32>
    %c0_26 = arith.constant 0 : index
    %c4 = arith.constant 4 : index
    %c0_27 = arith.constant 0 : index
    %c0_28 = arith.constant 0 : index
    %52 = vector.load %arg4[%c0_26, %c4, %c0_27, %c0_28] : memref<2x10x10x1xf32, #tpu.memory_space<vmem>>, vector<1x1x10x1xf32>
    %53 = vector.shape_cast %52 : vector<1x1x10x1xf32> to vector<10x1xf32>
    %54 = vector.extract_strided_slice %22 {offsets = [4, 0], sizes = [1, 1024], strides = [1, 1]} : vector<10x1024xf32> to vector<1x1024xf32>
    %55 = vector.broadcast %53 : vector<10x1xf32> to vector<10x1024xf32>
    %56 = vector.broadcast %54 : vector<1x1024xf32> to vector<10x1024xf32>
    %57 = arith.mulf %55, %56 : vector<10x1024xf32>
    %58 = arith.addf %51, %57 : vector<10x1024xf32>
    %c0_29 = arith.constant 0 : index
    %c5 = arith.constant 5 : index
    %c0_30 = arith.constant 0 : index
    %c0_31 = arith.constant 0 : index
    %59 = vector.load %arg4[%c0_29, %c5, %c0_30, %c0_31] : memref<2x10x10x1xf32, #tpu.memory_space<vmem>>, vector<1x1x10x1xf32>
    %60 = vector.shape_cast %59 : vector<1x1x10x1xf32> to vector<10x1xf32>
    %61 = vector.extract_strided_slice %22 {offsets = [5, 0], sizes = [1, 1024], strides = [1, 1]} : vector<10x1024xf32> to vector<1x1024xf32>
    %62 = vector.broadcast %60 : vector<10x1xf32> to vector<10x1024xf32>
    %63 = vector.broadcast %61 : vector<1x1024xf32> to vector<10x1024xf32>
    %64 = arith.mulf %62, %63 : vector<10x1024xf32>
    %65 = arith.addf %58, %64 : vector<10x1024xf32>
    %c0_32 = arith.constant 0 : index
    %c6 = arith.constant 6 : index
    %c0_33 = arith.constant 0 : index
    %c0_34 = arith.constant 0 : index
    %66 = vector.load %arg4[%c0_32, %c6, %c0_33, %c0_34] : memref<2x10x10x1xf32, #tpu.memory_space<vmem>>, vector<1x1x10x1xf32>
    %67 = vector.shape_cast %66 : vector<1x1x10x1xf32> to vector<10x1xf32>
    %68 = vector.extract_strided_slice %22 {offsets = [6, 0], sizes = [1, 1024], strides = [1, 1]} : vector<10x1024xf32> to vector<1x1024xf32>
    %69 = vector.broadcast %67 : vector<10x1xf32> to vector<10x1024xf32>
    %70 = vector.broadcast %68 : vector<1x1024xf32> to vector<10x1024xf32>
    %71 = arith.mulf %69, %70 : vector<10x1024xf32>
    %72 = arith.addf %65, %71 : vector<10x1024xf32>
    %c0_35 = arith.constant 0 : index
    %c7 = arith.constant 7 : index
    %c0_36 = arith.constant 0 : index
    %c0_37 = arith.constant 0 : index
    %73 = vector.load %arg4[%c0_35, %c7, %c0_36, %c0_37] : memref<2x10x10x1xf32, #tpu.memory_space<vmem>>, vector<1x1x10x1xf32>
    %74 = vector.shape_cast %73 : vector<1x1x10x1xf32> to vector<10x1xf32>
    %75 = vector.extract_strided_slice %22 {offsets = [7, 0], sizes = [1, 1024], strides = [1, 1]} : vector<10x1024xf32> to vector<1x1024xf32>
    %76 = vector.broadcast %74 : vector<10x1xf32> to vector<10x1024xf32>
    %77 = vector.broadcast %75 : vector<1x1024xf32> to vector<10x1024xf32>
    %78 = arith.mulf %76, %77 : vector<10x1024xf32>
    %79 = arith.addf %72, %78 : vector<10x1024xf32>
    %c0_38 = arith.constant 0 : index
    %c8 = arith.constant 8 : index
    %c0_39 = arith.constant 0 : index
    %c0_40 = arith.constant 0 : index
    %80 = vector.load %arg4[%c0_38, %c8, %c0_39, %c0_40] : memref<2x10x10x1xf32, #tpu.memory_space<vmem>>, vector<1x1x10x1xf32>
    %81 = vector.shape_cast %80 : vector<1x1x10x1xf32> to vector<10x1xf32>
    %82 = vector.extract_strided_slice %22 {offsets = [8, 0], sizes = [1, 1024], strides = [1, 1]} : vector<10x1024xf32> to vector<1x1024xf32>
    %83 = vector.broadcast %81 : vector<10x1xf32> to vector<10x1024xf32>
    %84 = vector.broadcast %82 : vector<1x1024xf32> to vector<10x1024xf32>
    %85 = arith.mulf %83, %84 : vector<10x1024xf32>
    %86 = arith.addf %79, %85 : vector<10x1024xf32>
    %c0_41 = arith.constant 0 : index
    %c9 = arith.constant 9 : index
    %c0_42 = arith.constant 0 : index
    %c0_43 = arith.constant 0 : index
    %87 = vector.load %arg4[%c0_41, %c9, %c0_42, %c0_43] : memref<2x10x10x1xf32, #tpu.memory_space<vmem>>, vector<1x1x10x1xf32>
    %88 = vector.shape_cast %87 : vector<1x1x10x1xf32> to vector<10x1xf32>
    %89 = vector.extract_strided_slice %22 {offsets = [9, 0], sizes = [1, 1024], strides = [1, 1]} : vector<10x1024xf32> to vector<1x1024xf32>
    %90 = vector.broadcast %88 : vector<10x1xf32> to vector<10x1024xf32>
    %91 = vector.broadcast %89 : vector<1x1024xf32> to vector<10x1024xf32>
    %92 = arith.mulf %90, %91 : vector<10x1024xf32>
    %93 = arith.addf %86, %92 : vector<10x1024xf32>
    %94 = vector.broadcast %24 : vector<10x1xf32> to vector<10x1024xf32>
    %95 = arith.addf %93, %94 : vector<10x1024xf32>
    %cst_44 = arith.constant 0.000000e+00 : f32
    %96 = vector.broadcast %cst_44 : f32 to vector<10x1024xf32>
    %97 = arith.cmpf ogt, %95, %96 : vector<10x1024xf32>
    %cst_45 = arith.constant 0.00999999977 : f32
    %98 = vector.broadcast %cst_45 : f32 to vector<10x1024xf32>
    %99 = arith.mulf %98, %95 : vector<10x1024xf32>
    %100 = arith.select %97, %95, %99 : vector<10x1024xi1>, vector<10x1024xf32>
    %c1_46 = arith.constant 1 : index
    %c0_47 = arith.constant 0 : index
    %c0_48 = arith.constant 0 : index
    %101 = vector.load %arg5[%c1_46, %c0_47, %c0_48] : memref<2x10x1xf32, #tpu.memory_space<vmem>>, vector<1x10x1xf32>
    %102 = vector.shape_cast %101 : vector<1x10x1xf32> to vector<10x1xf32>
    %c1_49 = arith.constant 1 : index
    %c0_50 = arith.constant 0 : index
    %c0_51 = arith.constant 0 : index
    %c0_52 = arith.constant 0 : index
    %103 = vector.load %arg4[%c1_49, %c0_50, %c0_51, %c0_52] : memref<2x10x10x1xf32, #tpu.memory_space<vmem>>, vector<1x1x10x1xf32>
    %104 = vector.shape_cast %103 : vector<1x1x10x1xf32> to vector<10x1xf32>
    %105 = vector.extract_strided_slice %100 {offsets = [0, 0], sizes = [1, 1024], strides = [1, 1]} : vector<10x1024xf32> to vector<1x1024xf32>
    %106 = vector.broadcast %104 : vector<10x1xf32> to vector<10x1024xf32>
    %107 = vector.broadcast %105 : vector<1x1024xf32> to vector<10x1024xf32>
    %108 = arith.mulf %106, %107 : vector<10x1024xf32>
    %c1_53 = arith.constant 1 : index
    %c1_54 = arith.constant 1 : index
    %c0_55 = arith.constant 0 : index
    %c0_56 = arith.constant 0 : index
    %109 = vector.load %arg4[%c1_53, %c1_54, %c0_55, %c0_56] : memref<2x10x10x1xf32, #tpu.memory_space<vmem>>, vector<1x1x10x1xf32>
    %110 = vector.shape_cast %109 : vector<1x1x10x1xf32> to vector<10x1xf32>
    %111 = vector.extract_strided_slice %100 {offsets = [1, 0], sizes = [1, 1024], strides = [1, 1]} : vector<10x1024xf32> to vector<1x1024xf32>
    %112 = vector.broadcast %110 : vector<10x1xf32> to vector<10x1024xf32>
    %113 = vector.broadcast %111 : vector<1x1024xf32> to vector<10x1024xf32>
    %114 = arith.mulf %112, %113 : vector<10x1024xf32>
    %115 = arith.addf %108, %114 : vector<10x1024xf32>
    %c1_57 = arith.constant 1 : index
    %c2_58 = arith.constant 2 : index
    %c0_59 = arith.constant 0 : index
    %c0_60 = arith.constant 0 : index
    %116 = vector.load %arg4[%c1_57, %c2_58, %c0_59, %c0_60] : memref<2x10x10x1xf32, #tpu.memory_space<vmem>>, vector<1x1x10x1xf32>
    %117 = vector.shape_cast %116 : vector<1x1x10x1xf32> to vector<10x1xf32>
    %118 = vector.extract_strided_slice %100 {offsets = [2, 0], sizes = [1, 1024], strides = [1, 1]} : vector<10x1024xf32> to vector<1x1024xf32>
    %119 = vector.broadcast %117 : vector<10x1xf32> to vector<10x1024xf32>
    %120 = vector.broadcast %118 : vector<1x1024xf32> to vector<10x1024xf32>
    %121 = arith.mulf %119, %120 : vector<10x1024xf32>
    %122 = arith.addf %115, %121 : vector<10x1024xf32>
    %c1_61 = arith.constant 1 : index
    %c3_62 = arith.constant 3 : index
    %c0_63 = arith.constant 0 : index
    %c0_64 = arith.constant 0 : index
    %123 = vector.load %arg4[%c1_61, %c3_62, %c0_63, %c0_64] : memref<2x10x10x1xf32, #tpu.memory_space<vmem>>, vector<1x1x10x1xf32>
    %124 = vector.shape_cast %123 : vector<1x1x10x1xf32> to vector<10x1xf32>
    %125 = vector.extract_strided_slice %100 {offsets = [3, 0], sizes = [1, 1024], strides = [1, 1]} : vector<10x1024xf32> to vector<1x1024xf32>
    %126 = vector.broadcast %124 : vector<10x1xf32> to vector<10x1024xf32>
    %127 = vector.broadcast %125 : vector<1x1024xf32> to vector<10x1024xf32>
    %128 = arith.mulf %126, %127 : vector<10x1024xf32>
    %129 = arith.addf %122, %128 : vector<10x1024xf32>
    %c1_65 = arith.constant 1 : index
    %c4_66 = arith.constant 4 : index
    %c0_67 = arith.constant 0 : index
    %c0_68 = arith.constant 0 : index
    %130 = vector.load %arg4[%c1_65, %c4_66, %c0_67, %c0_68] : memref<2x10x10x1xf32, #tpu.memory_space<vmem>>, vector<1x1x10x1xf32>
    %131 = vector.shape_cast %130 : vector<1x1x10x1xf32> to vector<10x1xf32>
    %132 = vector.extract_strided_slice %100 {offsets = [4, 0], sizes = [1, 1024], strides = [1, 1]} : vector<10x1024xf32> to vector<1x1024xf32>
    %133 = vector.broadcast %131 : vector<10x1xf32> to vector<10x1024xf32>
    %134 = vector.broadcast %132 : vector<1x1024xf32> to vector<10x1024xf32>
    %135 = arith.mulf %133, %134 : vector<10x1024xf32>
    %136 = arith.addf %129, %135 : vector<10x1024xf32>
    %c1_69 = arith.constant 1 : index
    %c5_70 = arith.constant 5 : index
    %c0_71 = arith.constant 0 : index
    %c0_72 = arith.constant 0 : index
    %137 = vector.load %arg4[%c1_69, %c5_70, %c0_71, %c0_72] : memref<2x10x10x1xf32, #tpu.memory_space<vmem>>, vector<1x1x10x1xf32>
    %138 = vector.shape_cast %137 : vector<1x1x10x1xf32> to vector<10x1xf32>
    %139 = vector.extract_strided_slice %100 {offsets = [5, 0], sizes = [1, 1024], strides = [1, 1]} : vector<10x1024xf32> to vector<1x1024xf32>
    %140 = vector.broadcast %138 : vector<10x1xf32> to vector<10x1024xf32>
    %141 = vector.broadcast %139 : vector<1x1024xf32> to vector<10x1024xf32>
    %142 = arith.mulf %140, %141 : vector<10x1024xf32>
    %143 = arith.addf %136, %142 : vector<10x1024xf32>
    %c1_73 = arith.constant 1 : index
    %c6_74 = arith.constant 6 : index
    %c0_75 = arith.constant 0 : index
    %c0_76 = arith.constant 0 : index
    %144 = vector.load %arg4[%c1_73, %c6_74, %c0_75, %c0_76] : memref<2x10x10x1xf32, #tpu.memory_space<vmem>>, vector<1x1x10x1xf32>
    %145 = vector.shape_cast %144 : vector<1x1x10x1xf32> to vector<10x1xf32>
    %146 = vector.extract_strided_slice %100 {offsets = [6, 0], sizes = [1, 1024], strides = [1, 1]} : vector<10x1024xf32> to vector<1x1024xf32>
    %147 = vector.broadcast %145 : vector<10x1xf32> to vector<10x1024xf32>
    %148 = vector.broadcast %146 : vector<1x1024xf32> to vector<10x1024xf32>
    %149 = arith.mulf %147, %148 : vector<10x1024xf32>
    %150 = arith.addf %143, %149 : vector<10x1024xf32>
    %c1_77 = arith.constant 1 : index
    %c7_78 = arith.constant 7 : index
    %c0_79 = arith.constant 0 : index
    %c0_80 = arith.constant 0 : index
    %151 = vector.load %arg4[%c1_77, %c7_78, %c0_79, %c0_80] : memref<2x10x10x1xf32, #tpu.memory_space<vmem>>, vector<1x1x10x1xf32>
    %152 = vector.shape_cast %151 : vector<1x1x10x1xf32> to vector<10x1xf32>
    %153 = vector.extract_strided_slice %100 {offsets = [7, 0], sizes = [1, 1024], strides = [1, 1]} : vector<10x1024xf32> to vector<1x1024xf32>
    %154 = vector.broadcast %152 : vector<10x1xf32> to vector<10x1024xf32>
    %155 = vector.broadcast %153 : vector<1x1024xf32> to vector<10x1024xf32>
    %156 = arith.mulf %154, %155 : vector<10x1024xf32>
    %157 = arith.addf %150, %156 : vector<10x1024xf32>
    %c1_81 = arith.constant 1 : index
    %c8_82 = arith.constant 8 : index
    %c0_83 = arith.constant 0 : index
    %c0_84 = arith.constant 0 : index
    %158 = vector.load %arg4[%c1_81, %c8_82, %c0_83, %c0_84] : memref<2x10x10x1xf32, #tpu.memory_space<vmem>>, vector<1x1x10x1xf32>
    %159 = vector.shape_cast %158 : vector<1x1x10x1xf32> to vector<10x1xf32>
    %160 = vector.extract_strided_slice %100 {offsets = [8, 0], sizes = [1, 1024], strides = [1, 1]} : vector<10x1024xf32> to vector<1x1024xf32>
    %161 = vector.broadcast %159 : vector<10x1xf32> to vector<10x1024xf32>
    %162 = vector.broadcast %160 : vector<1x1024xf32> to vector<10x1024xf32>
    %163 = arith.mulf %161, %162 : vector<10x1024xf32>
    %164 = arith.addf %157, %163 : vector<10x1024xf32>
    %c1_85 = arith.constant 1 : index
    %c9_86 = arith.constant 9 : index
    %c0_87 = arith.constant 0 : index
    %c0_88 = arith.constant 0 : index
    %165 = vector.load %arg4[%c1_85, %c9_86, %c0_87, %c0_88] : memref<2x10x10x1xf32, #tpu.memory_space<vmem>>, vector<1x1x10x1xf32>
    %166 = vector.shape_cast %165 : vector<1x1x10x1xf32> to vector<10x1xf32>
    %167 = vector.extract_strided_slice %100 {offsets = [9, 0], sizes = [1, 1024], strides = [1, 1]} : vector<10x1024xf32> to vector<1x1024xf32>
    %168 = vector.broadcast %166 : vector<10x1xf32> to vector<10x1024xf32>
    %169 = vector.broadcast %167 : vector<1x1024xf32> to vector<10x1024xf32>
    %170 = arith.mulf %168, %169 : vector<10x1024xf32>
    %171 = arith.addf %164, %170 : vector<10x1024xf32>
    %172 = vector.broadcast %102 : vector<10x1xf32> to vector<10x1024xf32>
    %173 = arith.addf %171, %172 : vector<10x1024xf32>
    %cst_89 = arith.constant 0.000000e+00 : f32
    %174 = vector.broadcast %cst_89 : f32 to vector<10x1024xf32>
    %175 = arith.cmpf ogt, %173, %174 : vector<10x1024xf32>
    %cst_90 = arith.constant 0.00999999977 : f32
    %176 = vector.broadcast %cst_90 : f32 to vector<10x1024xf32>
    %177 = arith.mulf %176, %173 : vector<10x1024xf32>
    %178 = arith.select %175, %173, %177 : vector<10x1024xi1>, vector<10x1024xf32>
    %c0_91 = arith.constant 0 : index
    %c0_92 = arith.constant 0 : index
    %179 = vector.load %arg7[%c0_91, %c0_92] : memref<1x1xf32, #tpu.memory_space<vmem>>, vector<1x1xf32>
    %c0_93 = arith.constant 0 : index
    %c0_94 = arith.constant 0 : index
    %c0_95 = arith.constant 0 : index
    %180 = vector.load %arg6[%c0_93, %c0_94, %c0_95] : memref<10x1x1xf32, #tpu.memory_space<vmem>>, vector<1x1x1xf32>
    %181 = vector.shape_cast %180 : vector<1x1x1xf32> to vector<1x1xf32>
    %182 = vector.extract_strided_slice %178 {offsets = [0, 0], sizes = [1, 1024], strides = [1, 1]} : vector<10x1024xf32> to vector<1x1024xf32>
    %183 = vector.broadcast %181 : vector<1x1xf32> to vector<1x1024xf32>
    %184 = arith.mulf %183, %182 : vector<1x1024xf32>
    %c1_96 = arith.constant 1 : index
    %c0_97 = arith.constant 0 : index
    %c0_98 = arith.constant 0 : index
    %185 = vector.load %arg6[%c1_96, %c0_97, %c0_98] : memref<10x1x1xf32, #tpu.memory_space<vmem>>, vector<1x1x1xf32>
    %186 = vector.shape_cast %185 : vector<1x1x1xf32> to vector<1x1xf32>
    %187 = vector.extract_strided_slice %178 {offsets = [1, 0], sizes = [1, 1024], strides = [1, 1]} : vector<10x1024xf32> to vector<1x1024xf32>
    %188 = vector.broadcast %186 : vector<1x1xf32> to vector<1x1024xf32>
    %189 = arith.mulf %188, %187 : vector<1x1024xf32>
    %190 = arith.addf %184, %189 : vector<1x1024xf32>
    %c2_99 = arith.constant 2 : index
    %c0_100 = arith.constant 0 : index
    %c0_101 = arith.constant 0 : index
    %191 = vector.load %arg6[%c2_99, %c0_100, %c0_101] : memref<10x1x1xf32, #tpu.memory_space<vmem>>, vector<1x1x1xf32>
    %192 = vector.shape_cast %191 : vector<1x1x1xf32> to vector<1x1xf32>
    %193 = vector.extract_strided_slice %178 {offsets = [2, 0], sizes = [1, 1024], strides = [1, 1]} : vector<10x1024xf32> to vector<1x1024xf32>
    %194 = vector.broadcast %192 : vector<1x1xf32> to vector<1x1024xf32>
    %195 = arith.mulf %194, %193 : vector<1x1024xf32>
    %196 = arith.addf %190, %195 : vector<1x1024xf32>
    %c3_102 = arith.constant 3 : index
    %c0_103 = arith.constant 0 : index
    %c0_104 = arith.constant 0 : index
    %197 = vector.load %arg6[%c3_102, %c0_103, %c0_104] : memref<10x1x1xf32, #tpu.memory_space<vmem>>, vector<1x1x1xf32>
    %198 = vector.shape_cast %197 : vector<1x1x1xf32> to vector<1x1xf32>
    %199 = vector.extract_strided_slice %178 {offsets = [3, 0], sizes = [1, 1024], strides = [1, 1]} : vector<10x1024xf32> to vector<1x1024xf32>
    %200 = vector.broadcast %198 : vector<1x1xf32> to vector<1x1024xf32>
    %201 = arith.mulf %200, %199 : vector<1x1024xf32>
    %202 = arith.addf %196, %201 : vector<1x1024xf32>
    %c4_105 = arith.constant 4 : index
    %c0_106 = arith.constant 0 : index
    %c0_107 = arith.constant 0 : index
    %203 = vector.load %arg6[%c4_105, %c0_106, %c0_107] : memref<10x1x1xf32, #tpu.memory_space<vmem>>, vector<1x1x1xf32>
    %204 = vector.shape_cast %203 : vector<1x1x1xf32> to vector<1x1xf32>
    %205 = vector.extract_strided_slice %178 {offsets = [4, 0], sizes = [1, 1024], strides = [1, 1]} : vector<10x1024xf32> to vector<1x1024xf32>
    %206 = vector.broadcast %204 : vector<1x1xf32> to vector<1x1024xf32>
    %207 = arith.mulf %206, %205 : vector<1x1024xf32>
    %208 = arith.addf %202, %207 : vector<1x1024xf32>
    %c5_108 = arith.constant 5 : index
    %c0_109 = arith.constant 0 : index
    %c0_110 = arith.constant 0 : index
    %209 = vector.load %arg6[%c5_108, %c0_109, %c0_110] : memref<10x1x1xf32, #tpu.memory_space<vmem>>, vector<1x1x1xf32>
    %210 = vector.shape_cast %209 : vector<1x1x1xf32> to vector<1x1xf32>
    %211 = vector.extract_strided_slice %178 {offsets = [5, 0], sizes = [1, 1024], strides = [1, 1]} : vector<10x1024xf32> to vector<1x1024xf32>
    %212 = vector.broadcast %210 : vector<1x1xf32> to vector<1x1024xf32>
    %213 = arith.mulf %212, %211 : vector<1x1024xf32>
    %214 = arith.addf %208, %213 : vector<1x1024xf32>
    %c6_111 = arith.constant 6 : index
    %c0_112 = arith.constant 0 : index
    %c0_113 = arith.constant 0 : index
    %215 = vector.load %arg6[%c6_111, %c0_112, %c0_113] : memref<10x1x1xf32, #tpu.memory_space<vmem>>, vector<1x1x1xf32>
    %216 = vector.shape_cast %215 : vector<1x1x1xf32> to vector<1x1xf32>
    %217 = vector.extract_strided_slice %178 {offsets = [6, 0], sizes = [1, 1024], strides = [1, 1]} : vector<10x1024xf32> to vector<1x1024xf32>
    %218 = vector.broadcast %216 : vector<1x1xf32> to vector<1x1024xf32>
    %219 = arith.mulf %218, %217 : vector<1x1024xf32>
    %220 = arith.addf %214, %219 : vector<1x1024xf32>
    %c7_114 = arith.constant 7 : index
    %c0_115 = arith.constant 0 : index
    %c0_116 = arith.constant 0 : index
    %221 = vector.load %arg6[%c7_114, %c0_115, %c0_116] : memref<10x1x1xf32, #tpu.memory_space<vmem>>, vector<1x1x1xf32>
    %222 = vector.shape_cast %221 : vector<1x1x1xf32> to vector<1x1xf32>
    %223 = vector.extract_strided_slice %178 {offsets = [7, 0], sizes = [1, 1024], strides = [1, 1]} : vector<10x1024xf32> to vector<1x1024xf32>
    %224 = vector.broadcast %222 : vector<1x1xf32> to vector<1x1024xf32>
    %225 = arith.mulf %224, %223 : vector<1x1024xf32>
    %226 = arith.addf %220, %225 : vector<1x1024xf32>
    %c8_117 = arith.constant 8 : index
    %c0_118 = arith.constant 0 : index
    %c0_119 = arith.constant 0 : index
    %227 = vector.load %arg6[%c8_117, %c0_118, %c0_119] : memref<10x1x1xf32, #tpu.memory_space<vmem>>, vector<1x1x1xf32>
    %228 = vector.shape_cast %227 : vector<1x1x1xf32> to vector<1x1xf32>
    %229 = vector.extract_strided_slice %178 {offsets = [8, 0], sizes = [1, 1024], strides = [1, 1]} : vector<10x1024xf32> to vector<1x1024xf32>
    %230 = vector.broadcast %228 : vector<1x1xf32> to vector<1x1024xf32>
    %231 = arith.mulf %230, %229 : vector<1x1024xf32>
    %232 = arith.addf %226, %231 : vector<1x1024xf32>
    %c9_120 = arith.constant 9 : index
    %c0_121 = arith.constant 0 : index
    %c0_122 = arith.constant 0 : index
    %233 = vector.load %arg6[%c9_120, %c0_121, %c0_122] : memref<10x1x1xf32, #tpu.memory_space<vmem>>, vector<1x1x1xf32>
    %234 = vector.shape_cast %233 : vector<1x1x1xf32> to vector<1x1xf32>
    %235 = vector.extract_strided_slice %178 {offsets = [9, 0], sizes = [1, 1024], strides = [1, 1]} : vector<10x1024xf32> to vector<1x1024xf32>
    %236 = vector.broadcast %234 : vector<1x1xf32> to vector<1x1024xf32>
    %237 = arith.mulf %236, %235 : vector<1x1024xf32>
    %238 = arith.addf %232, %237 : vector<1x1024xf32>
    %239 = vector.broadcast %179 : vector<1x1xf32> to vector<1x1024xf32>
    %240 = arith.addf %238, %239 : vector<1x1024xf32>
    %cst_123 = arith.constant 0.000000e+00 : f32
    %241 = vector.broadcast %cst_123 : f32 to vector<1x1024xf32>
    %242 = arith.subf %241, %240 : vector<1x1024xf32>
    %243 = math.exp %242 : vector<1x1024xf32>
    %cst_124 = arith.constant 1.000000e+00 : f32
    %244 = vector.broadcast %cst_124 : f32 to vector<1x1024xf32>
    %245 = arith.addf %244, %243 : vector<1x1024xf32>
    %246 = tpu.reciprocal %245 {approx = true} : vector<1x1024xf32> -> vector<1x1024xf32>
    %c0_125 = arith.constant 0 : index
    %c0_126 = arith.constant 0 : index
    %247 = vector.load %arg8[%c0_125, %c0_126] : memref<1x1024xf32, #tpu.memory_space<vmem>>, vector<1x1024xf32>
    tpu.vector_store %arg8[%c0_125, %c0_126], %246 {strides = array<i32>} : memref<1x1024xf32, #tpu.memory_space<vmem>>, vector<1x1024xf32>,
    return
  }
  func.func @transform_0(%arg0: i32) -> (i32, i32) {
    %c0_i32 = arith.constant 0 : i32
    %c0_i32_0 = arith.constant 0 : i32
    return %c0_i32, %arg0 : i32, i32
  }
  func.func @transform_1(%arg0: i32) -> (i32, i32, i32) {
    %c0_i32 = arith.constant 0 : i32
    %c0_i32_0 = arith.constant 0 : i32
    %c0_i32_1 = arith.constant 0 : i32
    %c0_i32_2 = arith.constant 0 : i32
    return %c0_i32, %c0_i32_0, %c0_i32_1 : i32, i32, i32
  }
  func.func @transform_2(%arg0: i32) -> (i32, i32) {
    %c0_i32 = arith.constant 0 : i32
    %c0_i32_0 = arith.constant 0 : i32
    %c0_i32_1 = arith.constant 0 : i32
    return %c0_i32, %c0_i32_0 : i32, i32
  }
  func.func @transform_3(%arg0: i32) -> (i32, i32, i32, i32) {
    %c0_i32 = arith.constant 0 : i32
    %c0_i32_0 = arith.constant 0 : i32
    %c0_i32_1 = arith.constant 0 : i32
    %c0_i32_2 = arith.constant 0 : i32
    %c0_i32_3 = arith.constant 0 : i32
    return %c0_i32, %c0_i32_0, %c0_i32_1, %c0_i32_2 : i32, i32, i32, i32
  }
  func.func @transform_4(%arg0: i32) -> (i32, i32, i32) {
    %c0_i32 = arith.constant 0 : i32
    %c0_i32_0 = arith.constant 0 : i32
    %c0_i32_1 = arith.constant 0 : i32
    %c0_i32_2 = arith.constant 0 : i32
    return %c0_i32, %c0_i32_0, %c0_i32_1 : i32, i32, i32
  }
  func.func @transform_5(%arg0: i32) -> (i32, i32, i32) {
    %c0_i32 = arith.constant 0 : i32
    %c0_i32_0 = arith.constant 0 : i32
    %c0_i32_1 = arith.constant 0 : i32
    %c0_i32_2 = arith.constant 0 : i32
    return %c0_i32, %c0_i32_0, %c0_i32_1 : i32, i32, i32
  }
  func.func @transform_6(%arg0: i32) -> (i32, i32) {
    %c0_i32 = arith.constant 0 : i32
    %c0_i32_0 = arith.constant 0 : i32
    %c0_i32_1 = arith.constant 0 : i32
    return %c0_i32, %c0_i32_0 : i32, i32
  }
  func.func @transform_7(%arg0: i32) -> (i32, i32) {
    %c0_i32 = arith.constant 0 : i32
    %c0_i32_0 = arith.constant 0 : i32
    return %c0_i32, %arg0 : i32, i32
  }
}

</mosaic_0001>

<bundles_post_ra>
// kernel: tpu_custom_call.1
= control target key start
LH: loop header
LB: loop body
LE: loop exit
PB: predicated region body
PF: predicated region fallthrough
CT: control target
= control target key end

     0   :  { %s4586_s0 = inlined_call_operand.vmem [shape: f32[2,1024], index: 0, kind: input, shape index: {}]   ;;  %s4587_s1 = inlined_call_operand.vmem [shape: f32[2,10,1], index: 1, kind: input, shape index: {}]   ;;  %s4588_s2 = inlined_call_operand.vmem [shape: f32[10,1], index: 2, kind: input, shape index: {}]   ;;  %s4589_s3 = inlined_call_operand.vmem [shape: f32[2,10,10,1], index: 3, kind: input, shape index: {}]   ;;  %s4590_s4 = inlined_call_operand.vmem [shape: f32[2,10,1], index: 4, kind: input, shape index: {}]   ;;  %s4591_s5 = inlined_call_operand.vmem [shape: f32[10,1,1], index: 5, kind: input, shape index: {}]   ;;  %s4592_s6 = inlined_call_operand.<no memory space> [shape: f32[1,1], index: 6, kind: input, shape index: {}]   ;;  %s4593_s7 = inlined_call_operand.hbm [shape: f32[1,1024], index: 7, kind: output, shape index: {}]  }
   0x1   :  { %v12_v0 = vstv %s4592_s6 }
   0x2   :  { %13 = vst [vmem:[#allocation2] sm:$0x1] %v12_v0 }
   0x3   :  { %v2602_v1 = vld [vmem:[%s4587_s1 + $0x10] sm:$0xff]  ;;  %v33_v2 = vld [vmem:[%s4587_s1] sm:$0xff]  ;;  %v2776_v3 = vmov 0   ;;  %v2603_v4 = vld [vmem:[%s4587_s1 + $0x18] sm:$0x3] }
   0x4   :  { %2657 = vset.pattern.permute.xlu1 %v2776_v3  ;;  %2656 = vset.pattern.permute.xlu0 %v2776_v3  ;;  %v34_v5 = vld [vmem:[%s4587_s1 + $0x8] sm:$0x3]  ;;  %v31_v7 = vld [vmem:[%s4588_s2] sm:$0xff]  ;;  %v2605_v10 = vld [vmem:[%s4589_s3 + $0x18] sm:$0x3] }
   0x5   :  { %140 = vperm.xlu1 %2657, %v2602_v1   ;;  %37 = vperm.xlu0 %2656, %v33_v2   ;;  %v32_v6 = vld [vmem:[%s4588_s2 + $0x8] sm:$0x3]  ;;  %v360_v9 = vld [vmem:[%s4589_s3] sm:$0xff]  ;;  %v2604_v11 = vld [vmem:[%s4589_s3 + $0x10] sm:$0xff] }
   0x6   :  { %v361_v8 = vld [vmem:[%s4589_s3 + $0x8] sm:$0x3]  ;;  %v2606_v13 = vld [vmem:[%s4589_s3 + $0x20] sm:$0xff] }
   0x7   :  { %v2607_v12 = vld [vmem:[%s4589_s3 + $0x28] sm:$0x3] }
   0x9   :  { %145 = vperm.xlu1 %2657, %v2603_v4   ;;  %42 = vperm.xlu0 %2656, %v34_v5  }
   0xd   :  { %259 = vperm.xlu1 %2657, %v32_v6   ;;  %254 = vperm.xlu0 %2656, %v31_v7  }
  0x11   :  { %369 = vperm.xlu1 %2657, %v361_v8   ;;  %364 = vperm.xlu0 %2656, %v360_v9  }
  0x15   :  { %430 = vperm.xlu1 %2657, %v2605_v10   ;;  %425 = vperm.xlu0 %2656, %v2604_v11  }
  0x16   :  { %14 = vsyncpa [#allocation4], 0  ;;  %v2609_v14 = vld [vmem:[%s4589_s3 + $0x38] sm:$0x3]  ;;  %v2608_v15 = vld [vmem:[%s4589_s3 + $0x30] sm:$0xff]  ;;  %v47_v56 = vlaneseq }
  0x17   :  { %v2611_v16 = vld [vmem:[%s4589_s3 + $0x48] sm:$0x3]  ;;  %v2610_v17 = vld [vmem:[%s4589_s3 + $0x40] sm:$0xff]  ;;  %v2613_v18 = vld [vmem:[%s4589_s3 + $0x58] sm:$0x3] }
  0x18   :  { %v2612_v19 = vld [vmem:[%s4589_s3 + $0x50] sm:$0xff]  ;;  %v2614_v21 = vld [vmem:[%s4589_s3 + $0x60] sm:$0xff]  ;;  %v2615_v24 = vld [vmem:[%s4589_s3 + $0x68] sm:$0x3]  ;;  %v2990_v59 = vshrl.u32 %v47_v56, 7 }
  0x19   :  { %507 = vperm.xlu1 %2657, %v2607_v12   ;;  %502 = vperm.xlu0 %2656, %v2606_v13   ;;  %v2616_v20 = vld [vmem:[%s4589_s3 + $0x70] sm:$0xff]  ;;  %v2618_v23 = vld [vmem:[%s4589_s3 + $0x80] sm:$0xff]  ;;  %v2617_v27 = vld [vmem:[%s4589_s3 + $0x78] sm:$0x3] }
  0x1a   :  { %v2620_v22 = vld [vmem:[%s4589_s3 + $0x90] sm:$0xff]  ;;  %v358_v25 = vld [vmem:[%s4590_s4] sm:$0xff]  ;;  %v2619_v28 = vld [vmem:[%s4589_s3 + $0x88] sm:$0x3]  ;;  %4717 = vst [vmem:[#allocation6_spill] sm:$0xff] %v2990_v59  ;;  %v2999_v62 = vsub.s32 1, %v2990_v59 }
  0x1b   :  { %v2624_v26 = vld [vmem:[%s4589_s3 + $0xa0] sm:$0xff]  ;;  %v2626_v29 = vld [vmem:[%s4589_s3 + $0xb0] sm:$0xff]  ;;  %v2621_v30 = vld [vmem:[%s4589_s3 + $0x98] sm:$0x3]  ;;  %v3008_v1 = vsub.s32 3, %v2990_v59  ;;  %v3011_v2 = vsub.s32 5, %v2990_v59 }
  0x1c   :  { %v2628_v31 = vld [vmem:[%s4589_s3 + $0xc0] sm:$0xff]  ;;  %v2630_v33 = vld [vmem:[%s4589_s3 + $0xd0] sm:$0xff]  ;;  %v359_v35 = vld [vmem:[%s4590_s4 + $0x8] sm:$0x3]  ;;  %4718 = vst [vmem:[#allocation7_spill] sm:$0xff] %v2999_v62  ;;  %v3014_v3 = vsub.s32 7, %v2990_v59 }
  0x1d   :  { %584 = vperm.xlu1 %2657, %v2609_v14   ;;  %579 = vperm.xlu0 %2656, %v2608_v15   ;;  %v2632_v32 = vld [vmem:[%s4589_s3 + $0xe0] sm:$0xff]  ;;  %v2634_v34 = vld [vmem:[%s4589_s3 + $0xf0] sm:$0xff]  ;;  %v2625_v38 = vld [vmem:[%s4589_s3 + $0xa8] sm:$0x3]  ;;  %4719 = vst [vmem:[#allocation8_spill] sm:$0xff] %v3008_v1  ;;  %v3020_v5 = vsub.s32 0, %v2990_v59 }
  0x1e   :  { %v2638_v36 = vld [vmem:[%s4589_s3 + $0x110] sm:$0xff]  ;;  %v2636_v37 = vld [vmem:[%s4589_s3 + $0x100] sm:$0xff]  ;;  %v2627_v41 = vld [vmem:[%s4589_s3 + $0xb8] sm:$0x3]  ;;  %4720 = vst [vmem:[#allocation9_spill] sm:$0xff] %v3011_v2  ;;  %v3026_v7 = vsub.s32 2, %v2990_v59 }
  0x1f   :  { %v2640_v39 = vld [vmem:[%s4589_s3 + $0x120] sm:$0xff]  ;;  %v2642_v40 = vld [vmem:[%s4589_s3 + $0x130] sm:$0xff]  ;;  %v2631_v42 = vld [vmem:[%s4589_s3 + $0xd8] sm:$0x3]  ;;  %4721 = vst [vmem:[#allocation10_spill] sm:$0xff] %v3014_v3  ;;  %v3029_v8 = vsub.s32 4, %v2990_v59 }
  0x20   :  { %v2629_v43 = vld [vmem:[%s4589_s3 + $0xc8] sm:$0x3]  ;;  %v2622_v45 = vld [vmem:[%s4590_s4 + $0x10] sm:$0xff]  ;;  %v2635_v46 = vld [vmem:[%s4589_s3 + $0xf8] sm:$0x3]  ;;  %4722 = vst [vmem:[#allocation11_spill] sm:$0xff] %v3020_v5 }
  0x21   :  { %661 = vperm.xlu1 %2657, %v2611_v16   ;;  %656 = vperm.xlu0 %2656, %v2610_v17   ;;  %v2633_v44 = vld [vmem:[%s4589_s3 + $0xe8] sm:$0x3]  ;;  %v2644_v47 = vld [vmem:[%s4591_s5 + $0x1] sm:$0x1]  ;;  %v2645_v48 = vld [vmem:[%s4591_s5 + $0x2] sm:$0x1] }
  0x22   :  { %v2019_v49 = vld [vmem:[%s4591_s5] sm:$0x1]  ;;  %v2646_v50 = vld [vmem:[%s4591_s5 + $0x3] sm:$0x1]  ;;  %v2637_v51 = vld [vmem:[%s4589_s3 + $0x108] sm:$0x3] }
  0x23   :  { %v2647_v52 = vld [vmem:[%s4591_s5 + $0x4] sm:$0x1]  ;;  %v2639_v53 = vld [vmem:[%s4589_s3 + $0x118] sm:$0x3]  ;;  %v2648_v54 = vld [vmem:[%s4591_s5 + $0x5] sm:$0x1] }
  0x24   :  { %v2641_v55 = vld [vmem:[%s4589_s3 + $0x128] sm:$0x3]  ;;  %v2649_v57 = vld [vmem:[%s4591_s5 + $0x6] sm:$0x1]  ;;  %v2643_v58 = vld [vmem:[%s4589_s3 + $0x138] sm:$0x3] }
  0x25   :  { %738 = vperm.xlu1 %2657, %v2613_v18   ;;  %733 = vperm.xlu0 %2656, %v2612_v19   ;;  %v2623_v60 = vld [vmem:[%s4590_s4 + $0x18] sm:$0x3]  ;;  %v2650_v61 = vld [vmem:[%s4591_s5 + $0x7] sm:$0x1]  ;;  %v2652_v63 = vld [vmem:[%s4591_s5 + $0x9] sm:$0x1] }
  0x26   :  { %v2651_v0 = vld [vmem:[%s4591_s5 + $0x8] sm:$0x1]  ;;  %v29_v4 = vld [vmem:[%s4586_s0] sm:$0xff]  ;;  %4723 = vst [vmem:[#allocation12_spill] sm:$0xff] %v3026_v7  ;;  %4724 = vst [vmem:[#allocation13_spill] sm:$0xff] %v3029_v8  ;;  %v3032_v9 = vsub.s32 6, %v2990_v59 }
  0x27   :  { %v30_v6 = vld [vmem:[%s4586_s0 + $0x8] sm:$0xff]  ;;  %v2018_v10 = vld [vmem:[#allocation2] sm:$0x1]  ;;  %v151_v11 = vrot.slane %v29_v4, %v2999_v62  ;;  %v155_v12 = vrot.slane %v29_v4, %v3008_v1  ;;  %v159_v13 = vrot.slane %v29_v4, %v3011_v2  ;;  %v163_v14 = vrot.slane %v29_v4, %v3014_v3  ;;  %s2778_s0 = smov [#allocation3]  }
  0x28   :  { %4725 = vst [vmem:[#allocation14_spill] sm:$0xff] %v3032_v9  ;;  %v167_v15 = vrot.slane %v30_v6, %v2999_v62  ;;  %v171_v16 = vrot.slane %v30_v6, %v3008_v1  ;;  %v50_v17 = vrot.slane %v29_v4, %v3020_v5  ;;  %v54_v18 = vrot.slane %v29_v4, %v3026_v7  ;;  %s2594_s5 = sshll.u32 %s2778_s0, 4  ;;  %s2595_s5 = int_to_ptr.vmem [resolvable:$true] %s2594_s5 }
  0x29   :  { %887 = vperm.xlu1 %2657, %v2616_v20   ;;  %810 = vperm.xlu0 %2656, %v2614_v21   ;;  %v58_v19 = vrot.slane %v29_v4, %v3029_v8  ;;  %v62_v20 = vrot.slane %v29_v4, %v3032_v9  ;;  %v66_v21 = vrot.slane %v30_v6, %v3020_v5  ;;  %s2754_s19 = scalar_lea.vmem %s2595_s5, 128  ;;  %p2759_p1 = scmp.lt.s32.totalorder %s2595_s5, %s2595_s5 }
  0x2a   :  { %p2755_p0 = scmp.ne.s32.totalorder %s2595_s5, %s2754_s19  ;;  %p2760_p2 = scmp.lt.s32.totalorder %s2754_s19, %s2754_s19 }
  0x2c   :  { %p2761_p3 = por %p2760_p2, %p2759_p1 }
  0x2d   :  { %1041 = vperm.xlu1 %2657, %v2620_v22   ;;  %964 = vperm.xlu0 %2656, %v2618_v23   ;;  %v175_v22 = vrot.slane %v30_v6, %v3011_v2  ;;  %v179_v23 = vrot.slane %v30_v6, %v3014_v3 }
  0x2e   :  { %p2762_p4 = pnand %p2761_p3, %p2755_p0 }
  0x31   :  { %815 = vperm.xlu1 %2657, %v2615_v24   ;;  %1115 = vperm.xlu0 %2656, %v358_v25   ;;  %v70_v24 = vrot.slane %v30_v6, %v3026_v7  ;;  %v74_v25 = vrot.slane %v30_v6, %v3029_v8 }
  0x35   :  { %1195 = vperm.xlu1 %2657, %v2624_v26   ;;  %892 = vperm.xlu0 %2656, %v2617_v27   ;;  %v191_v26 = vrot.slane %v151_v11, %v2999_v62  ;;  %v195_v27 = vrot.slane %v155_v12, %v2999_v62 }
  0x39   :  { %969 = vperm.xlu1 %2657, %v2619_v28   ;;  %1256 = vperm.xlu0 %2656, %v2626_v29   ;;  %v199_v28 = vrot.slane %v159_v13, %v2999_v62  ;;  %v78_v29 = vrot.slane %v30_v6, %v3032_v9 }
  0x3d   :  { %1046 = vperm.xlu1 %2657, %v2621_v30   ;;  %1333 = vperm.xlu0 %2656, %v2628_v31   ;;  %v203_v30 = vrot.slane %v163_v14, %v2999_v62  ;;  %v207_v31 = vrot.slane %v167_v15, %v2999_v62 }
  0x41   :  { %1487 = vperm.xlu1 %2657, %v2632_v32   ;;  %1410 = vperm.xlu0 %2656, %v2630_v33   ;;  %v211_v32 = vrot.slane %v171_v16, %v2999_v62  ;;  %v90_v33 = vrot.slane %v50_v17, %v3020_v5 }
  0x45   :  { %1564 = vperm.xlu1 %2657, %v2634_v34   ;;  %1120 = vperm.xlu0 %2656, %v359_v35  }
  0x49   :  { %1718 = vperm.xlu1 %2657, %v2638_v36   ;;  %1641 = vperm.xlu0 %2656, %v2636_v37   ;;  %v94_v36 = vrot.slane %v54_v18, %v3020_v5  ;;  %v98_v37 = vrot.slane %v58_v19, %v3020_v5 }
  0x4d   :  { %1200 = vperm.xlu1 %2657, %v2625_v38   ;;  %1795 = vperm.xlu0 %2656, %v2640_v39   ;;  %v102_v38 = vrot.slane %v62_v20, %v3020_v5  ;;  %v106_v39 = vrot.slane %v66_v21, %v3020_v5 }
  0x51   :  { %1872 = vperm.xlu1 %2657, %v2642_v40   ;;  %1261 = vperm.xlu0 %2656, %v2627_v41   ;;  %v3066_v40 = vrot.slane %v175_v22, %v2999_v62  ;;  %v3069_v41 = vrot.slane %v179_v23, %v2999_v62 }
  0x55   :  { %1415 = vperm.xlu1 %2657, %v2631_v42   ;;  %1338 = vperm.xlu0 %2656, %v2629_v43   ;;  %v110_v42 = vrot.slane %v70_v24, %v3020_v5  ;;  %v3073_v43 = vrot.slane %v74_v25, %v3020_v5 }
  0x59   :  { %1492 = vperm.xlu1 %2657, %v2633_v44   ;;  %1946 = vperm.xlu0 %2656, %v2622_v45  }
  0x5d   :  { %1569 = vperm.xlu1 %2657, %v2635_v46   ;;  %2041 = vperm.xlu0 %2656, %v2644_v47   ;;  %v3085_v47 = vrot.slane %v78_v29, %v3020_v5 }
  0x61   :  { %2092 = vperm.xlu1 %2657, %v2645_v48   ;;  %2022 = vperm.xlu0 %2656, %v2019_v49  }
  0x65   :  { %2143 = vperm.xlu1 %2657, %v2646_v50   ;;  %1646 = vperm.xlu0 %2656, %v2637_v51  }
  0x69   :  { %2194 = vperm.xlu1 %2657, %v2647_v52   ;;  %1723 = vperm.xlu0 %2656, %v2639_v53  }
  0x6d   :  { %2245 = vperm.xlu1 %2657, %v2648_v54   ;;  %1800 = vperm.xlu0 %2656, %v2641_v55  }
  0x71   :  { %2296 = vperm.xlu1 %2657, %v2649_v57   ;;  %1877 = vperm.xlu0 %2656, %v2643_v58  }
  0x75   :  { %1951 = vperm.xlu1 %2657, %v2623_v60   ;;  %2347 = vperm.xlu0 %2656, %v2650_v61  }
  0x79   :  { %2425 = vperm.xlu1 %2657, %v2652_v63   ;;  %2398 = vperm.xlu0 %2656, %v2651_v0  }
  0x7d   :  { %2474 = vperm.xlu0 %2656, %v2018_v10  }
  0x80   :  { %v3057_v34 = vpop.permute.xlu1 %140  ;;  %v3059_v35 = vpop.permute.xlu0 %37 }
  0x81   :  { %v3076_v44 = vmul.f32 %v191_v26, %v3057_v34  ;;  %v3079_v45 = vmul.f32 %v195_v27, %v3057_v34  ;;  %v3082_v46 = vmul.f32 %v199_v28, %v3057_v34  ;;  %v3088_v48 = vmul.f32 %v203_v30, %v3057_v34 }
  0x82   :  { %v3091_v49 = vmul.f32 %v207_v31, %v3057_v34  ;;  %v3094_v50 = vmul.f32 %v211_v32, %v3057_v34  ;;  %v119_v51 = vmul.f32 %v90_v33, %v3059_v35  ;;  %v120_v52 = vmul.f32 %v94_v36, %v3059_v35 }
  0x83   :  { %v3099_v53 = vmul.f32 %v98_v37, %v3059_v35  ;;  %v3102_v54 = vmul.f32 %v102_v38, %v3059_v35  ;;  %v3105_v55 = vmul.f32 %v106_v39, %v3059_v35 }
  0x84   :  { %v146_v56 = vpop.permute.xlu1 %145  ;;  %v43_v57 = vpop.permute.xlu0 %42 }
  0x85   :  { %v228_v58 = vmul.f32 %v191_v26, %v146_v56  ;;  %v229_v60 = vmul.f32 %v195_v27, %v146_v56  ;;  %v230_v61 = vmul.f32 %v199_v28, %v146_v56  ;;  %v231_v63 = vmul.f32 %v203_v30, %v146_v56 }
  0x86   :  { %v232_v0 = vmul.f32 %v207_v31, %v146_v56  ;;  %v233_v4 = vmul.f32 %v211_v32, %v146_v56  ;;  %v234_v6 = vmul.f32 %v3066_v40, %v146_v56  ;;  %v235_v10 = vmul.f32 %v3069_v41, %v146_v56 }
  0x87   :  { %v127_v11 = vmul.f32 %v90_v33, %v43_v57  ;;  %v128_v12 = vmul.f32 %v94_v36, %v43_v57  ;;  %v129_v13 = vmul.f32 %v98_v37, %v43_v57  ;;  %v130_v14 = vmul.f32 %v102_v38, %v43_v57 }
  0x88   :  { %v131_v15 = vmul.f32 %v106_v39, %v43_v57  ;;  %v132_v16 = vmul.f32 %v110_v42, %v43_v57  ;;  %v133_v17 = vmul.f32 %v3073_v43, %v43_v57  ;;  %v134_v18 = vmul.f32 %v3085_v47, %v43_v57  ;;  %v260_v19 = vpop.permute.xlu1 %259  ;;  %v3111_v20 = vpop.permute.xlu0 %254 }
  0x89   :  { %v244_v21 = vadd.f32 %v228_v58, %v127_v11  ;;  %v245_v22 = vadd.f32 %v229_v60, %v128_v12  ;;  %v246_v23 = vadd.f32 %v230_v61, %v129_v13  ;;  %v247_v24 = vadd.f32 %v231_v63, %v130_v14 }
  0x8a   :  { %v248_v25 = vadd.f32 %v232_v0, %v131_v15  ;;  %v249_v26 = vadd.f32 %v233_v4, %v132_v16  ;;  %v250_v27 = vadd.f32 %v234_v6, %v133_v17  ;;  %v251_v28 = vadd.f32 %v235_v10, %v134_v18 }
  0x8b   :  { %v270_v29 = vadd.f32 %v260_v19, %v244_v21  ;;  %v271_v30 = vadd.f32 %v260_v19, %v245_v22  ;;  %v272_v31 = vadd.f32 %v260_v19, %v246_v23  ;;  %v273_v32 = vadd.f32 %v260_v19, %v247_v24 }
  0x8c   :  { %v274_v33 = vadd.f32 %v260_v19, %v248_v25  ;;  %v275_v36 = vadd.f32 %v260_v19, %v249_v26  ;;  %v276_v37 = vadd.f32 %v260_v19, %v250_v27  ;;  %v277_v38 = vadd.f32 %v260_v19, %v251_v28  ;;  %v3113_v39 = vpop.permute.xlu1 %369  ;;  %v3115_v56 = vpop.permute.xlu0 %364 }
  0x8d   :  { %v286_v57 = vsub.f32 0.0, %v270_v29  ;;  %v287_v58 = vsub.f32 0.0, %v271_v30  ;;  %v288_v60 = vsub.f32 0.0, %v272_v31  ;;  %v289_v61 = vsub.f32 0.0, %v273_v32 }
  0x8e   :  { %v290_v63 = vsub.f32 0.0, %v274_v33  ;;  %v291_v0 = vsub.f32 0.0, %v275_v36  ;;  %v292_v4 = vsub.f32 0.0, %v276_v37  ;;  %v293_v6 = vsub.f32 0.0, %v277_v38 }
  0x8f   :  { %v124_v10 = vmul.f32 %v110_v42, %v3059_v35  ;;  %v310_v11 = vmul.f32 1.442695, %v286_v57  ;;  %v312_v12 = vmul.f32 1.442695, %v287_v58  ;;  %v314_v13 = vmul.f32 1.442695, %v288_v60 }
  0x90   :  { %v316_v14 = vmul.f32 1.442695, %v289_v61  ;;  %v318_v15 = vmul.f32 1.442695, %v290_v63  ;;  %v236_v16 = vadd.f32 %v3076_v44, %v119_v51  ;;  %v3119_v17 = vpop.permute.xlu1 %430  ;;  %v320_v18 = vmul.f32 1.442695, %v291_v0  ;;  %v3122_v22 = vpop.permute.xlu0 %425 }
  0x91   :  { %2658 = vpow2.f32 %v310_v11  ;;  %v322_v19 = vmul.f32 1.442695, %v292_v4  ;;  %v237_v21 = vadd.f32 %v3079_v45, %v120_v52  ;;  %v324_v23 = vmul.f32 1.442695, %v293_v6 }
  0x92   :  { %2660 = vpow2.f32 %v312_v12  ;;  %v238_v42 = vadd.f32 %v3082_v46, %v3099_v53  ;;  %v239_v24 = vadd.f32 %v3088_v48, %v3102_v54  ;;  %v240_v44 = vadd.f32 %v3091_v49, %v3105_v55 }
  0x93   :  { %2662 = vpow2.f32 %v314_v13  ;;  %v241_v51 = vadd.f32 %v3094_v50, %v124_v10  ;;  %v262_v25 = vadd.f32 %v3111_v20, %v236_v16  ;;  %v263_v45 = vadd.f32 %v3111_v20, %v237_v21 }
  0x94   :  { %2664 = vpow2.f32 %v316_v14  ;;  %v264_v52 = vadd.f32 %v3111_v20, %v238_v42  ;;  %v265_v26 = vadd.f32 %v3111_v20, %v239_v24  ;;  %v3135_v27 = vpop.permute.xlu1 %507  ;;  %v226_v46 = vmul.f32 %v3066_v40, %v3057_v34  ;;  %v3143_v30 = vpop.permute.xlu0 %502 }
  0x95   :  { %2666 = vpow2.f32 %v318_v15  ;;  %v266_v48 = vadd.f32 %v3111_v20, %v240_v44  ;;  %v267_v49 = vadd.f32 %v3111_v20, %v241_v51  ;;  %v125_v50 = vmul.f32 %v3073_v43, %v3059_v35 }
  0x96   :  { %2668 = vpow2.f32 %v320_v18  ;;  %v278_v53 = vsub.f32 0.0, %v262_v25  ;;  %v279_v54 = vsub.f32 0.0, %v263_v45  ;;  %v280_v55 = vsub.f32 0.0, %v264_v52 }
  0x97   :  { %2670 = vpow2.f32 %v322_v19  ;;  %v281_v28 = vsub.f32 0.0, %v265_v26  ;;  %v282_v29 = vsub.f32 0.0, %v266_v48  ;;  %v227_v40 = vmul.f32 %v3069_v41, %v3057_v34 }
  0x98   :  { %v126_v31 = vmul.f32 %v3085_v47, %v3059_v35  ;;  %2672 = vpow2.f32 %v324_v23  ;;  %v283_v32 = vsub.f32 0.0, %v267_v49  ;;  %v3149_v33 = vpop.permute.xlu1 %584  ;;  %v294_v43 = vmul.f32 1.442695, %v278_v53  ;;  %v3154_v35 = vpop.permute.xlu0 %579 }
  0x99   :  { %v296_v36 = vmul.f32 1.442695, %v279_v54  ;;  %v298_v37 = vmul.f32 1.442695, %v280_v55  ;;  %v300_v38 = vmul.f32 1.442695, %v281_v28  ;;  %v242_v57 = vadd.f32 %v226_v46, %v125_v50 }
  0x9a   :  { %2674 = vpow2.f32 %v294_v43  ;;  %v302_v58 = vmul.f32 1.442695, %v282_v29  ;;  %v243_v60 = vadd.f32 %v227_v40, %v126_v31  ;;  %v304_v61 = vmul.f32 1.442695, %v283_v32 }
  0x9b   :  { %2676 = vpow2.f32 %v296_v36  ;;  %v268_v34 = vadd.f32 %v3111_v20, %v242_v57 }
  0x9c   :  { %v3151_v63 = vpop.permute.xlu1 %661  ;;  %2678 = vpow2.f32 %v298_v37  ;;  %v269_v47 = vadd.f32 %v3111_v20, %v243_v60  ;;  %v3159_v20 = vpop.permute.xlu0 %656 }
  0x9d   :  { %2680 = vpow2.f32 %v300_v38  ;;  %v284_v14 = vsub.f32 0.0, %v268_v34 }
  0x9e   :  { %v2659_v41 = vpop.eup %2658  ;;  %2682 = vpow2.f32 %v302_v58  ;;  %v285_v18 = vsub.f32 0.0, %v269_v47 }
  0x9f   :  { %v2661_v0 = vpop.eup %2660  ;;  %v334_v4 = vadd.f32 1.0, %v2659_v41  ;;  %2684 = vpow2.f32 %v304_v61  ;;  %v306_v25 = vmul.f32 1.442695, %v284_v14 }
  0xa0   :  { %v2663_v6 = vpop.eup %2662  ;;  %v335_v10 = vadd.f32 1.0, %v2661_v0  ;;  %v3157_v11 = vpop.permute.xlu1 %738  ;;  %v308_v52 = vmul.f32 1.442695, %v285_v18 }
  0xa1   :  { %v2665_v12 = vpop.eup %2664  ;;  %v336_v13 = vadd.f32 1.0, %v2663_v6  ;;  %2686 = vrcp.f32 %v334_v4  ;;  %v3165_v50 = vpop.permute.xlu0 %733 }
  0xa2   :  { %v2667_v15 = vpop.eup %2666  ;;  %v337_v16 = vadd.f32 1.0, %v2665_v12  ;;  %2688 = vrcp.f32 %v335_v10 }
  0xa3   :  { %v2669_v19 = vpop.eup %2668  ;;  %v338_v21 = vadd.f32 1.0, %v2667_v15  ;;  %2690 = vrcp.f32 %v336_v13 }
  0xa4   :  { %v2671_v23 = vpop.eup %2670  ;;  %v339_v42 = vadd.f32 1.0, %v2669_v19  ;;  %2692 = vrcp.f32 %v337_v16  ;;  %v3161_v24 = vpop.permute.xlu1 %887 }
  0xa5   :  { %4726 = vst [vmem:[#allocation15_spill] sm:$0xff] %v3161_v24  ;;  %v2673_v44 = vpop.eup %2672  ;;  %v340_v51 = vadd.f32 1.0, %v2671_v23  ;;  %2694 = vrcp.f32 %v338_v21  ;;  %v3169_v57 = vpop.permute.xlu0 %810 }
  0xa6   :  { %v341_v45 = vadd.f32 1.0, %v2673_v44  ;;  %2696 = vrcp.f32 %v339_v42  ;;  %4728 = vst [vmem:[#allocation17_spill] sm:$0xff] %v3169_v57 }
  0xa7   :  { %2698 = vrcp.f32 %v340_v51  ;;  %v2675_v26 = vpop.eup %2674 }
  0xa8   :  { %2700 = vrcp.f32 %v341_v45  ;;  %v3163_v46 = vpop.permute.xlu1 %1041  ;;  %v2677_v48 = vpop.eup %2676  ;;  %v326_v49 = vadd.f32 1.0, %v2675_v26 }
  0xa9   :  { %2702 = vpow2.f32 %v306_v25  ;;  %v2679_v53 = vpop.eup %2678  ;;  %v327_v54 = vadd.f32 1.0, %v2677_v48  ;;  %v965_v19 = vpop.permute.xlu0 %964 }
  0xaa   :  { %2704 = vpow2.f32 %v308_v52  ;;  %v2681_v55 = vpop.eup %2680  ;;  %v328_v28 = vadd.f32 1.0, %v2679_v53 }
  0xab   :  { %2706 = vrcp.f32 %v326_v49  ;;  %v2683_v29 = vpop.eup %2682  ;;  %v329_v40 = vadd.f32 1.0, %v2681_v55 }
  0xac   :  { %2708 = vrcp.f32 %v327_v54  ;;  %v3167_v31 = vpop.permute.xlu1 %815  ;;  %v2685_v32 = vpop.eup %2684  ;;  %v330_v43 = vadd.f32 1.0, %v2683_v29 }
  0xad   :  { %4727 = vst [vmem:[#allocation16_spill] sm:$0xff] %v3167_v31  ;;  %2710 = vrcp.f32 %v328_v28  ;;  %v331_v37 = vadd.f32 1.0, %v2685_v32 }
  0xae   :  { %v2687_v36 = vpop.eup %2686  ;;  %2712 = vrcp.f32 %v329_v40 }
  0xaf   :  { %v2689_v38 = vpop.eup %2688  ;;  %2714 = vrcp.f32 %v330_v43  ;;  %v3172_v61 = vrot.slane %v2687_v36, %v2999_v62  ;;  %v975_v47 = vrot.slane %v2687_v36, %v3020_v5 }
  0xb0   :  { %v2691_v58 = vpop.eup %2690  ;;  %2716 = vrcp.f32 %v331_v37  ;;  %v3175_v41 = vrot.slane %v2689_v38, %v2999_v62  ;;  %v979_v0 = vrot.slane %v2689_v38, %v3020_v5  ;;  %v3179_v4 = vpop.permute.xlu1 %1195 }
  0xb1   :  { %v2693_v60 = vpop.eup %2692  ;;  %4729 = vst [vmem:[#allocation18_spill] sm:$0xff] %v3172_v61  ;;  %4731 = vst [vmem:[#allocation20_spill] sm:$0xff] %v3179_v4  ;;  %v3182_v12 = vrot.slane %v2691_v58, %v2999_v62  ;;  %v3188_v14 = vrot.slane %v2691_v58, %v3020_v5  ;;  %v3195_v18 = vmul.f32 %v3172_v61, %v3163_v46 }
  0xb2   :  { %v2695_v34 = vpop.eup %2694  ;;  %4730 = vst [vmem:[#allocation19_spill] sm:$0xff] %v3175_v41  ;;  %v3185_v13 = vrot.slane %v2693_v60, %v2999_v62  ;;  %v3198_v21 = vrot.slane %v2693_v60, %v3020_v5  ;;  %v3208_v51 = vmul.f32 %v3175_v41, %v3163_v46  ;;  %v3210_v25 = vmul.f32 %v975_v47, %v965_v19 }
  0xb3   :  { %v2697_v6 = vpop.eup %2696  ;;  %4732 = vst [vmem:[#allocation21_spill] sm:$0xff] %v3182_v12  ;;  %4734 = vst [vmem:[#allocation23_spill] sm:$0xff] %v3188_v14  ;;  %v3191_v16 = vrot.slane %v2695_v34, %v2999_v62  ;;  %v3201_v23 = vrot.slane %v2695_v34, %v3020_v5  ;;  %v3212_v45 = vmul.f32 %v979_v0, %v965_v19 }
  0xb4   :  { %v2699_v10 = vpop.eup %2698  ;;  %4733 = vst [vmem:[#allocation22_spill] sm:$0xff] %v3185_v13  ;;  %4736 = vst [vmem:[#allocation25_spill] sm:$0xff] %v3195_v18  ;;  %v3204_v44 = vrot.slane %v2697_v6, %v2999_v62  ;;  %v3218_v49 = vrot.slane %v2697_v6, %v3020_v5  ;;  %v3227_v28 = vmul.f32 %v3182_v12, %v3163_v46  ;;  %v3236_v32 = vpop.permute.xlu1 %969 }
  0xb5   :  { %v2701_v15 = vpop.eup %2700  ;;  %4735 = vst [vmem:[#allocation24_spill] sm:$0xff] %v3191_v16  ;;  %4737 = vst [vmem:[#allocation26_spill] sm:$0xff] %v3198_v21  ;;  %v3215_v48 = vrot.slane %v2699_v10, %v2999_v62  ;;  %v3221_v53 = vrot.slane %v2699_v10, %v3020_v5  ;;  %v3231_v29 = vmul.f32 %v3185_v13, %v3163_v46 }
  0xb6   :  { %4738 = vst [vmem:[#allocation27_spill] sm:$0xff] %v3201_v23  ;;  %v2703_v42 = vpop.eup %2702  ;;  %4739 = vst [vmem:[#allocation28_spill] sm:$0xff] %v3204_v44  ;;  %v3234_v40 = vmul.f32 %v3188_v14, %v965_v19  ;;  %v3242_v36 = vmul.f32 %v3191_v16, %v3163_v46  ;;  %v3245_v37 = vmul.f32 %v3198_v21, %v965_v19 }
  0xb7   :  { %4740 = vst [vmem:[#allocation29_spill] sm:$0xff] %v3208_v51  ;;  %4741 = vst [vmem:[#allocation30_spill] sm:$0xff] %v3210_v25  ;;  %v2705_v52 = vpop.eup %2704  ;;  %v332_v26 = vadd.f32 1.0, %v2703_v42  ;;  %v3248_v38 = vmul.f32 %v3201_v23, %v965_v19  ;;  %v3253_v60 = vrot.slane %v2701_v15, %v2999_v62  ;;  %v3257_v34 = vmul.f32 %v3204_v44, %v3163_v46 }
  0xb8   :  { %4742 = vst [vmem:[#allocation31_spill] sm:$0xff] %v3212_v45  ;;  %4743 = vst [vmem:[#allocation32_spill] sm:$0xff] %v3215_v48  ;;  %v3223_v54 = vpop.eup %2706  ;;  %v333_v55 = vadd.f32 1.0, %v2705_v52  ;;  %v3260_v6 = vrot.slane %v2701_v15, %v3020_v5  ;;  %v3266_v42 = vmul.f32 %v3215_v48, %v3163_v46  ;;  %v3269_v52 = vmul.f32 %v3218_v49, %v965_v19 }
  0xb9   :  { %4744 = vst [vmem:[#allocation33_spill] sm:$0xff] %v3218_v49  ;;  %4745 = vst [vmem:[#allocation34_spill] sm:$0xff] %v3221_v53  ;;  %v3238_v43 = vpop.eup %2708  ;;  %2718 = vrcp.f32 %v332_v26  ;;  %v3272_v26 = vmul.f32 %v3221_v53, %v965_v19  ;;  %v375_v15 = vrot.slane %v3223_v54, %v3020_v5  ;;  %v436_v12 = vrot.slane %v3223_v54, %v2999_v62 }
  0xba   :  { %4746 = vst [vmem:[#allocation35_spill] sm:$0xff] %v3227_v28  ;;  %4747 = vst [vmem:[#allocation36_spill] sm:$0xff] %v3231_v29  ;;  %v3250_v58 = vpop.eup %2710  ;;  %2720 = vrcp.f32 %v333_v55  ;;  %v3275_v55 = vmul.f32 %v975_v47, %v3236_v32  ;;  %v379_v44 = vrot.slane %v3238_v43, %v3020_v5  ;;  %v440_v41 = vrot.slane %v3238_v43, %v2999_v62 }
  0xbb   :  { %4748 = vst [vmem:[#allocation37_spill] sm:$0xff] %v3234_v40  ;;  %4749 = vst [vmem:[#allocation38_spill] sm:$0xff] %v3236_v32  ;;  %v3262_v10 = vpop.eup %2712  ;;  %v383_v48 = vrot.slane %v3250_v58, %v3020_v5  ;;  %v444_v61 = vrot.slane %v3250_v58, %v2999_v62  ;;  %v3307_v21 = vrot.slane %v3223_v54, %v3026_v7 }
  0xbc   :  { %4750 = vst [vmem:[#allocation39_spill] sm:$0xff] %v3242_v36  ;;  %4751 = vst [vmem:[#allocation40_spill] sm:$0xff] %v3245_v37  ;;  %v3277_v59 = vpop.eup %2714  ;;  %v387_v16 = vrot.slane %v3262_v10, %v3020_v5  ;;  %v448_v53 = vrot.slane %v3262_v10, %v2999_v62  ;;  %v3311_v14 = vmul.f32 %v3253_v60, %v3163_v46 }
  0xbd   :  { %4752 = vst [vmem:[#allocation41_spill] sm:$0xff] %v3248_v38  ;;  %4753 = vst [vmem:[#allocation42_spill] sm:$0xff] %v3253_v60  ;;  %v3287_v13 = vpop.eup %2716  ;;  %v391_v47 = vrot.slane %v3277_v59, %v3020_v5  ;;  %v452_v49 = vrot.slane %v3277_v59, %v2999_v62  ;;  %v3314_v4 = vmul.f32 %v3260_v6, %v965_v19 }
  0xbe   :  { %4754 = vst [vmem:[#allocation43_spill] sm:$0xff] %v3257_v34  ;;  %4755 = vst [vmem:[#allocation44_spill] sm:$0xff] %v3260_v6  ;;  %v456_v23 = vrot.slane %v3287_v13, %v2999_v62  ;;  %v412_v34 = vmul.f32 %v375_v15, %v3113_v39  ;;  %v413_v36 = vmul.f32 %v379_v44, %v3113_v39 }
  0xbf   :  { %4756 = vst [vmem:[#allocation45_spill] sm:$0xff] %v3266_v42  ;;  %4757 = vst [vmem:[#allocation46_spill] sm:$0xff] %v3269_v52  ;;  %v3317_v42 = vmul.f32 %v979_v0, %v3236_v32  ;;  %v414_v29 = vmul.f32 %v383_v48, %v3113_v39  ;;  %v415_v28 = vmul.f32 %v387_v16, %v3113_v39 }
  0xc0   :  { %4758 = vst [vmem:[#allocation47_spill] sm:$0xff] %v3272_v26  ;;  %4759 = vst [vmem:[#allocation48_spill] sm:$0xff] %v3275_v55  ;;  %v395_v55 = vrot.slane %v3287_v13, %v3020_v5  ;;  %v416_v51 = vmul.f32 %v391_v47, %v3113_v39  ;;  %v473_v18 = vmul.f32 %v436_v12, %v3119_v17 }
  0xc1   :  { %4760 = vst [vmem:[#allocation49_spill] sm:$0xff] %v3311_v14  ;;  %4761 = vst [vmem:[#allocation50_spill] sm:$0xff] %v3314_v4  ;;  %v474_v46 = vmul.f32 %v440_v41, %v3119_v17  ;;  %v475_v19 = vmul.f32 %v444_v61, %v3119_v17  ;;  %v476_v0 = vmul.f32 %v448_v53, %v3119_v17 }
  0xc2   :  { %4762 = vst [vmem:[#allocation51_spill] sm:$0xff] %v3317_v42  ;;  %v417_v60 = vmul.f32 %v395_v55, %v3113_v39  ;;  %v477_v42 = vmul.f32 %v452_v49, %v3119_v17  ;;  %v478_v6 = vmul.f32 %v456_v23, %v3119_v17  ;;  %v404_v32 = vmul.f32 %v375_v15, %v3115_v56 }
  0xc3   :  { %v405_v14 = vmul.f32 %v379_v44, %v3115_v56  ;;  %v406_v31 = vmul.f32 %v383_v48, %v3115_v56  ;;  %v3336_v4 = vrot.slane %v3238_v43, %v3026_v7  ;;  %v407_v26 = vmul.f32 %v387_v16, %v3115_v56 }
  0xc4   :  { %v408_v52 = vmul.f32 %v391_v47, %v3115_v56  ;;  %v409_v38 = vmul.f32 %v395_v55, %v3115_v56  ;;  %v465_v37 = vmul.f32 %v436_v12, %v3122_v22  ;;  %v489_v40 = vadd.f32 %v473_v18, %v412_v34 }
  0xc5   :  { %v490_v45 = vadd.f32 %v474_v46, %v413_v36  ;;  %v491_v25 = vadd.f32 %v475_v19, %v414_v29  ;;  %v466_v15 = vmul.f32 %v440_v41, %v3122_v22  ;;  %v492_v48 = vadd.f32 %v476_v0, %v415_v28 }
  0xc6   :  { %v3343_v44 = vpop.eup %2718  ;;  %v493_v57 = vadd.f32 %v477_v42, %v416_v51  ;;  %v494_v9 = vadd.f32 %v478_v6, %v417_v60  ;;  %v467_v24 = vmul.f32 %v444_v61, %v3122_v22  ;;  %v468_v18 = vmul.f32 %v448_v53, %v3122_v22 }
  0xc7   :  { %v3346_v3 = vpop.eup %2720  ;;  %v399_v16 = vrot.slane %v3343_v44, %v3020_v5  ;;  %v460_v12 = vrot.slane %v3343_v44, %v2999_v62  ;;  %v469_v29 = vmul.f32 %v452_v49, %v3122_v22  ;;  %v470_v61 = vmul.f32 %v456_v23, %v3122_v22 }
  0xc8   :  { %v403_v41 = vrot.slane %v3346_v3, %v3020_v5  ;;  %v464_v51 = vrot.slane %v3346_v3, %v2999_v62  ;;  %v481_v28 = vadd.f32 %v465_v37, %v404_v32  ;;  %v482_v34 = vadd.f32 %v466_v15, %v405_v14 }
  0xc9   :  { %v418_v36 = vmul.f32 %v399_v16, %v3113_v39  ;;  %v410_v60 = vmul.f32 %v399_v16, %v3115_v56  ;;  %v521_v6 = vrot.slane %v3250_v58, %v3026_v7  ;;  %v479_v49 = vmul.f32 %v460_v12, %v3119_v17 }
  0xca   :  { %v419_v53 = vmul.f32 %v403_v41, %v3113_v39  ;;  %v480_v42 = vmul.f32 %v464_v51, %v3119_v17  ;;  %v471_v55 = vmul.f32 %v460_v12, %v3122_v22  ;;  %v411_v47 = vmul.f32 %v403_v41, %v3115_v56 }
  0xcb   :  { %v472_v23 = vmul.f32 %v464_v51, %v3122_v22  ;;  %v525_v32 = vrot.slane %v3262_v10, %v3026_v7  ;;  %v529_v14 = vrot.slane %v3277_v59, %v3026_v7  ;;  %v483_v37 = vadd.f32 %v467_v24, %v406_v31 }
  0xcc   :  { %v533_v39 = vrot.slane %v3287_v13, %v3026_v7  ;;  %v537_v46 = vrot.slane %v3343_v44, %v3026_v7  ;;  %v541_v17 = vrot.slane %v3346_v3, %v3026_v7  ;;  %v484_v19 = vadd.f32 %v468_v18, %v407_v26 }
  0xcd   :  { %v485_v56 = vadd.f32 %v469_v29, %v408_v52  ;;  %v486_v0 = vadd.f32 %v470_v61, %v409_v38  ;;  %v550_v22 = vmul.f32 %v3307_v21, %v3135_v27  ;;  %v495_v15 = vadd.f32 %v479_v49, %v418_v36 }
  0xce   :  { %v496_v16 = vadd.f32 %v480_v42, %v419_v53  ;;  %v487_v12 = vadd.f32 %v471_v55, %v410_v60  ;;  %v551_v24 = vmul.f32 %v3336_v4, %v3135_v27  ;;  %v488_v31 = vadd.f32 %v472_v23, %v411_v47 }
  0xcf   :  { %v552_v41 = vmul.f32 %v521_v6, %v3135_v27  ;;  %v553_v51 = vmul.f32 %v525_v32, %v3135_v27  ;;  %v554_v62 = vmul.f32 %v529_v14, %v3135_v27  ;;  %v555_v26 = vmul.f32 %v533_v39, %v3135_v27 }
  0xd0   :  { %v556_v38 = vmul.f32 %v537_v46, %v3135_v27  ;;  %v557_v52 = vmul.f32 %v541_v17, %v3135_v27  ;;  %v566_v18 = vadd.f32 %v550_v22, %v489_v40  ;;  %v567_v29 = vadd.f32 %v551_v24, %v490_v45 }
  0xd1   :  { %v568_v61 = vadd.f32 %v552_v41, %v491_v25  ;;  %v569_v36 = vadd.f32 %v553_v51, %v492_v48  ;;  %v570_v60 = vadd.f32 %v554_v62, %v493_v57  ;;  %v571_v53 = vadd.f32 %v555_v26, %v494_v9 }
  0xd2   :  { %v572_v49 = vadd.f32 %v556_v38, %v495_v15  ;;  %v573_v42 = vadd.f32 %v557_v52, %v496_v16  ;;  %v542_v55 = vmul.f32 %v3307_v21, %v3143_v30  ;;  %v543_v47 = vmul.f32 %v3336_v4, %v3143_v30 }
  0xd3   :  { %v544_v23 = vmul.f32 %v521_v6, %v3143_v30  ;;  %v545_v7 = vmul.f32 %v525_v32, %v3143_v30  ;;  %v546_v27 = vmul.f32 %v529_v14, %v3143_v30  ;;  %v547_v45 = vmul.f32 %v533_v39, %v3143_v30 }
  0xd4   :  { %v548_v25 = vmul.f32 %v537_v46, %v3143_v30  ;;  %v549_v62 = vmul.f32 %v541_v17, %v3143_v30  ;;  %v590_v9 = vrot.slane %v3223_v54, %v3008_v1  ;;  %v594_v57 = vrot.slane %v3238_v43, %v3008_v1 }
  0xd5   :  { %v598_v4 = vrot.slane %v3250_v58, %v3008_v1  ;;  %v602_v21 = vrot.slane %v3262_v10, %v3008_v1  ;;  %v606_v40 = vrot.slane %v3277_v59, %v3008_v1  ;;  %v558_v48 = vadd.f32 %v542_v55, %v481_v28 }
  0xd6   :  { %v610_v6 = vrot.slane %v3287_v13, %v3008_v1  ;;  %v614_v30 = vrot.slane %v3343_v44, %v3008_v1  ;;  %v618_v32 = vrot.slane %v3346_v3, %v3008_v1  ;;  %v559_v14 = vadd.f32 %v543_v47, %v482_v34 }
  0xd7   :  { %v560_v39 = vadd.f32 %v544_v23, %v483_v37  ;;  %v561_v46 = vadd.f32 %v545_v7, %v484_v19  ;;  %v562_v17 = vadd.f32 %v546_v27, %v485_v56  ;;  %v563_v22 = vadd.f32 %v547_v45, %v486_v0 }
  0xd8   :  { %v564_v15 = vadd.f32 %v548_v25, %v487_v12  ;;  %v565_v16 = vadd.f32 %v549_v62, %v488_v31  ;;  %v627_v24 = vmul.f32 %v590_v9, %v3149_v33  ;;  %v628_v28 = vmul.f32 %v594_v57, %v3149_v33 }
  0xd9   :  { %v629_v41 = vmul.f32 %v598_v4, %v3149_v33  ;;  %v630_v51 = vmul.f32 %v602_v21, %v3149_v33  ;;  %v631_v26 = vmul.f32 %v606_v40, %v3149_v33  ;;  %v632_v38 = vmul.f32 %v610_v6, %v3149_v33 }
  0xda   :  { %v633_v34 = vmul.f32 %v614_v30, %v3149_v33  ;;  %v634_v7 = vmul.f32 %v618_v32, %v3149_v33  ;;  %v643_v37 = vadd.f32 %v627_v24, %v566_v18  ;;  %v644_v19 = vadd.f32 %v628_v28, %v567_v29 }
  0xdb   :  { %v645_v56 = vadd.f32 %v629_v41, %v568_v61  ;;  %v646_v0 = vadd.f32 %v630_v51, %v569_v36  ;;  %v647_v12 = vadd.f32 %v631_v26, %v570_v60  ;;  %v648_v31 = vadd.f32 %v632_v38, %v571_v53 }
  0xdc   :  { %v649_v52 = vadd.f32 %v633_v34, %v572_v49  ;;  %v650_v55 = vadd.f32 %v634_v7, %v573_v42  ;;  %v619_v47 = vmul.f32 %v590_v9, %v3154_v35  ;;  %v620_v23 = vmul.f32 %v594_v57, %v3154_v35 }
  0xdd   :  { %v621_v27 = vmul.f32 %v598_v4, %v3154_v35  ;;  %v622_v45 = vmul.f32 %v602_v21, %v3154_v35  ;;  %v623_v25 = vmul.f32 %v606_v40, %v3154_v35  ;;  %v624_v33 = vmul.f32 %v610_v6, %v3154_v35 }
  0xde   :  { %v625_v18 = vmul.f32 %v614_v30, %v3154_v35  ;;  %v626_v29 = vmul.f32 %v618_v32, %v3154_v35  ;;  %v667_v61 = vrot.slane %v3223_v54, %v3029_v8  ;;  %v671_v36 = vrot.slane %v3238_v43, %v3029_v8 }
  0xdf   :  { %v675_v60 = vrot.slane %v3250_v58, %v3029_v8  ;;  %v679_v53 = vrot.slane %v3262_v10, %v3029_v8  ;;  %v683_v49 = vrot.slane %v3277_v59, %v3029_v8  ;;  %v635_v42 = vadd.f32 %v619_v47, %v558_v48 }
  0xe0   :  { %v687_v62 = vrot.slane %v3287_v13, %v3029_v8  ;;  %v691_v35 = vrot.slane %v3343_v44, %v3029_v8  ;;  %v695_v9 = vrot.slane %v3346_v3, %v3029_v8  ;;  %v636_v57 = vadd.f32 %v620_v23, %v559_v14 }
  0xe1   :  { %v637_v4 = vadd.f32 %v621_v27, %v560_v39  ;;  %v638_v21 = vadd.f32 %v622_v45, %v561_v46  ;;  %v639_v40 = vadd.f32 %v623_v25, %v562_v17  ;;  %v640_v6 = vadd.f32 %v624_v33, %v563_v22 }
  0xe2   :  { %v641_v30 = vadd.f32 %v625_v18, %v564_v15  ;;  %v642_v32 = vadd.f32 %v626_v29, %v565_v16  ;;  %v704_v24 = vmul.f32 %v667_v61, %v3151_v63  ;;  %v705_v48 = vmul.f32 %v671_v36, %v3151_v63 }
  0xe3   :  { %v706_v28 = vmul.f32 %v675_v60, %v3151_v63  ;;  %v707_v41 = vmul.f32 %v679_v53, %v3151_v63  ;;  %v708_v51 = vmul.f32 %v683_v49, %v3151_v63  ;;  %v709_v26 = vmul.f32 %v687_v62, %v3151_v63 }
  0xe4   :  { %v710_v14 = vmul.f32 %v691_v35, %v3151_v63  ;;  %v711_v39 = vmul.f32 %v695_v9, %v3151_v63  ;;  %v3455_v46 = vadd.f32 %v704_v24, %v643_v37  ;;  %v3457_v17 = vadd.f32 %v705_v48, %v644_v19 }
  0xe5   :  { %v3459_v22 = vadd.f32 %v706_v28, %v645_v56  ;;  %v3461_v15 = vadd.f32 %v707_v41, %v646_v0  ;;  %v3463_v16 = vadd.f32 %v708_v51, %v647_v12  ;;  %v3465_v38 = vadd.f32 %v709_v26, %v648_v31 }
  0xe6   :  { %v3467_v34 = vadd.f32 %v710_v14, %v649_v52  ;;  %v3469_v7 = vadd.f32 %v711_v39, %v650_v55  ;;  %v696_v47 = vmul.f32 %v667_v61, %v3159_v20  ;;  %v697_v63 = vmul.f32 %v671_v36, %v3159_v20 }
  0xe7   :  { %v698_v37 = vmul.f32 %v675_v60, %v3159_v20  ;;  %v699_v19 = vmul.f32 %v679_v53, %v3159_v20  ;;  %v700_v56 = vmul.f32 %v683_v49, %v3159_v20  ;;  %v701_v0 = vmul.f32 %v687_v62, %v3159_v20 }
  0xe8   :  { %v702_v12 = vmul.f32 %v691_v35, %v3159_v20  ;;  %v703_v31 = vmul.f32 %v695_v9, %v3159_v20  ;;  %v744_v52 = vrot.slane %v3223_v54, %v3011_v2  ;;  %v712_v55 = vadd.f32 %v696_v47, %v635_v42 }
  0xe9   :  { %v713_v23 = vadd.f32 %v697_v63, %v636_v57  ;;  %v748_v27 = vrot.slane %v3238_v43, %v3011_v2  ;;  %v752_v45 = vrot.slane %v3250_v58, %v3011_v2  ;;  %v714_v25 = vadd.f32 %v698_v37, %v637_v4  ;;  %v4763_v63 = vld [vmem:[#allocation10_spill] sm:$0xff] }
  0xea   :  { %v3487_v33 = vrot.slane %v3262_v10, %v3011_v2  ;;  %v3491_v18 = vrot.slane %v3277_v59, %v3011_v2  ;;  %v3495_v20 = vrot.slane %v3287_v13, %v3011_v2  ;;  %v715_v29 = vadd.f32 %v699_v19, %v638_v21 }
  0xeb   :  { %v716_v61 = vadd.f32 %v700_v56, %v639_v40  ;;  %v3499_v36 = vrot.slane %v3343_v44, %v3011_v2  ;;  %v3503_v60 = vrot.slane %v3346_v3, %v3011_v2  ;;  %v717_v53 = vadd.f32 %v701_v0, %v640_v6 }
  0xec   :  { %v718_v49 = vadd.f32 %v702_v12, %v641_v30  ;;  %v719_v42 = vadd.f32 %v703_v31, %v642_v32  ;;  %v3506_v62 = vmul.f32 %v744_v52, %v3157_v11  ;;  %v3509_v35 = vmul.f32 %v748_v27, %v3157_v11 }
  0xed   :  { %v3512_v9 = vmul.f32 %v752_v45, %v3157_v11  ;;  %v773_v57 = vmul.f32 %v744_v52, %v3165_v50  ;;  %v774_v4 = vmul.f32 %v748_v27, %v3165_v50  ;;  %v775_v21 = vmul.f32 %v752_v45, %v3165_v50 }
  0xee   :  { %v776_v40 = vmul.f32 %v3487_v33, %v3165_v50  ;;  %v777_v6 = vmul.f32 %v3491_v18, %v3165_v50  ;;  %v778_v30 = vmul.f32 %v3495_v20, %v3165_v50  ;;  %v779_v32 = vmul.f32 %v3499_v36, %v3165_v50 }
  0xef   :  { %v780_v24 = vmul.f32 %v3503_v60, %v3165_v50  ;;  %v789_v48 = vadd.f32 %v773_v57, %v712_v55  ;;  %v790_v28 = vadd.f32 %v774_v4, %v713_v23  ;;  %v791_v41 = vadd.f32 %v775_v21, %v714_v25  ;;  %v4772_v55 = vld [vmem:[#allocation15_spill] sm:$0xff] }
  0xf0   :  { %v792_v51 = vadd.f32 %v776_v40, %v715_v29  ;;  %v793_v26 = vadd.f32 %v777_v6, %v716_v61  ;;  %v794_v14 = vadd.f32 %v778_v30, %v717_v53  ;;  %v795_v39 = vadd.f32 %v779_v32, %v718_v49 }
  0xf1   :  { %v796_v47 = vadd.f32 %v780_v24, %v719_v42  ;;  %v3529_v37 = vrot.slane %v3223_v54, %v4763_v63  ;;  %v3533_v19 = vrot.slane %v3238_v43, %v4763_v63  ;;  %v3537_v56 = vrot.slane %v3250_v58, %v4763_v63  ;;  %v4773_v42 = vld [vmem:[#allocation14_spill] sm:$0xff] }
  0xf2   :  { %v3541_v50 = vrot.slane %v3262_v10, %v4763_v63  ;;  %v3545_v0 = vrot.slane %v3277_v59, %v4763_v63  ;;  %v3549_v12 = vrot.slane %v3287_v13, %v4763_v63  ;;  %v3553_v31 = vrot.slane %v3343_v44, %v4763_v63 }
  0xf3   :  { %4764 = vst [vmem:[#allocation52_spill] sm:$0xff] %v3529_v37  ;;  %4765 = vst [vmem:[#allocation53_spill] sm:$0xff] %v3533_v19  ;;  %v3557_v52 = vrot.slane %v3346_v3, %v4763_v63  ;;  %v927_v23 = vmul.f32 %v3529_v37, %v4772_v55  ;;  %v928_v27 = vmul.f32 %v3533_v19, %v4772_v55 }
  0xf4   :  { %4766 = vst [vmem:[#allocation54_spill] sm:$0xff] %v3537_v56  ;;  %4767 = vst [vmem:[#allocation55_spill] sm:$0xff] %v3541_v50  ;;  %v929_v45 = vmul.f32 %v3537_v56, %v4772_v55  ;;  %v930_v25 = vmul.f32 %v3541_v50, %v4772_v55  ;;  %v931_v29 = vmul.f32 %v3545_v0, %v4772_v55 }
  0xf5   :  { %4768 = vst [vmem:[#allocation56_spill] sm:$0xff] %v3545_v0  ;;  %4769 = vst [vmem:[#allocation57_spill] sm:$0xff] %v3549_v12  ;;  %v932_v61 = vmul.f32 %v3549_v12, %v4772_v55  ;;  %v933_v53 = vmul.f32 %v3553_v31, %v4772_v55  ;;  %v934_v49 = vmul.f32 %v3557_v52, %v4772_v55 }
  0xf6   :  { %4770 = vst [vmem:[#allocation58_spill] sm:$0xff] %v3553_v31  ;;  %4771 = vst [vmem:[#allocation59_spill] sm:$0xff] %v3557_v52  ;;  %v821_v57 = vrot.slane %v3223_v54, %v4773_v42  ;;  %v825_v4 = vrot.slane %v3238_v43, %v4773_v42  ;;  %v829_v21 = vrot.slane %v3250_v58, %v4773_v42  ;;  %v4775_v58 = vld [vmem:[#allocation17_spill] sm:$0xff] }
  0xf7   :  { %v3583_v40 = vrot.slane %v3262_v10, %v4773_v42  ;;  %v3587_v6 = vrot.slane %v3277_v59, %v4773_v42  ;;  %v3591_v30 = vrot.slane %v3287_v13, %v4773_v42  ;;  %v3595_v54 = vrot.slane %v3343_v44, %v4773_v42 }
  0xf8   :  { %v3599_v43 = vrot.slane %v3346_v3, %v4773_v42  ;;  %v850_v32 = vmul.f32 %v821_v57, %v4775_v58  ;;  %v851_v10 = vmul.f32 %v825_v4, %v4775_v58  ;;  %v852_v24 = vmul.f32 %v829_v21, %v4775_v58 }
  0xf9   :  { %4774 = vst [vmem:[#allocation15_spill] sm:$0xff] %v3595_v54  ;;  %v853_v59 = vmul.f32 %v3583_v40, %v4775_v58  ;;  %v854_v13 = vmul.f32 %v3587_v6, %v4775_v58  ;;  %v855_v44 = vmul.f32 %v3591_v30, %v4775_v58  ;;  %v856_v55 = vmul.f32 %v3595_v54, %v4775_v58 }
  0xfa   :  { %v857_v3 = vmul.f32 %v3599_v43, %v4775_v58  ;;  %v866_v42 = vadd.f32 %v850_v32, %v789_v48  ;;  %v867_v63 = vadd.f32 %v851_v10, %v790_v28  ;;  %v868_v2 = vadd.f32 %v852_v24, %v791_v41 }
  0xfb   :  { %v869_v1 = vadd.f32 %v853_v59, %v792_v51  ;;  %v870_v8 = vadd.f32 %v854_v13, %v793_v26  ;;  %v871_v52 = vadd.f32 %v855_v44, %v794_v14  ;;  %v872_v31 = vadd.f32 %v856_v55, %v795_v39  ;;  %v4777_v26 = vld [vmem:[#allocation31_spill] sm:$0xff] }
  0xfc   :  { %v873_v12 = vadd.f32 %v857_v3, %v796_v47  ;;  %v943_v0 = vadd.f32 %v927_v23, %v866_v42  ;;  %v944_v50 = vadd.f32 %v928_v27, %v867_v63  ;;  %v945_v56 = vadd.f32 %v929_v45, %v868_v2  ;;  %v4779_v47 = vld [vmem:[#allocation40_spill] sm:$0xff]  ;;  %v4786_v23 = vld [vmem:[#allocation29_spill] sm:$0xff]  ;;  %v1116_v45 = vpop.permute.xlu0 %1115 }
  0xfd   :  { %v946_v19 = vadd.f32 %v930_v25, %v869_v1  ;;  %v947_v37 = vadd.f32 %v931_v29, %v870_v8  ;;  %v948_v5 = vadd.f32 %v932_v61, %v871_v52  ;;  %v784_v54 = vmul.f32 %v3487_v33, %v3157_v11  ;;  %v4787_v25 = vld [vmem:[#allocation35_spill] sm:$0xff]  ;;  %v4788_v29 = vld [vmem:[#allocation36_spill] sm:$0xff]  ;;  %v4791_v42 = vld [vmem:[#allocation45_spill] sm:$0xff] }
  0xfe   :  { %v785_v58 = vmul.f32 %v3491_v18, %v3157_v11  ;;  %v949_v48 = vadd.f32 %v933_v53, %v872_v31  ;;  %v950_v28 = vadd.f32 %v934_v49, %v873_v12  ;;  %v786_v41 = vmul.f32 %v3495_v20, %v3157_v11  ;;  %v4776_v18 = vld [vmem:[#allocation30_spill] sm:$0xff]  ;;  %v4785_v31 = vld [vmem:[#allocation25_spill] sm:$0xff]  ;;  %v4790_v49 = vld [vmem:[#allocation43_spill] sm:$0xff] }
  0xff   :  { %v787_v51 = vmul.f32 %v3499_v36, %v3157_v11  ;;  %v788_v2 = vmul.f32 %v3503_v60, %v3157_v11  ;;  %v3626_v1 = vadd.f32 %v3506_v62, %v3455_v46  ;;  %v3630_v8 = vadd.f32 %v3509_v35, %v3457_v17  ;;  %v4778_v36 = vld [vmem:[#allocation37_spill] sm:$0xff]  ;;  %v4781_v46 = vld [vmem:[#allocation46_spill] sm:$0xff] }
 0x100   :  { %v3634_v33 = vadd.f32 %v3512_v9, %v3459_v22  ;;  %v1020_v20 = vadd.f32 %v4776_v18, %v943_v0  ;;  %v1021_v14 = vadd.f32 %v4777_v26, %v944_v50  ;;  %v1022_v39 = vadd.f32 %v4778_v36, %v945_v56  ;;  %v4780_v60 = vld [vmem:[#allocation41_spill] sm:$0xff]  ;;  %v4782_v22 = vld [vmem:[#allocation47_spill] sm:$0xff]  ;;  %v4783_v9 = vld [vmem:[#allocation50_spill] sm:$0xff] }
 0x101   :  { %v1023_v11 = vadd.f32 %v4779_v47, %v946_v19  ;;  %v1024_v63 = vadd.f32 %v4780_v60, %v947_v37  ;;  %v1025_v62 = vadd.f32 %v4781_v46, %v948_v5  ;;  %v3643_v12 = vadd.f32 %v784_v54, %v3461_v15  ;;  %v4784_v5 = vld [vmem:[#allocation16_spill] sm:$0xff]  ;;  %v4793_v46 = vld [vmem:[#allocation15_spill] sm:$0xff] }
 0x102   :  { %v3646_v17 = vadd.f32 %v785_v58, %v3463_v16  ;;  %v1026_v35 = vadd.f32 %v4782_v22, %v949_v48  ;;  %v1027_v0 = vadd.f32 %v4783_v9, %v950_v28  ;;  %v3651_v50 = vadd.f32 %v786_v41, %v3465_v38  ;;  %v4794_v9 = vld [vmem:[#allocation11_spill] sm:$0xff] }
 0x103   :  { %v3654_v56 = vadd.f32 %v787_v51, %v3467_v34  ;;  %v3657_v37 = vadd.f32 %v788_v2, %v3469_v7  ;;  %v858_v19 = vmul.f32 %v821_v57, %v4784_v5  ;;  %v859_v15 = vmul.f32 %v825_v4, %v4784_v5  ;;  %v4789_v34 = vld [vmem:[#allocation39_spill] sm:$0xff]  ;;  %v4792_v57 = vld [vmem:[#allocation49_spill] sm:$0xff] }
 0x104   :  { %v860_v16 = vmul.f32 %v829_v21, %v4784_v5  ;;  %v1097_v52 = vadd.f32 %v4785_v31, %v1020_v20  ;;  %v1098_v27 = vadd.f32 %v4786_v23, %v1021_v14  ;;  %v1099_v38 = vadd.f32 %v4787_v25, %v1022_v39  ;;  %v893_v23 = vpop.permute.xlu0 %892 }
 0x105   :  { %v1100_v61 = vadd.f32 %v4788_v29, %v1023_v11  ;;  %v1101_v53 = vadd.f32 %v4789_v34, %v1024_v63  ;;  %v1102_v7 = vadd.f32 %v4790_v49, %v1025_v62  ;;  %v1103_v54 = vadd.f32 %v4791_v42, %v1026_v35 }
 0x106   :  { %v1104_v32 = vadd.f32 %v4792_v57, %v1027_v0  ;;  %v1123_v4 = vadd.f32 %v1116_v45, %v1097_v52  ;;  %v1124_v10 = vadd.f32 %v1116_v45, %v1098_v27  ;;  %v1125_v21 = vadd.f32 %v1116_v45, %v1099_v38 }
 0x107   :  { %v1126_v24 = vadd.f32 %v1116_v45, %v1100_v61  ;;  %v1127_v59 = vadd.f32 %v1116_v45, %v1101_v53  ;;  %v1128_v13 = vadd.f32 %v1116_v45, %v1102_v7  ;;  %v1129_v44 = vadd.f32 %v1116_v45, %v1103_v54  ;;  %v4803_v53 = vld [vmem:[#allocation52_spill] sm:$0xff]  ;;  %v4806_v54 = vld [vmem:[#allocation54_spill] sm:$0xff] }
 0x108   :  { %v1130_v55 = vadd.f32 %v1116_v45, %v1104_v32  ;;  %vm1139_vm0 = vcmp.gt.f32.partialorder %v1123_v4, 0.0  ;;  %vm1140_vm1 = vcmp.gt.f32.partialorder %v1124_v10, 0.0  ;;  %vm1141_vm2 = vcmp.gt.f32.partialorder %v1125_v21, 0.0  ;;  %v4804_v7 = vld [vmem:[#allocation20_spill] sm:$0xff]  ;;  %v4807_v32 = vld [vmem:[#allocation55_spill] sm:$0xff] }
 0x109   :  { %vm1142_vm3 = vcmp.gt.f32.partialorder %v1126_v24, 0.0  ;;  %vm1143_vm4 = vcmp.gt.f32.partialorder %v1127_v59, 0.0  ;;  %vm1144_vm5 = vcmp.gt.f32.partialorder %v1128_v13, 0.0  ;;  %vm1145_vm6 = vcmp.gt.f32.partialorder %v1129_v44, 0.0 }
 0x10a   :  { %vm1146_vm7 = vcmp.gt.f32.partialorder %v1130_v55, 0.0  ;;  %v1155_v3 = vmul.f32 0.01, %v1123_v4  ;;  %v1156_v58 = vmul.f32 0.01, %v1124_v10  ;;  %v861_v48 = vmul.f32 %v3583_v40, %v4784_v5 }
 0x10b   :  { %v1157_v28 = vmul.f32 0.01, %v1125_v21  ;;  %v1158_v41 = vmul.f32 0.01, %v1126_v24  ;;  %v1159_v51 = vmul.f32 0.01, %v1127_v59  ;;  %v862_v2 = vmul.f32 %v3587_v6, %v4784_v5 }
 0x10c   :  { %v1160_v18 = vmul.f32 0.01, %v1128_v13  ;;  %v1161_v20 = vmul.f32 0.01, %v1129_v44  ;;  %v1162_v26 = vmul.f32 0.01, %v1130_v55  ;;  %v3675_v14 = vsel %vm1139_vm0, %v1123_v4, %v1155_v3 }
 0x10d   :  { %v3678_v36 = vsel %vm1140_vm1, %v1124_v10, %v1156_v58  ;;  %v3681_v39 = vsel %vm1141_vm2, %v1125_v21, %v1157_v28  ;;  %v3684_v40 = vsel %vm1142_vm3, %v1126_v24, %v1158_v41  ;;  %v3687_v47 = vsel %vm1143_vm4, %v1127_v59, %v1159_v51  ;;  %v4808_v10 = vld [vmem:[#allocation56_spill] sm:$0xff]  ;;  %v4809_v24 = vld [vmem:[#allocation57_spill] sm:$0xff] }
 0x10e   :  { %v3690_v6 = vsel %vm1144_vm5, %v1128_v13, %v1160_v18  ;;  %v3693_v11 = vsel %vm1145_vm6, %v1129_v44, %v1161_v20  ;;  %v3696_v60 = vsel %vm1146_vm7, %v1130_v55, %v1162_v26  ;;  %v863_v63 = vmul.f32 %v3591_v30, %v4784_v5  ;;  %v4810_v13 = vld [vmem:[#allocation58_spill] sm:$0xff]  ;;  %v4811_v55 = vld [vmem:[#allocation59_spill] sm:$0xff] }
 0x10f   :  { %v864_v62 = vmul.f32 %v4793_v46, %v4784_v5  ;;  %v865_v22 = vmul.f32 %v3599_v43, %v4784_v5  ;;  %v874_v35 = vadd.f32 %v858_v19, %v3626_v1  ;;  %v3707_v0 = vrot.slane %v3675_v14, %v4794_v9  ;;  %v4812_v26 = vld [vmem:[#allocation38_spill] sm:$0xff] }
 0x110   :  { %v3711_v31 = vrot.slane %v3678_v36, %v4794_v9  ;;  %v3715_v52 = vrot.slane %v3681_v39, %v4794_v9  ;;  %v3719_v30 = vrot.slane %v3684_v40, %v4794_v9  ;;  %v3723_v43 = vrot.slane %v3687_v47, %v4794_v9 }
 0x111   :  { %4795 = vst [vmem:[#allocation17_spill] sm:$0xff] %v3707_v0  ;;  %v3727_v1 = vrot.slane %v3690_v6, %v4794_v9  ;;  %v3731_v5 = vrot.slane %v3693_v11, %v4794_v9  ;;  %v3735_v19 = vrot.slane %v3696_v60, %v4794_v9  ;;  %v875_v27 = vadd.f32 %v859_v15, %v3630_v8  ;;  %v4805_v15 = vld [vmem:[#allocation53_spill] sm:$0xff] }
 0x112   :  { %4796 = vst [vmem:[#allocation30_spill] sm:$0xff] %v3711_v31  ;;  %4797 = vst [vmem:[#allocation31_spill] sm:$0xff] %v3715_v52  ;;  %v876_v45 = vadd.f32 %v860_v16, %v3634_v33  ;;  %v877_v25 = vadd.f32 %v861_v48, %v3643_v12  ;;  %v878_v38 = vadd.f32 %v862_v2, %v3646_v17  ;;  %v4848_v9 = vld [vmem:[#allocation13_spill] sm:$0xff] }
 0x113   :  { %4798 = vst [vmem:[#allocation37_spill] sm:$0xff] %v3719_v30  ;;  %4799 = vst [vmem:[#allocation40_spill] sm:$0xff] %v3723_v43  ;;  %v879_v29 = vadd.f32 %v863_v63, %v3651_v50  ;;  %v880_v61 = vadd.f32 %v864_v62, %v3654_v56  ;;  %v881_v34 = vadd.f32 %v865_v22, %v3657_v37  ;;  %v4813_v63 = vld [vmem:[#allocation23_spill] sm:$0xff] }
 0x114   :  { %4800 = vst [vmem:[#allocation41_spill] sm:$0xff] %v3727_v1  ;;  %4801 = vst [vmem:[#allocation46_spill] sm:$0xff] %v3731_v5  ;;  %v935_v49 = vmul.f32 %v4803_v53, %v893_v23  ;;  %v1235_v42 = vmul.f32 %v3707_v0, %v4804_v7  ;;  %v1236_v8 = vmul.f32 %v3711_v31, %v4804_v7  ;;  %v4814_v62 = vld [vmem:[#allocation7_spill] sm:$0xff] }
 0x115   :  { %4802 = vst [vmem:[#allocation47_spill] sm:$0xff] %v3735_v19  ;;  %v1237_v33 = vmul.f32 %v3715_v52, %v4804_v7  ;;  %v1238_v12 = vmul.f32 %v3719_v30, %v4804_v7  ;;  %v1239_v17 = vmul.f32 %v3723_v43, %v4804_v7  ;;  %v1240_v50 = vmul.f32 %v3727_v1, %v4804_v7 }
 0x116   :  { %v1241_v56 = vmul.f32 %v3731_v5, %v4804_v7  ;;  %v1242_v37 = vmul.f32 %v3735_v19, %v4804_v7  ;;  %v936_v16 = vmul.f32 %v4805_v15, %v893_v23  ;;  %v937_v57 = vmul.f32 %v4806_v54, %v893_v23  ;;  %v4825_v7 = vld [vmem:[#allocation33_spill] sm:$0xff] }
 0x117   :  { %v938_v4 = vmul.f32 %v4807_v32, %v893_v23  ;;  %v939_v21 = vmul.f32 %v4808_v10, %v893_v23  ;;  %v940_v59 = vmul.f32 %v4809_v24, %v893_v23  ;;  %v941_v44 = vmul.f32 %v4810_v13, %v893_v23  ;;  %v4827_v32 = vld [vmem:[#allocation44_spill] sm:$0xff] }
 0x118   :  { %v942_v3 = vmul.f32 %v4811_v55, %v893_v23  ;;  %v951_v58 = vadd.f32 %v935_v49, %v874_v35  ;;  %v952_v48 = vadd.f32 %v936_v16, %v875_v27  ;;  %v953_v28 = vadd.f32 %v937_v57, %v876_v45  ;;  %v4826_v16 = vld [vmem:[#allocation34_spill] sm:$0xff]  ;;  %v1257_v57 = vpop.permute.xlu0 %1256 }
 0x119   :  { %v954_v41 = vadd.f32 %v938_v4, %v877_v25  ;;  %v955_v51 = vadd.f32 %v939_v21, %v878_v38  ;;  %v956_v2 = vadd.f32 %v940_v59, %v879_v29  ;;  %v957_v18 = vadd.f32 %v941_v44, %v880_v61  ;;  %v4823_v29 = vld [vmem:[#allocation26_spill] sm:$0xff] }
 0x11a   :  { %v958_v20 = vadd.f32 %v942_v3, %v881_v34  ;;  %v1014_v46 = vmul.f32 %v4813_v63, %v4812_v26  ;;  %v3772_v22 = vrot.slane %v3675_v14, %v4814_v62  ;;  %v3776_v53 = vrot.slane %v3678_v36, %v4814_v62  ;;  %v4824_v34 = vld [vmem:[#allocation27_spill] sm:$0xff]  ;;  %v4828_v3 = vld [vmem:[#allocation48_spill] sm:$0xff] }
 0x11b   :  { %v3780_v35 = vrot.slane %v3681_v39, %v4814_v62  ;;  %v3784_v23 = vrot.slane %v3684_v40, %v4814_v62  ;;  %v3788_v27 = vrot.slane %v3687_v47, %v4814_v62  ;;  %v3792_v45 = vrot.slane %v3690_v6, %v4814_v62 }
 0x11c   :  { %4815 = vst [vmem:[#allocation50_spill] sm:$0xff] %v3772_v22  ;;  %4816 = vst [vmem:[#allocation16_spill] sm:$0xff] %v3776_v53  ;;  %v3796_v25 = vrot.slane %v3693_v11, %v4814_v62  ;;  %v3800_v38 = vrot.slane %v3696_v60, %v4814_v62  ;;  %v1015_v61 = vmul.f32 %v4823_v29, %v4812_v26  ;;  %v4829_v29 = vld [vmem:[#allocation51_spill] sm:$0xff] }
 0x11d   :  { %4817 = vst [vmem:[#allocation25_spill] sm:$0xff] %v3780_v35  ;;  %4818 = vst [vmem:[#allocation29_spill] sm:$0xff] %v3784_v23  ;;  %v1016_v49 = vmul.f32 %v4824_v34, %v4812_v26  ;;  %v1017_v15 = vmul.f32 %v4825_v7, %v4812_v26  ;;  %v1018_v54 = vmul.f32 %v4826_v16, %v4812_v26 }
 0x11e   :  { %4819 = vst [vmem:[#allocation35_spill] sm:$0xff] %v3788_v27  ;;  %4820 = vst [vmem:[#allocation36_spill] sm:$0xff] %v3792_v45  ;;  %v1019_v4 = vmul.f32 %v4827_v32, %v4812_v26  ;;  %v1296_v10 = vmul.f32 %v3772_v22, %v1257_v57  ;;  %v1297_v21 = vmul.f32 %v3776_v53, %v1257_v57 }
 0x11f   :  { %4821 = vst [vmem:[#allocation39_spill] sm:$0xff] %v3796_v25  ;;  %4822 = vst [vmem:[#allocation43_spill] sm:$0xff] %v3800_v38  ;;  %v1298_v24 = vmul.f32 %v3780_v35, %v1257_v57  ;;  %v1299_v59 = vmul.f32 %v3784_v23, %v1257_v57  ;;  %v1300_v13 = vmul.f32 %v3788_v27, %v1257_v57 }
 0x120   :  { %v1301_v44 = vmul.f32 %v3792_v45, %v1257_v57  ;;  %v1302_v55 = vmul.f32 %v3796_v25, %v1257_v57  ;;  %v3820_v63 = vadd.f32 %v4828_v3, %v951_v58  ;;  %v3823_v34 = vadd.f32 %v4829_v29, %v952_v48 }
 0x121   :  { %v3825_v26 = vadd.f32 %v1014_v46, %v953_v28  ;;  %v1303_v7 = vmul.f32 %v3800_v38, %v1257_v57  ;;  %v3828_v16 = vadd.f32 %v1015_v61, %v954_v41  ;;  %v3830_v32 = vadd.f32 %v1016_v49, %v955_v51  ;;  %v1047_v46 = vpop.permute.xlu1 %1046  ;;  %v4830_v57 = vld [vmem:[#allocation12_spill] sm:$0xff]  ;;  %v4842_v49 = vld [vmem:[#allocation22_spill] sm:$0xff] }
 0x122   :  { %v3832_v23 = vadd.f32 %v1017_v15, %v956_v2  ;;  %v3834_v27 = vadd.f32 %v1018_v54, %v957_v18  ;;  %v3836_v45 = vadd.f32 %v1019_v4, %v958_v20  ;;  %v1312_v25 = vadd.f32 %v1296_v10, %v1235_v42  ;;  %v4840_v18 = vld [vmem:[#allocation21_spill] sm:$0xff]  ;;  %v4843_v54 = vld [vmem:[#allocation24_spill] sm:$0xff] }
 0x123   :  { %v1313_v58 = vadd.f32 %v1297_v21, %v1236_v8  ;;  %v1314_v3 = vadd.f32 %v1298_v24, %v1237_v33  ;;  %v1315_v35 = vadd.f32 %v1299_v59, %v1238_v12  ;;  %v1316_v48 = vadd.f32 %v1300_v13, %v1239_v17  ;;  %v4838_v17 = vld [vmem:[#allocation18_spill] sm:$0xff]  ;;  %v4844_v10 = vld [vmem:[#allocation28_spill] sm:$0xff]  ;;  %v1334_v13 = vpop.permute.xlu0 %1333 }
 0x124   :  { %v1317_v29 = vadd.f32 %v1301_v44, %v1240_v50  ;;  %v1318_v28 = vadd.f32 %v1302_v55, %v1241_v56  ;;  %v1319_v53 = vadd.f32 %v1303_v7, %v1242_v37  ;;  %v3840_v41 = vrot.slane %v3675_v14, %v4830_v57  ;;  %v4839_v56 = vld [vmem:[#allocation19_spill] sm:$0xff]  ;;  %v4845_v24 = vld [vmem:[#allocation32_spill] sm:$0xff]  ;;  %v4846_v44 = vld [vmem:[#allocation42_spill] sm:$0xff] }
 0x125   :  { %v3844_v51 = vrot.slane %v3678_v36, %v4830_v57  ;;  %v3848_v2 = vrot.slane %v3681_v39, %v4830_v57  ;;  %v3852_v42 = vrot.slane %v3684_v40, %v4830_v57  ;;  %v3856_v8 = vrot.slane %v3687_v47, %v4830_v57 }
 0x126   :  { %4831 = vst [vmem:[#allocation45_spill] sm:$0xff] %v3840_v41  ;;  %v3860_v33 = vrot.slane %v3690_v6, %v4830_v57  ;;  %v3864_v12 = vrot.slane %v3693_v11, %v4830_v57  ;;  %v3867_v50 = vmul.f32 %v4838_v17, %v1047_v46  ;;  %v3870_v37 = vmul.f32 %v4839_v56, %v1047_v46 }
 0x127   :  { %4832 = vst [vmem:[#allocation49_spill] sm:$0xff] %v3844_v51  ;;  %4833 = vst [vmem:[#allocation15_spill] sm:$0xff] %v3848_v2  ;;  %v3873_v20 = vmul.f32 %v4840_v18, %v1047_v46  ;;  %v3877_v61 = vrot.slane %v3696_v60, %v4830_v57  ;;  %v3880_v15 = vmul.f32 %v4842_v49, %v1047_v46 }
 0x128   :  { %4834 = vst [vmem:[#allocation52_spill] sm:$0xff] %v3852_v42  ;;  %4835 = vst [vmem:[#allocation20_spill] sm:$0xff] %v3856_v8  ;;  %v3883_v4 = vmul.f32 %v4843_v54, %v1047_v46  ;;  %v3886_v21 = vmul.f32 %v4844_v10, %v1047_v46  ;;  %v3889_v59 = vmul.f32 %v4845_v24, %v1047_v46 }
 0x129   :  { %4836 = vst [vmem:[#allocation53_spill] sm:$0xff] %v3860_v33  ;;  %4837 = vst [vmem:[#allocation54_spill] sm:$0xff] %v3864_v12  ;;  %v3892_v55 = vmul.f32 %v4846_v44, %v1047_v46  ;;  %v1373_v7 = vmul.f32 %v3840_v41, %v1334_v13  ;;  %v1374_v57 = vmul.f32 %v3844_v51, %v1334_v13 }
 0x12a   :  { %4841 = vst [vmem:[#allocation55_spill] sm:$0xff] %v3877_v61  ;;  %v1375_v17 = vmul.f32 %v3848_v2, %v1334_v13  ;;  %v1376_v56 = vmul.f32 %v3852_v42, %v1334_v13  ;;  %v1377_v18 = vmul.f32 %v3856_v8, %v1334_v13  ;;  %v1378_v49 = vmul.f32 %v3860_v33, %v1334_v13 }
 0x12b   :  { %4847 = vst [vmem:[#allocation56_spill] sm:$0xff] %v3892_v55  ;;  %v1379_v54 = vmul.f32 %v3864_v12, %v1334_v13  ;;  %v1380_v10 = vmul.f32 %v3877_v61, %v1334_v13  ;;  %v1389_v24 = vadd.f32 %v1373_v7, %v1312_v25  ;;  %v1390_v38 = vadd.f32 %v1374_v57, %v1313_v58  ;;  %v4852_v25 = vld [vmem:[#allocation8_spill] sm:$0xff]  ;;  %v1488_v7 = vpop.permute.xlu1 %1487  ;;  %v1411_v61 = vpop.permute.xlu0 %1410  ;;  %v4860_v55 = vld [vmem:[#allocation9_spill] sm:$0xff] }
 0x12c   :  { %v1391_v46 = vadd.f32 %v1375_v17, %v1314_v3  ;;  %v1392_v44 = vadd.f32 %v1376_v56, %v1315_v35  ;;  %v1393_v22 = vadd.f32 %v1377_v18, %v1316_v48  ;;  %v1394_v41 = vadd.f32 %v1378_v49, %v1317_v29 }
 0x12d   :  { %v1395_v62 = vadd.f32 %v1379_v54, %v1318_v28  ;;  %v1396_v51 = vadd.f32 %v1380_v10, %v1319_v53  ;;  %v3904_v2 = vrot.slane %v3675_v14, %v4848_v9  ;;  %v3908_v8 = vrot.slane %v3678_v36, %v4848_v9 }
 0x12e   :  { %v3912_v12 = vrot.slane %v3681_v39, %v4848_v9  ;;  %v3916_v58 = vrot.slane %v3675_v14, %v4852_v25  ;;  %v3920_v35 = vrot.slane %v3678_v36, %v4852_v25  ;;  %v3924_v53 = vrot.slane %v3681_v39, %v4852_v25 }
 0x12f   :  { %4849 = vst [vmem:[#allocation57_spill] sm:$0xff] %v3904_v2  ;;  %4850 = vst [vmem:[#allocation58_spill] sm:$0xff] %v3908_v8  ;;  %v3928_v3 = vrot.slane %v3684_v40, %v4852_v25  ;;  %v3932_v48 = vrot.slane %v3687_v47, %v4852_v25  ;;  %v3936_v29 = vrot.slane %v3690_v6, %v4852_v25 }
 0x130   :  { %4851 = vst [vmem:[#allocation59_spill] sm:$0xff] %v3912_v12  ;;  %4853 = vst [vmem:[#allocation38_spill] sm:$0xff] %v3916_v58  ;;  %v3940_v28 = vrot.slane %v3693_v11, %v4852_v25  ;;  %v3944_v13 = vrot.slane %v3696_v60, %v4852_v25  ;;  %v3948_v57 = vrot.slane %v3684_v40, %v4848_v9 }
 0x131   :  { %4854 = vst [vmem:[#allocation23_spill] sm:$0xff] %v3920_v35  ;;  %4855 = vst [vmem:[#allocation26_spill] sm:$0xff] %v3924_v53  ;;  %v3952_v17 = vrot.slane %v3687_v47, %v4848_v9  ;;  %v3956_v56 = vrot.slane %v3690_v6, %v4848_v9  ;;  %v3960_v18 = vrot.slane %v3693_v11, %v4848_v9 }
 0x132   :  { %4856 = vst [vmem:[#allocation27_spill] sm:$0xff] %v3928_v3  ;;  %4857 = vst [vmem:[#allocation33_spill] sm:$0xff] %v3932_v48  ;;  %v3964_v49 = vrot.slane %v3696_v60, %v4848_v9  ;;  %v1527_v54 = vmul.f32 %v3904_v2, %v1488_v7  ;;  %v1528_v10 = vmul.f32 %v3908_v8, %v1488_v7 }
 0x133   :  { %4858 = vst [vmem:[#allocation34_spill] sm:$0xff] %v3936_v29  ;;  %4859 = vst [vmem:[#allocation44_spill] sm:$0xff] %v3940_v28  ;;  %v1529_v25 = vmul.f32 %v3912_v12, %v1488_v7  ;;  %v1450_v33 = vmul.f32 %v3916_v58, %v1411_v61  ;;  %v1451_v42 = vmul.f32 %v3920_v35, %v1411_v61 }
 0x134   :  { %v1452_v19 = vmul.f32 %v3924_v53, %v1411_v61  ;;  %v1453_v5 = vmul.f32 %v3928_v3, %v1411_v61  ;;  %v1454_v1 = vmul.f32 %v3932_v48, %v1411_v61  ;;  %v1455_v9 = vmul.f32 %v3936_v29, %v1411_v61 }
 0x135   :  { %v1456_v43 = vmul.f32 %v3940_v28, %v1411_v61  ;;  %v1457_v2 = vmul.f32 %v3944_v13, %v1411_v61  ;;  %v1466_v8 = vadd.f32 %v1450_v33, %v1389_v24  ;;  %v1467_v30 = vadd.f32 %v1451_v42, %v1390_v38  ;;  %v1565_v42 = vpop.permute.xlu1 %1564 }
 0x136   :  { %v1468_v12 = vadd.f32 %v1452_v19, %v1391_v46  ;;  %v1469_v52 = vadd.f32 %v1453_v5, %v1392_v44  ;;  %v1470_v31 = vadd.f32 %v1454_v1, %v1393_v22  ;;  %v1471_v58 = vadd.f32 %v1455_v9, %v1394_v41 }
 0x137   :  { %v1472_v0 = vadd.f32 %v1456_v43, %v1395_v62  ;;  %v1473_v35 = vadd.f32 %v1457_v2, %v1396_v51  ;;  %v1530_v53 = vmul.f32 %v3948_v57, %v1488_v7  ;;  %v1531_v3 = vmul.f32 %v3952_v17, %v1488_v7 }
 0x138   :  { %v1532_v48 = vmul.f32 %v3956_v56, %v1488_v7  ;;  %v1533_v29 = vmul.f32 %v3960_v18, %v1488_v7  ;;  %v1534_v28 = vmul.f32 %v3964_v49, %v1488_v7  ;;  %v3984_v33 = vrot.slane %v3675_v14, %v4860_v55 }
 0x139   :  { %v3988_v1 = vrot.slane %v3678_v36, %v4860_v55  ;;  %v3992_v43 = vrot.slane %v3681_v39, %v4860_v55  ;;  %v1543_v5 = vadd.f32 %v1527_v54, %v1466_v8  ;;  %v1544_v19 = vadd.f32 %v1528_v10, %v1467_v30 }
 0x13a   :  { %v1545_v62 = vadd.f32 %v1529_v25, %v1468_v12  ;;  %v1546_v22 = vadd.f32 %v1530_v53, %v1469_v52  ;;  %v1547_v38 = vadd.f32 %v1531_v3, %v1470_v31  ;;  %v1548_v41 = vadd.f32 %v1532_v48, %v1471_v58 }
 0x13b   :  { %4861 = vst [vmem:[#allocation48_spill] sm:$0xff] %v3988_v1  ;;  %4862 = vst [vmem:[#allocation51_spill] sm:$0xff] %v3992_v43  ;;  %v1549_v51 = vadd.f32 %v1533_v29, %v1472_v0  ;;  %v1550_v2 = vadd.f32 %v1534_v28, %v1473_v35  ;;  %v3996_v61 = vrot.slane %v3684_v40, %v4860_v55 }
 0x13c   :  { %v4000_v24 = vrot.slane %v3687_v47, %v4860_v55  ;;  %v4004_v46 = vrot.slane %v3690_v6, %v4860_v55  ;;  %v4008_v52 = vrot.slane %v3693_v11, %v4860_v55  ;;  %v4012_v0 = vrot.slane %v3696_v60, %v4860_v55 }
 0x13d   :  { %4863 = vst [vmem:[#allocation12_spill] sm:$0xff] %v3996_v61  ;;  %v1604_v31 = vmul.f32 %v3984_v33, %v1565_v42  ;;  %v1605_v30 = vmul.f32 %v3988_v1, %v1565_v42  ;;  %v1606_v8 = vmul.f32 %v3992_v43, %v1565_v42  ;;  %v1105_v12 = vadd.f32 %v3867_v50, %v3820_v63  ;;  %v4868_v63 = vld [vmem:[#allocation56_spill] sm:$0xff] }
 0x13e   :  { %4864 = vst [vmem:[#allocation18_spill] sm:$0xff] %v4000_v24  ;;  %4865 = vst [vmem:[#allocation19_spill] sm:$0xff] %v4004_v46  ;;  %v1106_v44 = vadd.f32 %v3870_v37, %v3823_v34  ;;  %v1107_v58 = vadd.f32 %v3873_v20, %v3825_v26  ;;  %v1108_v35 = vadd.f32 %v3880_v15, %v3828_v16  ;;  %v1121_v20 = vpop.permute.xlu0 %1120 }
 0x13f   :  { %4866 = vst [vmem:[#allocation21_spill] sm:$0xff] %v4008_v52  ;;  %4867 = vst [vmem:[#allocation22_spill] sm:$0xff] %v4012_v0  ;;  %v1109_v55 = vadd.f32 %v3883_v4, %v3830_v32  ;;  %v1110_v53 = vadd.f32 %v3886_v21, %v3832_v23  ;;  %v1111_v3 = vadd.f32 %v3889_v59, %v3834_v27 }
 0x140   :  { %v1112_v50 = vadd.f32 %v4868_v63, %v3836_v45  ;;  %v1607_v34 = vmul.f32 %v3996_v61, %v1565_v42  ;;  %v1608_v37 = vmul.f32 %v4000_v24, %v1565_v42  ;;  %v1609_v26 = vmul.f32 %v4004_v46, %v1565_v42 }
 0x141   :  { %v1610_v16 = vmul.f32 %v4008_v52, %v1565_v42  ;;  %v1611_v32 = vmul.f32 %v4012_v0, %v1565_v42  ;;  %v4038_v15 = vadd.f32 %v1604_v31, %v1543_v5  ;;  %v4040_v23 = vadd.f32 %v1121_v20, %v1105_v12  ;;  %v4869_v42 = vld [vmem:[#allocation10_spill] sm:$0xff] }
 0x142   :  { %v4042_v4 = vadd.f32 %v1121_v20, %v1106_v44  ;;  %v4044_v27 = vadd.f32 %v1605_v30, %v1544_v19  ;;  %v4046_v45 = vadd.f32 %v1121_v20, %v1107_v58  ;;  %v4048_v21 = vadd.f32 %v1121_v20, %v1108_v35  ;;  %v1719_v58 = vpop.permute.xlu1 %1718 }
 0x143   :  { %v4050_v59 = vadd.f32 %v1121_v20, %v1109_v55  ;;  %v1622_v48 = vadd.f32 %v1606_v8, %v1545_v62  ;;  %v4052_v29 = vadd.f32 %v1121_v20, %v1110_v53  ;;  %v4054_v28 = vadd.f32 %v1121_v20, %v1111_v3 }
 0x144   :  { %v4056_v7 = vadd.f32 %v1121_v20, %v1112_v50  ;;  %v1623_v54 = vadd.f32 %v1607_v34, %v1546_v22  ;;  %v1624_v10 = vadd.f32 %v1608_v37, %v1547_v38  ;;  %v1625_v25 = vadd.f32 %v1609_v26, %v1548_v41  ;;  %v4878_v37 = vld [vmem:[#allocation14_spill] sm:$0xff] }
 0x145   :  { %v1626_v9 = vadd.f32 %v1610_v16, %v1549_v51  ;;  %v4059_v5 = vmul.f32 0.01, %v4040_v23  ;;  %v4062_v19 = vmul.f32 0.01, %v4042_v4  ;;  %v4066_v31 = vrot.slane %v3675_v14, %v4869_v42 }
 0x146   :  { %v4070_v62 = vrot.slane %v3678_v36, %v4869_v42  ;;  %v4073_v30 = vmul.f32 0.01, %v4046_v45  ;;  %v4076_v22 = vmul.f32 0.01, %v4048_v21  ;;  %v4079_v38 = vmul.f32 0.01, %v4050_v59 }
 0x147   :  { %4870 = vst [vmem:[#allocation24_spill] sm:$0xff] %v4066_v31  ;;  %v4083_v41 = vrot.slane %v3681_v39, %v4869_v42  ;;  %v1627_v51 = vadd.f32 %v1611_v32, %v1550_v2  ;;  %v4086_v8 = vmul.f32 0.01, %v4052_v29  ;;  %v4089_v12 = vmul.f32 0.01, %v4054_v28 }
 0x148   :  { %4871 = vst [vmem:[#allocation28_spill] sm:$0xff] %v4070_v62  ;;  %v4092_v44 = vmul.f32 0.01, %v4056_v7  ;;  %vm1147_vm8 = vcmp.gt.f32.partialorder %v4040_v23, 0.0  ;;  %vm1148_vm9 = vcmp.gt.f32.partialorder %v4042_v4, 0.0  ;;  %vm1149_vm10 = vcmp.gt.f32.partialorder %v4046_v45, 0.0 }
 0x149   :  { %4872 = vst [vmem:[#allocation32_spill] sm:$0xff] %v4083_v41  ;;  %vm1150_vm11 = vcmp.gt.f32.partialorder %v4048_v21, 0.0  ;;  %v4100_v2 = vrot.slane %v3684_v40, %v4869_v42  ;;  %v4104_v35 = vrot.slane %v3687_v47, %v4869_v42  ;;  %v4108_v55 = vrot.slane %v3690_v6, %v4869_v42 }
 0x14a   :  { %v4112_v53 = vrot.slane %v3693_v11, %v4869_v42  ;;  %vm1151_vm12 = vcmp.gt.f32.partialorder %v4050_v59, 0.0  ;;  %vm1152_vm13 = vcmp.gt.f32.partialorder %v4052_v29, 0.0  ;;  %vm1153_vm14 = vcmp.gt.f32.partialorder %v4054_v28, 0.0 }
 0x14b   :  { %4873 = vst [vmem:[#allocation42_spill] sm:$0xff] %v4100_v2  ;;  %4874 = vst [vmem:[#allocation13_spill] sm:$0xff] %v4104_v35  ;;  %vm1154_vm15 = vcmp.gt.f32.partialorder %v4056_v7, 0.0  ;;  %v4120_v3 = vrot.slane %v3696_v60, %v4869_v42  ;;  %v1758_v63 = vmul.f32 %v4066_v31, %v1719_v58  ;;  %v1759_v50 = vmul.f32 %v4070_v62, %v1719_v58  ;;  %v1642_v31 = vpop.permute.xlu0 %1641 }
 0x14c   :  { %4875 = vst [vmem:[#allocation8_spill] sm:$0xff] %v4108_v55  ;;  %4876 = vst [vmem:[#allocation9_spill] sm:$0xff] %v4112_v53  ;;  %v1760_v34 = vmul.f32 %v4083_v41, %v1719_v58  ;;  %v4127_v26 = vrot.slane %v3675_v14, %v4878_v37  ;;  %v4131_v16 = vrot.slane %v3678_v36, %v4878_v37 }
 0x14d   :  { %4877 = vst [vmem:[#allocation56_spill] sm:$0xff] %v4120_v3  ;;  %v4135_v20 = vrot.slane %v3681_v39, %v4878_v37  ;;  %v4139_v32 = vrot.slane %v3684_v40, %v4878_v37  ;;  %v4143_v42 = vrot.slane %v3687_v47, %v4878_v37  ;;  %v4147_v14 = vrot.slane %v3690_v6, %v4878_v37 }
 0x14e   :  { %4879 = vst [vmem:[#allocation10_spill] sm:$0xff] %v4127_v26  ;;  %4880 = vst [vmem:[#allocation14_spill] sm:$0xff] %v4131_v16  ;;  %v4151_v36 = vrot.slane %v3693_v11, %v4878_v37  ;;  %v4155_v39 = vrot.slane %v3696_v60, %v4878_v37  ;;  %v1761_v41 = vmul.f32 %v4100_v2, %v1719_v58 }
 0x14f   :  { %4881 = vst [vmem:[#allocation60_spill] sm:$0xff] %v4135_v20  ;;  %4882 = vst [vmem:[#allocation61_spill] sm:$0xff] %v4139_v32  ;;  %v1762_v40 = vmul.f32 %v4104_v35, %v1719_v58  ;;  %v1763_v62 = vmul.f32 %v4108_v55, %v1719_v58  ;;  %v1764_v47 = vmul.f32 %v4112_v53, %v1719_v58  ;;  %v1201_v55 = vpop.permute.xlu1 %1200 }
 0x150   :  { %4883 = vst [vmem:[#allocation62_spill] sm:$0xff] %v4143_v42  ;;  %4884 = vst [vmem:[#allocation63_spill] sm:$0xff] %v4147_v14  ;;  %v1765_v6 = vmul.f32 %v4120_v3, %v1719_v58  ;;  %v1681_v0 = vmul.f32 %v4127_v26, %v1642_v31  ;;  %v1682_v11 = vmul.f32 %v4131_v16, %v1642_v31 }
 0x151   :  { %4885 = vst [vmem:[#allocation64_spill] sm:$0xff] %v4151_v36  ;;  %4886 = vst [vmem:[#allocation65_spill] sm:$0xff] %v4155_v39  ;;  %v1683_v52 = vmul.f32 %v4135_v20, %v1642_v31  ;;  %v1684_v60 = vmul.f32 %v4139_v32, %v1642_v31  ;;  %v1685_v37 = vmul.f32 %v4143_v42, %v1642_v31  ;;  %v4887_v32 = vld [vmem:[#allocation17_spill] sm:$0xff]  ;;  %v4888_v42 = vld [vmem:[#allocation30_spill] sm:$0xff] }
 0x152   :  { %v1686_v2 = vmul.f32 %v4147_v14, %v1642_v31  ;;  %v1687_v35 = vmul.f32 %v4151_v36, %v1642_v31  ;;  %v1688_v53 = vmul.f32 %v4155_v39, %v1642_v31  ;;  %v1697_v46 = vadd.f32 %v1681_v0, %v4038_v15  ;;  %v4889_v36 = vld [vmem:[#allocation31_spill] sm:$0xff]  ;;  %v4890_v31 = vld [vmem:[#allocation37_spill] sm:$0xff]  ;;  %v4891_v0 = vld [vmem:[#allocation40_spill] sm:$0xff] }
 0x153   :  { %v1698_v58 = vadd.f32 %v1682_v11, %v4044_v27  ;;  %v1699_v3 = vadd.f32 %v1683_v52, %v1622_v48  ;;  %v1700_v26 = vadd.f32 %v1684_v60, %v1623_v54  ;;  %v1701_v16 = vadd.f32 %v1685_v37, %v1624_v10  ;;  %v4892_v52 = vld [vmem:[#allocation41_spill] sm:$0xff]  ;;  %v4893_v48 = vld [vmem:[#allocation46_spill] sm:$0xff] }
 0x154   :  { %v1702_v24 = vadd.f32 %v1686_v2, %v1625_v25  ;;  %v1703_v20 = vadd.f32 %v1687_v35, %v1626_v9  ;;  %v1704_v61 = vadd.f32 %v1688_v53, %v1627_v51  ;;  %v4173_v43 = vmul.f32 %v4887_v32, %v1201_v55  ;;  %v4895_v2 = vld [vmem:[#allocation11_spill] sm:$0xff] }
 0x155   :  { %v4176_v14 = vmul.f32 %v4888_v42, %v1201_v55  ;;  %v4179_v1 = vmul.f32 %v4889_v36, %v1201_v55  ;;  %v4182_v39 = vmul.f32 %v4890_v31, %v1201_v55  ;;  %v4185_v15 = vmul.f32 %v4891_v0, %v1201_v55 }
 0x156   :  { %v4188_v27 = vmul.f32 %v4892_v52, %v1201_v55  ;;  %v4191_v54 = vmul.f32 %v4893_v48, %v1201_v55  ;;  %v1179_v10 = vsel %vm1147_vm8, %v4040_v23, %v4059_v5  ;;  %v1180_v25 = vsel %vm1148_vm9, %v4042_v4, %v4062_v19  ;;  %v4894_v5 = vld [vmem:[#allocation47_spill] sm:$0xff] }
 0x157   :  { %v1181_v9 = vsel %vm1149_vm10, %v4046_v45, %v4073_v30  ;;  %v1182_v51 = vsel %vm1150_vm11, %v4048_v21, %v4076_v22  ;;  %v1183_v23 = vsel %vm1151_vm12, %v4050_v59, %v4079_v38  ;;  %v1184_v4 = vsel %vm1152_vm13, %v4052_v29, %v4086_v8  ;;  %v1796_v38 = vpop.permute.xlu0 %1795 }
 0x158   :  { %v1185_v45 = vsel %vm1153_vm14, %v4054_v28, %v4089_v12  ;;  %v1186_v21 = vsel %vm1154_vm15, %v4056_v7, %v4092_v44  ;;  %v4226_v19 = vmul.f32 %v4894_v5, %v1201_v55  ;;  %v1774_v30 = vadd.f32 %v1758_v63, %v1697_v46 }
 0x159   :  { %v1775_v59 = vadd.f32 %v1759_v50, %v1698_v58  ;;  %v1776_v22 = vadd.f32 %v1760_v34, %v1699_v3  ;;  %v4229_v35 = vrot.slane %v1179_v10, %v4895_v2  ;;  %v4232_v29 = vrot.slane %v1180_v25, %v4895_v2  ;;  %v4904_v58 = vld [vmem:[#allocation7_spill] sm:$0xff] }
 0x15a   :  { %v4235_v28 = vrot.slane %v1181_v9, %v4895_v2  ;;  %v4238_v8 = vrot.slane %v1182_v51, %v4895_v2  ;;  %v4241_v7 = vrot.slane %v1183_v23, %v4895_v2  ;;  %v4244_v46 = vrot.slane %v1184_v4, %v4895_v2 }
 0x15b   :  { %4896 = vst [vmem:[#allocation17_spill] sm:$0xff] %v4229_v35  ;;  %4897 = vst [vmem:[#allocation30_spill] sm:$0xff] %v4232_v29  ;;  %v4247_v12 = vrot.slane %v1185_v45, %v4895_v2  ;;  %v4250_v44 = vrot.slane %v1186_v21, %v4895_v2  ;;  %v1777_v55 = vadd.f32 %v1761_v41, %v1700_v26  ;;  %v1262_v48 = vpop.permute.xlu0 %1261 }
 0x15c   :  { %4898 = vst [vmem:[#allocation31_spill] sm:$0xff] %v4235_v28  ;;  %4899 = vst [vmem:[#allocation37_spill] sm:$0xff] %v4238_v8  ;;  %v1778_v53 = vadd.f32 %v1762_v40, %v1701_v16  ;;  %v1779_v3 = vadd.f32 %v1763_v62, %v1702_v24  ;;  %v1780_v63 = vadd.f32 %v1764_v47, %v1703_v20  ;;  %v1873_v47 = vpop.permute.xlu1 %1872 }
 0x15d   :  { %4900 = vst [vmem:[#allocation40_spill] sm:$0xff] %v4241_v7  ;;  %4901 = vst [vmem:[#allocation41_spill] sm:$0xff] %v4244_v46  ;;  %v1781_v50 = vadd.f32 %v1765_v6, %v1704_v61  ;;  %v1835_v34 = vmul.f32 %v4229_v35, %v1796_v38  ;;  %v1836_v32 = vmul.f32 %v4232_v29, %v1796_v38 }
 0x15e   :  { %4902 = vst [vmem:[#allocation46_spill] sm:$0xff] %v4247_v12  ;;  %4903 = vst [vmem:[#allocation47_spill] sm:$0xff] %v4250_v44  ;;  %v1837_v42 = vmul.f32 %v4235_v28, %v1796_v38  ;;  %v1838_v36 = vmul.f32 %v4238_v8, %v1796_v38  ;;  %v1839_v11 = vmul.f32 %v4241_v7, %v1796_v38 }
 0x15f   :  { %v1840_v60 = vmul.f32 %v4244_v46, %v1796_v38  ;;  %v1841_v37 = vmul.f32 %v4247_v12, %v1796_v38  ;;  %v1842_v41 = vmul.f32 %v4250_v44, %v1796_v38  ;;  %v4260_v26 = vadd.f32 %v1835_v34, %v1774_v30  ;;  %v4918_v34 = vld [vmem:[#allocation36_spill] sm:$0xff] }
 0x160   :  { %v4262_v24 = vadd.f32 %v1836_v32, %v1775_v59  ;;  %v4264_v61 = vadd.f32 %v1837_v42, %v1776_v22  ;;  %v4266_v62 = vadd.f32 %v1838_v36, %v1777_v55  ;;  %v4268_v16 = vadd.f32 %v1839_v11, %v1778_v53  ;;  %v4914_v55 = vld [vmem:[#allocation16_spill] sm:$0xff]  ;;  %v4915_v53 = vld [vmem:[#allocation25_spill] sm:$0xff]  ;;  %v4919_v42 = vld [vmem:[#allocation39_spill] sm:$0xff] }
 0x161   :  { %v4270_v20 = vadd.f32 %v1840_v60, %v1779_v3  ;;  %v4272_v40 = vadd.f32 %v1841_v37, %v1780_v63  ;;  %v4274_v6 = vadd.f32 %v1842_v41, %v1781_v50  ;;  %v4277_v31 = vrot.slane %v1179_v10, %v4904_v58  ;;  %v4917_v50 = vld [vmem:[#allocation35_spill] sm:$0xff] }
 0x162   :  { %v4280_v0 = vrot.slane %v1180_v25, %v4904_v58  ;;  %v4283_v52 = vrot.slane %v1181_v9, %v4904_v58  ;;  %v4286_v5 = vrot.slane %v1182_v51, %v4904_v58  ;;  %v4289_v30 = vrot.slane %v1183_v23, %v4904_v58  ;;  %v4913_v23 = vld [vmem:[#allocation50_spill] sm:$0xff]  ;;  %v4920_v11 = vld [vmem:[#allocation43_spill] sm:$0xff] }
 0x163   :  { %4905 = vst [vmem:[#allocation11_spill] sm:$0xff] %v4277_v31  ;;  %v4292_v59 = vrot.slane %v1184_v4, %v4904_v58  ;;  %v4295_v22 = vrot.slane %v1185_v45, %v4904_v58  ;;  %v4298_v10 = vrot.slane %v1186_v21, %v4904_v58  ;;  %v4301_v25 = vmul.f32 %v4277_v31, %v1873_v47  ;;  %v4916_v45 = vld [vmem:[#allocation29_spill] sm:$0xff] }
 0x164   :  { %4906 = vst [vmem:[#allocation7_spill] sm:$0xff] %v4280_v0  ;;  %4907 = vst [vmem:[#allocation66_spill] sm:$0xff] %v4283_v52  ;;  %v4304_v9 = vmul.f32 %v4280_v0, %v1873_v47  ;;  %v4307_v51 = vmul.f32 %v4283_v52, %v1873_v47  ;;  %v1304_v38 = vmul.f32 %v4913_v23, %v1262_v48  ;;  %v4926_v0 = vld [vmem:[#allocation15_spill] sm:$0xff] }
 0x165   :  { %4908 = vst [vmem:[#allocation67_spill] sm:$0xff] %v4286_v5  ;;  %4909 = vst [vmem:[#allocation68_spill] sm:$0xff] %v4289_v30  ;;  %v1305_v4 = vmul.f32 %v4914_v55, %v1262_v48  ;;  %v1306_v3 = vmul.f32 %v4915_v53, %v1262_v48  ;;  %v1307_v63 = vmul.f32 %v4916_v45, %v1262_v48  ;;  %v1416_v55 = vpop.permute.xlu1 %1415 }
 0x166   :  { %4910 = vst [vmem:[#allocation69_spill] sm:$0xff] %v4292_v59  ;;  %4911 = vst [vmem:[#allocation70_spill] sm:$0xff] %v4295_v22  ;;  %v1308_v21 = vmul.f32 %v4917_v50, %v1262_v48  ;;  %v1309_v32 = vmul.f32 %v4918_v34, %v1262_v48  ;;  %v1310_v36 = vmul.f32 %v4919_v42, %v1262_v48  ;;  %v1339_v34 = vpop.permute.xlu0 %1338 }
 0x167   :  { %4912 = vst [vmem:[#allocation71_spill] sm:$0xff] %v4298_v10  ;;  %v1311_v60 = vmul.f32 %v4920_v11, %v1262_v48  ;;  %v4318_v37 = vmul.f32 %v4286_v5, %v1873_v47  ;;  %v4321_v41 = vmul.f32 %v4289_v30, %v1873_v47  ;;  %v4324_v58 = vmul.f32 %v4292_v59, %v1873_v47  ;;  %v4921_v5 = vld [vmem:[#allocation38_spill] sm:$0xff] }
 0x168   :  { %v4327_v23 = vmul.f32 %v4295_v22, %v1873_v47  ;;  %v1919_v53 = vmul.f32 %v4298_v10, %v1873_v47  ;;  %v1320_v45 = vadd.f32 %v1304_v38, %v4173_v43  ;;  %v1321_v50 = vadd.f32 %v1305_v4, %v4176_v14  ;;  %v4922_v47 = vld [vmem:[#allocation23_spill] sm:$0xff]  ;;  %v4923_v43 = vld [vmem:[#allocation26_spill] sm:$0xff]  ;;  %v4924_v14 = vld [vmem:[#allocation45_spill] sm:$0xff] }
 0x169   :  { %v1322_v48 = vadd.f32 %v1306_v3, %v4179_v1  ;;  %v1323_v42 = vadd.f32 %v1307_v63, %v4182_v39  ;;  %v1324_v11 = vadd.f32 %v1308_v21, %v4185_v15  ;;  %v1325_v59 = vadd.f32 %v1309_v32, %v4188_v27  ;;  %v4925_v1 = vld [vmem:[#allocation49_spill] sm:$0xff]  ;;  %v4927_v63 = vld [vmem:[#allocation52_spill] sm:$0xff]  ;;  %v1493_v7 = vpop.permute.xlu1 %1492 }
 0x16a   :  { %v1326_v30 = vadd.f32 %v1310_v36, %v4191_v54  ;;  %v1327_v22 = vadd.f32 %v1311_v60, %v4226_v19  ;;  %v1458_v52 = vmul.f32 %v4921_v5, %v1416_v55  ;;  %v1459_v10 = vmul.f32 %v4922_v47, %v1416_v55  ;;  %v4928_v21 = vld [vmem:[#allocation20_spill] sm:$0xff]  ;;  %v4929_v32 = vld [vmem:[#allocation53_spill] sm:$0xff]  ;;  %v4930_v36 = vld [vmem:[#allocation54_spill] sm:$0xff] }
 0x16b   :  { %v1460_v38 = vmul.f32 %v4923_v43, %v1416_v55  ;;  %v1381_v4 = vmul.f32 %v4924_v14, %v1339_v34  ;;  %v1382_v3 = vmul.f32 %v4925_v1, %v1339_v34  ;;  %v1383_v39 = vmul.f32 %v4926_v0, %v1339_v34  ;;  %v4931_v60 = vld [vmem:[#allocation55_spill] sm:$0xff] }
 0x16c   :  { %v1384_v15 = vmul.f32 %v4927_v63, %v1339_v34  ;;  %v1385_v27 = vmul.f32 %v4928_v21, %v1339_v34  ;;  %v1386_v54 = vmul.f32 %v4929_v32, %v1339_v34  ;;  %v1387_v19 = vmul.f32 %v4930_v36, %v1339_v34  ;;  %v4932_v0 = vld [vmem:[#allocation27_spill] sm:$0xff]  ;;  %v4933_v63 = vld [vmem:[#allocation33_spill] sm:$0xff]  ;;  %v4934_v21 = vld [vmem:[#allocation34_spill] sm:$0xff] }
 0x16d   :  { %v1388_v5 = vmul.f32 %v4931_v60, %v1339_v34  ;;  %v1397_v31 = vadd.f32 %v1381_v4, %v1320_v45  ;;  %v1398_v47 = vadd.f32 %v1382_v3, %v1321_v50  ;;  %v1399_v44 = vadd.f32 %v1383_v39, %v1322_v48  ;;  %v4935_v32 = vld [vmem:[#allocation44_spill] sm:$0xff]  ;;  %v1947_v3 = vpop.permute.xlu0 %1946 }
 0x16e   :  { %v1400_v43 = vadd.f32 %v1384_v15, %v1323_v42  ;;  %v1401_v12 = vadd.f32 %v1385_v27, %v1324_v11  ;;  %v1402_v14 = vadd.f32 %v1386_v54, %v1325_v59  ;;  %v1403_v46 = vadd.f32 %v1387_v19, %v1326_v30  ;;  %v4936_v42 = vld [vmem:[#allocation57_spill] sm:$0xff]  ;;  %v4937_v59 = vld [vmem:[#allocation58_spill] sm:$0xff] }
 0x16f   :  { %v1404_v1 = vadd.f32 %v1388_v5, %v1327_v22  ;;  %v1461_v8 = vmul.f32 %v4932_v0, %v1416_v55  ;;  %v1462_v28 = vmul.f32 %v4933_v63, %v1416_v55  ;;  %v1463_v29 = vmul.f32 %v4934_v21, %v1416_v55  ;;  %v4938_v22 = vld [vmem:[#allocation59_spill] sm:$0xff]  ;;  %v4939_v63 = vld [vmem:[#allocation48_spill] sm:$0xff] }
 0x170   :  { %v1464_v35 = vmul.f32 %v4935_v32, %v1416_v55  ;;  %v1465_v36 = vmul.f32 %v3944_v13, %v1416_v55  ;;  %v1474_v34 = vadd.f32 %v1458_v52, %v1397_v31  ;;  %v1475_v45 = vadd.f32 %v1459_v10, %v1398_v47 }
 0x171   :  { %v1476_v50 = vadd.f32 %v1460_v38, %v1399_v44  ;;  %v1477_v48 = vadd.f32 %v1461_v8, %v1400_v43  ;;  %v1535_v11 = vmul.f32 %v4936_v42, %v1493_v7  ;;  %v1536_v30 = vmul.f32 %v4937_v59, %v1493_v7  ;;  %v4942_v42 = vld [vmem:[#allocation18_spill] sm:$0xff]  ;;  %v4943_v59 = vld [vmem:[#allocation19_spill] sm:$0xff] }
 0x172   :  { %v1537_v4 = vmul.f32 %v4938_v22, %v1493_v7  ;;  %v1478_v39 = vadd.f32 %v1462_v28, %v1401_v12  ;;  %v1479_v15 = vadd.f32 %v1463_v29, %v1402_v14  ;;  %v1480_v27 = vadd.f32 %v1464_v35, %v1403_v46  ;;  %v1570_v28 = vpop.permute.xlu1 %1569  ;;  %v4944_v22 = vld [vmem:[#allocation21_spill] sm:$0xff] }
 0x173   :  { %v1481_v54 = vadd.f32 %v1465_v36, %v1404_v1  ;;  %v1538_v19 = vmul.f32 %v3948_v57, %v1493_v7  ;;  %v1539_v60 = vmul.f32 %v3952_v17, %v1493_v7  ;;  %v1540_v13 = vmul.f32 %v3956_v56, %v1493_v7 }
 0x174   :  { %v1541_v44 = vmul.f32 %v3960_v18, %v1493_v7  ;;  %v1542_v8 = vmul.f32 %v3964_v49, %v1493_v7  ;;  %v1551_v31 = vadd.f32 %v1535_v11, %v1474_v34  ;;  %v1552_v52 = vadd.f32 %v1536_v30, %v1475_v45  ;;  %v4940_v34 = vld [vmem:[#allocation51_spill] sm:$0xff] }
 0x175   :  { %v1553_v10 = vadd.f32 %v1537_v4, %v1476_v50  ;;  %v1928_v55 = vadd.f32 %v4301_v25, %v4260_v26  ;;  %v1929_v35 = vadd.f32 %v4304_v9, %v4262_v24  ;;  %v1930_v57 = vadd.f32 %v4307_v51, %v4264_v61  ;;  %v2042_v24 = vpop.permute.xlu0 %2041  ;;  %v4941_v50 = vld [vmem:[#allocation12_spill] sm:$0xff] }
 0x176   :  { %v1931_v17 = vadd.f32 %v4318_v37, %v4266_v62  ;;  %v1932_v56 = vadd.f32 %v4321_v41, %v4268_v16  ;;  %v1933_v18 = vadd.f32 %v4324_v58, %v4270_v20  ;;  %v1934_v49 = vadd.f32 %v4327_v23, %v4272_v40  ;;  %v2093_v23 = vpop.permute.xlu1 %2092 }
 0x177   :  { %v1935_v29 = vadd.f32 %v1919_v53, %v4274_v6  ;;  %v1954_v7 = vadd.f32 %v1947_v3, %v1928_v55  ;;  %v1955_v46 = vadd.f32 %v1947_v3, %v1929_v35  ;;  %v1956_v12 = vadd.f32 %v1947_v3, %v1930_v57 }
 0x178   :  { %v1957_v26 = vadd.f32 %v1947_v3, %v1931_v17  ;;  %v1958_v61 = vadd.f32 %v1947_v3, %v1932_v56  ;;  %v1959_v25 = vadd.f32 %v1947_v3, %v1933_v18  ;;  %v1960_v62 = vadd.f32 %v1947_v3, %v1934_v49 }
 0x179   :  { %v1961_v9 = vadd.f32 %v1947_v3, %v1935_v29  ;;  %v1554_v51 = vadd.f32 %v1538_v19, %v1477_v48  ;;  %v1555_v16 = vadd.f32 %v1539_v60, %v1478_v39  ;;  %v1556_v37 = vadd.f32 %v1540_v13, %v1479_v15  ;;  %v2023_v43 = vpop.permute.xlu0 %2022  ;;  %v4945_v3 = vld [vmem:[#allocation22_spill] sm:$0xff] }
 0x17a   :  { %vm1970_vm0 = vcmp.gt.f32.partialorder %v1954_v7, 0.0  ;;  %vm1971_vm1 = vcmp.gt.f32.partialorder %v1955_v46, 0.0  ;;  %vm1972_vm2 = vcmp.gt.f32.partialorder %v1956_v12, 0.0  ;;  %vm1973_vm3 = vcmp.gt.f32.partialorder %v1957_v26, 0.0 }
 0x17b   :  { %vm1974_vm4 = vcmp.gt.f32.partialorder %v1958_v61, 0.0  ;;  %v1557_v20 = vadd.f32 %v1541_v44, %v1480_v27  ;;  %v1986_v40 = vmul.f32 0.01, %v1954_v7  ;;  %v1987_v6 = vmul.f32 0.01, %v1955_v46 }
 0x17c   :  { %v1988_v41 = vmul.f32 0.01, %v1956_v12  ;;  %vm1975_vm5 = vcmp.gt.f32.partialorder %v1959_v25, 0.0  ;;  %vm1976_vm6 = vcmp.gt.f32.partialorder %v1960_v62, 0.0  ;;  %vm1977_vm7 = vcmp.gt.f32.partialorder %v1961_v9, 0.0 }
 0x17d   :  { %v1989_v58 = vmul.f32 0.01, %v1957_v26  ;;  %v1558_v53 = vadd.f32 %v1542_v8, %v1481_v54  ;;  %v1990_v38 = vmul.f32 0.01, %v1958_v61  ;;  %v1991_v5 = vmul.f32 0.01, %v1959_v25  ;;  %v2144_v8 = vpop.permute.xlu1 %2143  ;;  %v4422_v56 = vpop.permute.xlu0 %1646 }
 0x17e   :  { %v1992_v47 = vmul.f32 0.01, %v1960_v62  ;;  %v1993_v14 = vmul.f32 0.01, %v1961_v9  ;;  %v4378_v1 = vsel %vm1970_vm0, %v1954_v7, %v1986_v40  ;;  %v1612_v0 = vmul.f32 %v3984_v33, %v1570_v28 }
 0x17f   :  { %v1613_v21 = vmul.f32 %v4939_v63, %v1570_v28  ;;  %v4383_v32 = vsel %vm1971_vm1, %v1955_v46, %v1987_v6  ;;  %v4386_v36 = vsel %vm1972_vm2, %v1956_v12, %v1988_v41  ;;  %v1614_v45 = vmul.f32 %v4940_v34, %v1570_v28  ;;  %v4949_v41 = vld [vmem:[#allocation61_spill] sm:$0xff] }
 0x180   :  { %v1615_v48 = vmul.f32 %v4941_v50, %v1570_v28  ;;  %v1616_v11 = vmul.f32 %v4942_v42, %v1570_v28  ;;  %v1617_v30 = vmul.f32 %v4943_v59, %v1570_v28  ;;  %v1618_v4 = vmul.f32 %v4944_v22, %v1570_v28 }
 0x181   :  { %v1619_v33 = vmul.f32 %v4945_v3, %v1570_v28  ;;  %v4395_v39 = vsel %vm1973_vm3, %v1957_v26, %v1989_v58  ;;  %v4398_v15 = vsel %vm1974_vm4, %v1958_v61, %v1990_v38  ;;  %v4401_v27 = vsel %vm1975_vm5, %v1959_v25, %v1991_v5 }
 0x182   :  { %v4404_v54 = vsel %vm1976_vm6, %v1960_v62, %v1992_v47  ;;  %v4407_v19 = vsel %vm1977_vm7, %v1961_v9, %v1993_v14  ;;  %v4409_v60 = vadd.f32 %v1612_v0, %v1551_v31  ;;  %v4411_v13 = vadd.f32 %v1613_v21, %v1552_v52  ;;  %v4947_v9 = vld [vmem:[#allocation14_spill] sm:$0xff] }
 0x183   :  { %v4413_v44 = vadd.f32 %v1614_v45, %v1553_v10  ;;  %v4415_v55 = vadd.f32 %v1615_v48, %v1554_v51  ;;  %v4417_v35 = vadd.f32 %v1616_v11, %v1555_v16  ;;  %v4419_v57 = vadd.f32 %v1617_v30, %v1556_v37  ;;  %v4948_v16 = vld [vmem:[#allocation60_spill] sm:$0xff] }
 0x184   :  { %v2047_v17 = vrot.slane %v2042_v24, %v4895_v2  ;;  %v4424_v18 = vadd.f32 %v1618_v4, %v1557_v20  ;;  %v4426_v49 = vadd.f32 %v1619_v33, %v1558_v53  ;;  %v2098_v31 = vrot.slane %v2093_v23, %v4895_v2  ;;  %v4946_v24 = vld [vmem:[#allocation10_spill] sm:$0xff] }
 0x185   :  { %v2028_v52 = vrot.slane %v2023_v43, %v4895_v2  ;;  %v2149_v7 = vrot.slane %v2144_v8, %v4895_v2  ;;  %v4439_v61 = vmul.f32 %v4946_v24, %v4422_v56  ;;  %v4445_v51 = vmul.f32 %v4947_v9, %v4422_v56 }
 0x186   :  { %v2048_v10 = vmul.f32 %v2047_v17, %v4378_v1  ;;  %v2049_v29 = vmul.f32 %v2047_v17, %v4383_v32  ;;  %v2050_v28 = vmul.f32 %v2047_v17, %v4386_v36  ;;  %v2051_v46 = vmul.f32 %v2047_v17, %v4395_v39 }
 0x187   :  { %v2052_v12 = vmul.f32 %v2047_v17, %v4398_v15  ;;  %v2053_v26 = vmul.f32 %v2047_v17, %v4401_v27  ;;  %v2054_v25 = vmul.f32 %v2047_v17, %v4404_v54  ;;  %v2055_v62 = vmul.f32 %v2047_v17, %v4407_v19 }
 0x188   :  { %v4449_v37 = vmul.f32 %v4948_v16, %v4422_v56  ;;  %v2064_v20 = vrot.slane %v2048_v10, 1  ;;  %v2065_v40 = vrot.slane %v2049_v29, 1  ;;  %v2066_v6 = vrot.slane %v2050_v28, 1 }
 0x189   :  { %v4453_v58 = vmul.f32 %v4949_v41, %v4422_v56  ;;  %v2099_v23 = vmul.f32 %v2098_v31, %v4378_v1  ;;  %v2100_v53 = vmul.f32 %v2098_v31, %v4383_v32  ;;  %v2101_v38 = vmul.f32 %v2098_v31, %v4386_v36 }
 0x18a   :  { %v2102_v5 = vmul.f32 %v2098_v31, %v4395_v39  ;;  %v2067_v47 = vrot.slane %v2051_v46, 1  ;;  %v2068_v43 = vrot.slane %v2052_v12, 1  ;;  %v2069_v14 = vrot.slane %v2053_v26, 1 }
 0x18b   :  { %v2103_v0 = vmul.f32 %v2098_v31, %v4398_v15  ;;  %v2070_v63 = vrot.slane %v2054_v25, 1  ;;  %v2071_v21 = vrot.slane %v2055_v62, 1  ;;  %v2104_v34 = vmul.f32 %v2098_v31, %v4401_v27 }
 0x18c   :  { %v2105_v45 = vmul.f32 %v2098_v31, %v4404_v54  ;;  %v2106_v50 = vmul.f32 %v2098_v31, %v4407_v19  ;;  %v2115_v48 = vrot.slane %v2099_v23, 2  ;;  %v2116_v42 = vrot.slane %v2100_v53, 2 }
 0x18d   :  { %v2117_v11 = vrot.slane %v2101_v38, 2  ;;  %v2118_v59 = vrot.slane %v2102_v5, 2  ;;  %v2029_v30 = vmul.f32 %v2028_v52, %v4378_v1  ;;  %v2030_v22 = vmul.f32 %v2028_v52, %v4383_v32 }
 0x18e   :  { %v2031_v4 = vmul.f32 %v2028_v52, %v4386_v36  ;;  %v2119_v3 = vrot.slane %v2103_v0, 2  ;;  %v2032_v33 = vmul.f32 %v2028_v52, %v4395_v39  ;;  %v2033_v8 = vmul.f32 %v2028_v52, %v4398_v15 }
 0x18f   :  { %v2034_v17 = vmul.f32 %v2028_v52, %v4401_v27  ;;  %v2035_v10 = vmul.f32 %v2028_v52, %v4404_v54  ;;  %v2080_v31 = vadd.f32 %v2064_v20, %v2029_v30  ;;  %v2081_v29 = vadd.f32 %v2065_v40, %v2030_v22 }
 0x190   :  { %v2082_v28 = vadd.f32 %v2066_v6, %v2031_v4  ;;  %v2120_v46 = vrot.slane %v2104_v34, 2  ;;  %v2121_v12 = vrot.slane %v2105_v45, 2  ;;  %v2122_v26 = vrot.slane %v2106_v50, 2 }
 0x191   :  { %v2036_v24 = vmul.f32 %v2028_v52, %v4407_v19  ;;  %v2083_v25 = vadd.f32 %v2067_v47, %v2032_v33  ;;  %v2084_v62 = vadd.f32 %v2068_v43, %v2033_v8  ;;  %v2085_v9 = vadd.f32 %v2069_v14, %v2034_v17 }
 0x192   :  { %v2086_v16 = vadd.f32 %v2070_v63, %v2035_v10  ;;  %v2131_v23 = vadd.f32 %v2115_v48, %v2080_v31  ;;  %v2132_v53 = vadd.f32 %v2116_v42, %v2081_v29  ;;  %v2133_v38 = vadd.f32 %v2117_v11, %v2082_v28  ;;  %v4950_v31 = vld [vmem:[#allocation62_spill] sm:$0xff] }
 0x193   :  { %v2087_v41 = vadd.f32 %v2071_v21, %v2036_v24  ;;  %v2150_v5 = vmul.f32 %v2149_v7, %v4378_v1  ;;  %v2151_v0 = vmul.f32 %v2149_v7, %v4383_v32  ;;  %v2152_v20 = vmul.f32 %v2149_v7, %v4386_v36 }
 0x194   :  { %v2153_v40 = vmul.f32 %v2149_v7, %v4395_v39  ;;  %v2154_v6 = vmul.f32 %v2149_v7, %v4398_v15  ;;  %v2155_v52 = vmul.f32 %v2149_v7, %v4401_v27  ;;  %v2156_v47 = vmul.f32 %v2149_v7, %v4404_v54 }
 0x195   :  { %v2157_v43 = vmul.f32 %v2149_v7, %v4407_v19  ;;  %v2134_v14 = vadd.f32 %v2118_v59, %v2083_v25  ;;  %v2135_v63 = vadd.f32 %v2119_v3, %v2084_v62  ;;  %v2136_v21 = vadd.f32 %v2120_v46, %v2085_v9  ;;  %v4951_v7 = vld [vmem:[#allocation63_spill] sm:$0xff]  ;;  %v4952_v3 = vld [vmem:[#allocation64_spill] sm:$0xff]  ;;  %v4953_v46 = vld [vmem:[#allocation65_spill] sm:$0xff] }
 0x196   :  { %v2137_v34 = vadd.f32 %v2121_v12, %v2086_v16  ;;  %v2138_v45 = vadd.f32 %v2122_v26, %v2087_v41  ;;  %v2166_v50 = vrot.slane %v2150_v5, 3  ;;  %v2167_v48 = vrot.slane %v2151_v0, 3  ;;  %v2195_v26 = vpop.permute.xlu1 %2194  ;;  %v1724_v16 = vpop.permute.xlu0 %1723 }
 0x197   :  { %v2168_v42 = vrot.slane %v2152_v20, 3  ;;  %v2169_v11 = vrot.slane %v2153_v40, 3  ;;  %v2170_v30 = vrot.slane %v2154_v6, 3  ;;  %v2171_v22 = vrot.slane %v2155_v52, 3  ;;  %v4955_v52 = vld [vmem:[#allocation28_spill] sm:$0xff] }
 0x198   :  { %v2172_v4 = vrot.slane %v2156_v47, 3  ;;  %v2173_v33 = vrot.slane %v2157_v43, 3  ;;  %v2182_v8 = vadd.f32 %v2166_v50, %v2131_v23  ;;  %v2183_v17 = vadd.f32 %v2167_v48, %v2132_v53  ;;  %v4957_v43 = vld [vmem:[#allocation42_spill] sm:$0xff] }
 0x199   :  { %v2184_v10 = vadd.f32 %v2168_v42, %v2133_v38  ;;  %v1693_v29 = vmul.f32 %v4950_v31, %v4422_v56  ;;  %v1694_v59 = vmul.f32 %v4951_v7, %v4422_v56  ;;  %v1695_v28 = vmul.f32 %v4952_v3, %v4422_v56 }
 0x19a   :  { %v1696_v12 = vmul.f32 %v4953_v46, %v4422_v56  ;;  %v2185_v24 = vadd.f32 %v2169_v11, %v2134_v14  ;;  %v2186_v25 = vadd.f32 %v2170_v30, %v2135_v63  ;;  %v2187_v62 = vadd.f32 %v2171_v22, %v2136_v21  ;;  %v4958_v63 = vld [vmem:[#allocation13_spill] sm:$0xff] }
 0x19b   :  { %v2188_v9 = vadd.f32 %v2172_v4, %v2137_v34  ;;  %v2189_v41 = vadd.f32 %v2173_v33, %v2138_v45  ;;  %v1705_v23 = vadd.f32 %v4439_v61, %v4409_v60  ;;  %v1706_v53 = vadd.f32 %v4445_v51, %v4411_v13  ;;  %v4954_v60 = vld [vmem:[#allocation24_spill] sm:$0xff]  ;;  %v4960_v11 = vld [vmem:[#allocation9_spill] sm:$0xff] }
 0x19c   :  { %v1707_v38 = vadd.f32 %v4449_v37, %v4413_v44  ;;  %v1708_v5 = vadd.f32 %v4453_v58, %v4415_v55  ;;  %v1709_v56 = vadd.f32 %v1693_v29, %v4417_v35  ;;  %v1710_v0 = vadd.f32 %v1694_v59, %v4419_v57  ;;  %v4956_v58 = vld [vmem:[#allocation32_spill] sm:$0xff] }
 0x19d   :  { %v2200_v20 = vrot.slane %v2195_v26, %v4895_v2  ;;  %v1711_v40 = vadd.f32 %v1695_v28, %v4424_v18  ;;  %v1712_v6 = vadd.f32 %v1696_v12, %v4426_v49  ;;  %v1766_v61 = vmul.f32 %v4954_v60, %v1724_v16  ;;  %v4959_v34 = vld [vmem:[#allocation8_spill] sm:$0xff]  ;;  %v2246_v28 = vpop.permute.xlu1 %2245 }
 0x19e   :  { %v1767_v13 = vmul.f32 %v4955_v52, %v1724_v16  ;;  %v1768_v47 = vmul.f32 %v4956_v58, %v1724_v16  ;;  %v1769_v14 = vmul.f32 %v4957_v43, %v1724_v16  ;;  %v1770_v21 = vmul.f32 %v4958_v63, %v1724_v16  ;;  %v1801_v52 = vpop.permute.xlu0 %1800  ;;  %v4964_v63 = vld [vmem:[#allocation31_spill] sm:$0xff] }
 0x19f   :  { %v2201_v51 = vmul.f32 %v2200_v20, %v4378_v1  ;;  %v2202_v44 = vmul.f32 %v2200_v20, %v4383_v32  ;;  %v2203_v55 = vmul.f32 %v2200_v20, %v4386_v36  ;;  %v2204_v35 = vmul.f32 %v2200_v20, %v4395_v39 }
 0x1a0   :  { %v2205_v57 = vmul.f32 %v2200_v20, %v4398_v15  ;;  %v2206_v37 = vmul.f32 %v2200_v20, %v4401_v27  ;;  %v2207_v18 = vmul.f32 %v2200_v20, %v4404_v54  ;;  %v2208_v49 = vmul.f32 %v2200_v20, %v4407_v19  ;;  %v4961_v20 = vld [vmem:[#allocation56_spill] sm:$0xff] }
 0x1a1   :  { %v1771_v45 = vmul.f32 %v4959_v34, %v1724_v16  ;;  %v2217_v50 = vrot.slane %v2201_v51, 4  ;;  %v2218_v48 = vrot.slane %v2202_v44, 4  ;;  %v2219_v42 = vrot.slane %v2203_v55, 4  ;;  %v4965_v34 = vld [vmem:[#allocation37_spill] sm:$0xff] }
 0x1a2   :  { %v1772_v30 = vmul.f32 %v4960_v11, %v1724_v16  ;;  %v2220_v22 = vrot.slane %v2204_v35, 4  ;;  %v2221_v4 = vrot.slane %v2205_v57, 4  ;;  %v2222_v33 = vrot.slane %v2206_v37, 4 }
 0x1a3   :  { %v2223_v31 = vrot.slane %v2207_v18, 4  ;;  %v2224_v29 = vrot.slane %v2208_v49, 4  ;;  %v2233_v7 = vadd.f32 %v2217_v50, %v2182_v8  ;;  %v2234_v59 = vadd.f32 %v2218_v48, %v2183_v17  ;;  %v4966_v50 = vld [vmem:[#allocation40_spill] sm:$0xff] }
 0x1a4   :  { %v2235_v3 = vadd.f32 %v2219_v42, %v2184_v10  ;;  %v2236_v46 = vadd.f32 %v2220_v22, %v2185_v24  ;;  %v2237_v12 = vadd.f32 %v2221_v4, %v2186_v25  ;;  %v2238_v26 = vadd.f32 %v2222_v33, %v2187_v62  ;;  %v4962_v10 = vld [vmem:[#allocation17_spill] sm:$0xff]  ;;  %v2297_v33 = vpop.permute.xlu1 %2296 }
 0x1a5   :  { %v1773_v60 = vmul.f32 %v4961_v20, %v1724_v16  ;;  %v2239_v51 = vadd.f32 %v2223_v31, %v2188_v9  ;;  %v2240_v44 = vadd.f32 %v2224_v29, %v2189_v41  ;;  %v1782_v55 = vadd.f32 %v1766_v61, %v1705_v23  ;;  %v4967_v22 = vld [vmem:[#allocation41_spill] sm:$0xff] }
 0x1a6   :  { %v1783_v58 = vadd.f32 %v1767_v13, %v1706_v53  ;;  %v1784_v43 = vadd.f32 %v1768_v47, %v1707_v38  ;;  %v1785_v35 = vadd.f32 %v1769_v14, %v1708_v5  ;;  %v1786_v57 = vadd.f32 %v1770_v21, %v1709_v56  ;;  %v4963_v47 = vld [vmem:[#allocation30_spill] sm:$0xff] }
 0x1a7   :  { %v2251_v37 = vrot.slane %v2246_v28, %v4895_v2  ;;  %v1787_v18 = vadd.f32 %v1771_v45, %v1710_v0  ;;  %v1788_v8 = vadd.f32 %v1772_v30, %v1711_v40  ;;  %v1789_v17 = vadd.f32 %v1773_v60, %v1712_v6  ;;  %v4968_v28 = vld [vmem:[#allocation46_spill] sm:$0xff]  ;;  %v4969_v60 = vld [vmem:[#allocation47_spill] sm:$0xff] }
 0x1a8   :  { %v1843_v49 = vmul.f32 %v4962_v10, %v1801_v52  ;;  %v1844_v14 = vmul.f32 %v4963_v47, %v1801_v52  ;;  %v1845_v21 = vmul.f32 %v4964_v63, %v1801_v52  ;;  %v1846_v45 = vmul.f32 %v4965_v34, %v1801_v52 }
 0x1a9   :  { %v2252_v24 = vmul.f32 %v2251_v37, %v4378_v1  ;;  %v2253_v25 = vmul.f32 %v2251_v37, %v4383_v32  ;;  %v2254_v62 = vmul.f32 %v2251_v37, %v4386_v36  ;;  %v2255_v9 = vmul.f32 %v2251_v37, %v4395_v39 }
 0x1aa   :  { %v2256_v16 = vmul.f32 %v2251_v37, %v4398_v15  ;;  %v2257_v41 = vmul.f32 %v2251_v37, %v4401_v27  ;;  %v2258_v23 = vmul.f32 %v2251_v37, %v4404_v54  ;;  %v2259_v53 = vmul.f32 %v2251_v37, %v4407_v19 }
 0x1ab   :  { %v2268_v38 = vrot.slane %v2252_v24, 5  ;;  %v2269_v5 = vrot.slane %v2253_v25, 5  ;;  %v2270_v56 = vrot.slane %v2254_v62, 5  ;;  %v2271_v0 = vrot.slane %v2255_v9, 5 }
 0x1ac   :  { %v2272_v40 = vrot.slane %v2256_v16, 5  ;;  %v2273_v6 = vrot.slane %v2257_v41, 5  ;;  %v2274_v61 = vrot.slane %v2258_v23, 5  ;;  %v2275_v13 = vrot.slane %v2259_v53, 5 }
 0x1ad   :  { %v1847_v48 = vmul.f32 %v4966_v50, %v1801_v52  ;;  %v2284_v42 = vadd.f32 %v2268_v38, %v2233_v7  ;;  %v2285_v11 = vadd.f32 %v2269_v5, %v2234_v59  ;;  %v2286_v30 = vadd.f32 %v2270_v56, %v2235_v3  ;;  %v4972_v5 = vld [vmem:[#allocation66_spill] sm:$0xff] }
 0x1ae   :  { %v1848_v4 = vmul.f32 %v4967_v22, %v1801_v52  ;;  %v2287_v31 = vadd.f32 %v2271_v0, %v2236_v46  ;;  %v2288_v29 = vadd.f32 %v2272_v40, %v2237_v12  ;;  %v1849_v20 = vmul.f32 %v4968_v28, %v1801_v52  ;;  %v1878_v46 = vpop.permute.xlu0 %1877  ;;  %v4973_v0 = vld [vmem:[#allocation67_spill] sm:$0xff]  ;;  %v4975_v22 = vld [vmem:[#allocation69_spill] sm:$0xff] }
 0x1af   :  { %v1850_v37 = vmul.f32 %v4969_v60, %v1801_v52  ;;  %v2289_v10 = vadd.f32 %v2273_v6, %v2238_v26  ;;  %v2290_v24 = vadd.f32 %v2274_v61, %v2239_v51  ;;  %v4533_v25 = vadd.f32 %v2275_v13, %v2240_v44  ;;  %v4974_v6 = vld [vmem:[#allocation68_spill] sm:$0xff] }
 0x1b0   :  { %v1859_v62 = vadd.f32 %v1843_v49, %v1782_v55  ;;  %v1860_v9 = vadd.f32 %v1844_v14, %v1783_v58  ;;  %v1861_v16 = vadd.f32 %v1845_v21, %v1784_v43  ;;  %v1862_v41 = vadd.f32 %v1846_v45, %v1785_v35 }
 0x1b1   :  { %v2302_v7 = vrot.slane %v2297_v33, %v4895_v2  ;;  %v1863_v59 = vadd.f32 %v1847_v48, %v1786_v57  ;;  %v1864_v3 = vadd.f32 %v1848_v4, %v1787_v18  ;;  %v1865_v23 = vadd.f32 %v1849_v20, %v1788_v8  ;;  %v4970_v18 = vld [vmem:[#allocation11_spill] sm:$0xff]  ;;  %v1952_v48 = vpop.permute.xlu1 %1951  ;;  %v4976_v33 = vld [vmem:[#allocation70_spill] sm:$0xff] }
 0x1b2   :  { %v1866_v53 = vadd.f32 %v1850_v37, %v1789_v17  ;;  %v1920_v8 = vmul.f32 %v4970_v18, %v1878_v46  ;;  %v4971_v17 = vld [vmem:[#allocation7_spill] sm:$0xff]  ;;  %v1922_v56 = vmul.f32 %v4972_v5, %v1878_v46  ;;  %v1923_v40 = vmul.f32 %v4973_v0, %v1878_v46 }
 0x1b3   :  { %v2303_v12 = vmul.f32 %v2302_v7, %v4378_v1  ;;  %v2304_v38 = vmul.f32 %v2302_v7, %v4383_v32  ;;  %v2305_v26 = vmul.f32 %v2302_v7, %v4386_v36  ;;  %v2306_v52 = vmul.f32 %v2302_v7, %v4395_v39  ;;  %v4977_v20 = vld [vmem:[#allocation71_spill] sm:$0xff] }
 0x1b4   :  { %v2307_v51 = vmul.f32 %v2302_v7, %v4398_v15  ;;  %v2308_v44 = vmul.f32 %v2302_v7, %v4401_v27  ;;  %v2309_v55 = vmul.f32 %v2302_v7, %v4404_v54  ;;  %v2310_v58 = vmul.f32 %v2302_v7, %v4407_v19 }
 0x1b5   :  { %v2319_v43 = vrot.slane %v2303_v12, 6  ;;  %v2320_v35 = vrot.slane %v2304_v38, 6  ;;  %v2321_v57 = vrot.slane %v2305_v26, 6  ;;  %v1921_v49 = vmul.f32 %v4971_v17, %v1878_v46 }
 0x1b6   :  { %v1924_v61 = vmul.f32 %v4974_v6, %v1878_v46  ;;  %v2322_v13 = vrot.slane %v2306_v52, 6  ;;  %v2323_v47 = vrot.slane %v2307_v51, 6  ;;  %v2324_v14 = vrot.slane %v2308_v44, 6 }
 0x1b7   :  { %v2325_v63 = vrot.slane %v2309_v55, 6  ;;  %v2326_v21 = vrot.slane %v2310_v58, 6  ;;  %v4549_v34 = vadd.f32 %v2319_v43, %v2284_v42  ;;  %v4551_v45 = vadd.f32 %v2320_v35, %v2285_v11  ;;  %v2348_v43 = vpop.permute.xlu0 %2347 }
 0x1b8   :  { %v4553_v50 = vadd.f32 %v2321_v57, %v2286_v30  ;;  %v1925_v4 = vmul.f32 %v4975_v22, %v1878_v46  ;;  %v1926_v28 = vmul.f32 %v4976_v33, %v1878_v46  ;;  %v1927_v60 = vmul.f32 %v4977_v20, %v1878_v46 }
 0x1b9   :  { %v1936_v37 = vadd.f32 %v1920_v8, %v1859_v62  ;;  %v1937_v7 = vadd.f32 %v1921_v49, %v1860_v9  ;;  %v1938_v12 = vadd.f32 %v1922_v56, %v1861_v16  ;;  %v1939_v38 = vadd.f32 %v1923_v40, %v1862_v41 }
 0x1ba   :  { %v1940_v26 = vadd.f32 %v1924_v61, %v1863_v59  ;;  %v1941_v52 = vadd.f32 %v1925_v4, %v1864_v3  ;;  %v1942_v51 = vadd.f32 %v1926_v28, %v1865_v23  ;;  %v1943_v42 = vadd.f32 %v1927_v60, %v1866_v53  ;;  %v2426_v28 = vpop.permute.xlu1 %2425 }
 0x1bb   :  { %v1962_v44 = vadd.f32 %v1952_v48, %v1936_v37  ;;  %v1963_v11 = vadd.f32 %v1952_v48, %v1937_v7  ;;  %v1964_v55 = vadd.f32 %v1952_v48, %v1938_v12  ;;  %v1965_v30 = vadd.f32 %v1952_v48, %v1939_v38 }
 0x1bc   :  { %v1966_v58 = vadd.f32 %v1952_v48, %v1940_v26  ;;  %v2338_v35 = vadd.f32 %v2322_v13, %v2287_v31  ;;  %v1967_v57 = vadd.f32 %v1952_v48, %v1941_v52  ;;  %v1968_v18 = vadd.f32 %v1952_v48, %v1942_v51 }
 0x1bd   :  { %v1969_v17 = vadd.f32 %v1952_v48, %v1943_v42  ;;  %v2339_v5 = vadd.f32 %v2323_v47, %v2288_v29  ;;  %v2340_v46 = vadd.f32 %v2324_v14, %v2289_v10  ;;  %v2341_v62 = vadd.f32 %v2325_v63, %v2290_v24  ;;  %v2399_v24 = vpop.permute.xlu0 %2398 }
 0x1be   :  { %vm1978_vm8 = vcmp.gt.f32.partialorder %v1962_v44, 0.0  ;;  %vm1979_vm9 = vcmp.gt.f32.partialorder %v1963_v11, 0.0  ;;  %vm1980_vm10 = vcmp.gt.f32.partialorder %v1964_v55, 0.0  ;;  %vm1981_vm11 = vcmp.gt.f32.partialorder %v1965_v30, 0.0 }
 0x1bf   :  { %v1994_v9 = vmul.f32 0.01, %v1962_v44  ;;  %vm1982_vm12 = vcmp.gt.f32.partialorder %v1966_v58, 0.0  ;;  %v1995_v16 = vmul.f32 0.01, %v1963_v11  ;;  %v2353_v59 = vrot.slane %v2348_v43, %v4895_v2 }
 0x1c0   :  { %v1996_v41 = vmul.f32 0.01, %v1964_v55  ;;  %vm1983_vm13 = vcmp.gt.f32.partialorder %v1967_v57, 0.0  ;;  %vm1984_vm14 = vcmp.gt.f32.partialorder %v1968_v18, 0.0  ;;  %vm1985_vm15 = vcmp.gt.f32.partialorder %v1969_v17, 0.0 }
 0x1c1   :  { %v1997_v31 = vmul.f32 0.01, %v1965_v30  ;;  %v2342_v3 = vadd.f32 %v2326_v21, %v4533_v25  ;;  %v1998_v23 = vmul.f32 0.01, %v1966_v58  ;;  %v1999_v29 = vmul.f32 0.01, %v1967_v57 }
 0x1c2   :  { %v2000_v10 = vmul.f32 0.01, %v1968_v18  ;;  %v2001_v53 = vmul.f32 0.01, %v1969_v17  ;;  %v2010_v8 = vsel %vm1978_vm8, %v1962_v44, %v1994_v9  ;;  %v2011_v49 = vsel %vm1979_vm9, %v1963_v11, %v1995_v16 }
 0x1c3   :  { %v2354_v56 = vmul.f32 %v2353_v59, %v4378_v1  ;;  %v2012_v0 = vsel %vm1980_vm10, %v1964_v55, %v1996_v41  ;;  %v2355_v40 = vmul.f32 %v2353_v59, %v4383_v32  ;;  %v2356_v6 = vmul.f32 %v2353_v59, %v4386_v36 }
 0x1c4   :  { %v2357_v61 = vmul.f32 %v2353_v59, %v4395_v39  ;;  %v2358_v25 = vmul.f32 %v2353_v59, %v4398_v15  ;;  %v2359_v13 = vmul.f32 %v2353_v59, %v4401_v27  ;;  %v2360_v47 = vmul.f32 %v2353_v59, %v4404_v54  ;;  %v2475_v54 = vpop.permute.xlu0 %2474 }
 0x1c5   :  { %v2361_v14 = vmul.f32 %v2353_v59, %v4407_v19  ;;  %v2370_v63 = vrot.slane %v2354_v56, 7  ;;  %v2371_v21 = vrot.slane %v2355_v40, 7  ;;  %v2372_v48 = vrot.slane %v2356_v6, 7 }
 0x1c6   :  { %v2373_v1 = vrot.slane %v2357_v61, 7  ;;  %v2374_v22 = vrot.slane %v2358_v25, 7  ;;  %v2375_v4 = vrot.slane %v2359_v13, 7  ;;  %v2376_v33 = vrot.slane %v2360_v47, 7 }
 0x1c7   :  { %v2377_v32 = vrot.slane %v2361_v14, 7  ;;  %v2013_v36 = vsel %vm1981_vm11, %v1965_v30, %v1997_v31  ;;  %v2014_v39 = vsel %vm1982_vm12, %v1966_v58, %v1998_v23  ;;  %v2015_v15 = vsel %vm1983_vm13, %v1967_v57, %v1999_v29 }
 0x1c8   :  { %v2016_v27 = vsel %vm1984_vm14, %v1968_v18, %v2000_v10  ;;  %v2017_v19 = vsel %vm1985_vm15, %v1969_v17, %v2001_v53  ;;  %v2386_v20 = vadd.f32 %v2370_v63, %v4549_v34  ;;  %v2387_v60 = vadd.f32 %v2371_v21, %v4551_v45 }
 0x1c9   :  { %v2388_v37 = vadd.f32 %v2372_v48, %v4553_v50  ;;  %v2389_v7 = vadd.f32 %v2373_v1, %v2338_v35  ;;  %v2390_v12 = vadd.f32 %v2374_v22, %v2339_v5  ;;  %v2391_v38 = vadd.f32 %v2375_v4, %v2340_v46 }
 0x1ca   :  { %v2431_v26 = vrot.slane %v2426_v28, %v4895_v2  ;;  %v2392_v52 = vadd.f32 %v2376_v33, %v2341_v62  ;;  %v2393_v51 = vadd.f32 %v2377_v32, %v2342_v3  ;;  %v2404_v42 = vrot.slane %v2399_v24, %v4895_v2 }
 0x1cb   :  { %v2480_v44 = vrot.slane %v2475_v54, %v4895_v2 }
 0x1cc   :  { %v2432_v11 = vmul.f32 %v2431_v26, %v2010_v8  ;;  %v2433_v55 = vmul.f32 %v2431_v26, %v2011_v49  ;;  %v2434_v30 = vmul.f32 %v2431_v26, %v2012_v0  ;;  %v2435_v58 = vmul.f32 %v2431_v26, %v2013_v36 }
 0x1cd   :  { %v2436_v34 = vmul.f32 %v2431_v26, %v2014_v39  ;;  %v2437_v43 = vmul.f32 %v2431_v26, %v2015_v15  ;;  %v2438_v45 = vmul.f32 %v2431_v26, %v2016_v27  ;;  %v2439_v57 = vmul.f32 %v2431_v26, %v2017_v19 }
 0x1ce   :  { %v2448_v50 = vrot.slane %v2432_v11, 1  ;;  %v2449_v35 = vrot.slane %v2433_v55, 1  ;;  %v2450_v18 = vrot.slane %v2434_v30, 1  ;;  %v2451_v17 = vrot.slane %v2435_v58, 1 }
 0x1cf   :  { %v2452_v5 = vrot.slane %v2436_v34, 1  ;;  %v2453_v46 = vrot.slane %v2437_v43, 1  ;;  %v2454_v62 = vrot.slane %v2438_v45, 1  ;;  %v2455_v9 = vrot.slane %v2439_v57, 1 }
 0x1d0   :  { %v2405_v16 = vmul.f32 %v2404_v42, %v2010_v8  ;;  %v2406_v41 = vmul.f32 %v2404_v42, %v2011_v49  ;;  %v2407_v59 = vmul.f32 %v2404_v42, %v2012_v0  ;;  %v2408_v2 = vmul.f32 %v2404_v42, %v2013_v36 }
 0x1d1   :  { %v2409_v31 = vmul.f32 %v2404_v42, %v2014_v39  ;;  %v2410_v3 = vmul.f32 %v2404_v42, %v2015_v15  ;;  %v2411_v23 = vmul.f32 %v2404_v42, %v2016_v27  ;;  %v2412_v29 = vmul.f32 %v2404_v42, %v2017_v19 }
 0x1d2   :  { %v2413_v10 = vadd.f32 %v2405_v16, %v2386_v20  ;;  %v2414_v24 = vadd.f32 %v2406_v41, %v2387_v60  ;;  %v2415_v53 = vadd.f32 %v2407_v59, %v2388_v37  ;;  %v2416_v56 = vadd.f32 %v2408_v2, %v2389_v7 }
 0x1d3   :  { %v2417_v40 = vadd.f32 %v2409_v31, %v2390_v12  ;;  %v2418_v6 = vadd.f32 %v2410_v3, %v2391_v38  ;;  %v2419_v61 = vadd.f32 %v2411_v23, %v2392_v52  ;;  %v2420_v25 = vadd.f32 %v2412_v29, %v2393_v51  ;;  %v4978_v31 = vld [vmem:[#allocation6_spill] sm:$0xff] }
 0x1d4   :  { %v2464_v13 = vadd.f32 %v2448_v50, %v2413_v10  ;;  %v2465_v47 = vadd.f32 %v2449_v35, %v2414_v24  ;;  %v2466_v14 = vadd.f32 %v2450_v18, %v2415_v53  ;;  %v2467_v63 = vadd.f32 %v2451_v17, %v2416_v56 }
 0x1d5   :  { %v2468_v8 = vadd.f32 %v2452_v5, %v2417_v40  ;;  %v2469_v49 = vadd.f32 %v2453_v46, %v2418_v6  ;;  %v2470_v0 = vadd.f32 %v2454_v62, %v2419_v61  ;;  %v2471_v21 = vadd.f32 %v2455_v9, %v2420_v25 }
 0x1d6   :  { %v2481_v48 = vadd.f32 %v2480_v44, %v2464_v13  ;;  %v2482_v1 = vadd.f32 %v2480_v44, %v2465_v47  ;;  %v2483_v22 = vadd.f32 %v2480_v44, %v2466_v14  ;;  %v2484_v4 = vadd.f32 %v2480_v44, %v2467_v63 }
 0x1d7   :  { %v2485_v33 = vadd.f32 %v2480_v44, %v2468_v8  ;;  %v2486_v32 = vadd.f32 %v2480_v44, %v2469_v49  ;;  %v2487_v28 = vadd.f32 %v2480_v44, %v2470_v0  ;;  %v2488_v36 = vadd.f32 %v2480_v44, %v2471_v21 }
 0x1d8   :  { %v2489_v39 = vsub.f32 0.0, %v2481_v48  ;;  %v2490_v15 = vsub.f32 0.0, %v2482_v1  ;;  %v2491_v27 = vsub.f32 0.0, %v2483_v22  ;;  %v2492_v54 = vsub.f32 0.0, %v2484_v4 }
 0x1d9   :  { %v2493_v19 = vsub.f32 0.0, %v2485_v33  ;;  %v2494_v20 = vsub.f32 0.0, %v2486_v32  ;;  %v2495_v60 = vsub.f32 0.0, %v2487_v28  ;;  %v2496_v38 = vsub.f32 0.0, %v2488_v36 }
 0x1da   :  { %v2497_v37 = vmul.f32 1.442695, %v2489_v39  ;;  %v2499_v7 = vmul.f32 1.442695, %v2490_v15  ;;  %v2501_v12 = vmul.f32 1.442695, %v2491_v27 }
 0x1db   :  { %v2503_v26 = vmul.f32 1.442695, %v2492_v54  ;;  %v2505_v52 = vmul.f32 1.442695, %v2493_v19  ;;  %v2507_v51 = vmul.f32 1.442695, %v2494_v20 }
 0x1dc   :  { %2722 = vpow2.f32 %v2497_v37  ;;  %v2509_v42 = vmul.f32 1.442695, %v2495_v60  ;;  %v2511_v44 = vmul.f32 1.442695, %v2496_v38  ;;  %v2777_v16 = vmov 1966171168  }
 0x1dd   :  { %2724 = vpow2.f32 %v2499_v7  ;;  %v2542_v41 = vunpack.c.l.s4 %v2777_v16 }
 0x1de   :  { %2726 = vpow2.f32 %v2501_v12 }
 0x1df   :  { %2728 = vpow2.f32 %v2503_v26  ;;  %v2543_v59 = vunpack.c.0.s8 %v2542_v41 }
 0x1e0   :  { %2730 = vpow2.f32 %v2505_v52 }
 0x1e1   :  { %2732 = vpow2.f32 %v2507_v51  ;;  %v2546_v3 = vsub.s32 %v2543_v59, %v4978_v31 }
 0x1e2   :  { %2734 = vpow2.f32 %v2509_v42 }
 0x1e3   :  { %2736 = vpow2.f32 %v2511_v44 }
 0x1e9   :  { %v2723_v11 = vpop.eup %2722 }
 0x1ea   :  { %v2725_v55 = vpop.eup %2724  ;;  %v2513_v30 = vadd.f32 1.0, %v2723_v11 }
 0x1eb   :  { %v2727_v58 = vpop.eup %2726  ;;  %v2514_v34 = vadd.f32 1.0, %v2725_v55 }
 0x1ec   :  { %v2729_v43 = vpop.eup %2728  ;;  %v2515_v45 = vadd.f32 1.0, %v2727_v58  ;;  %2738 = vrcp.f32 %v2513_v30 }
 0x1ed   :  { %v2731_v57 = vpop.eup %2730  ;;  %v2516_v50 = vadd.f32 1.0, %v2729_v43  ;;  %2740 = vrcp.f32 %v2514_v34 }
 0x1ee   :  { %v2733_v35 = vpop.eup %2732  ;;  %v2517_v18 = vadd.f32 1.0, %v2731_v57  ;;  %2742 = vrcp.f32 %v2515_v45 }
 0x1ef   :  { %v2735_v17 = vpop.eup %2734  ;;  %v2518_v5 = vadd.f32 1.0, %v2733_v35  ;;  %2744 = vrcp.f32 %v2516_v50 }
 0x1f0   :  { %v2737_v46 = vpop.eup %2736  ;;  %v2519_v62 = vadd.f32 1.0, %v2735_v17  ;;  %2746 = vrcp.f32 %v2517_v18 }
 0x1f1   :  { %v2520_v9 = vadd.f32 1.0, %v2737_v46  ;;  %2748 = vrcp.f32 %v2518_v5 }
 0x1f2   :  { %2750 = vrcp.f32 %v2519_v62 }
 0x1f3   :  { %2752 = vrcp.f32 %v2520_v9 }
 0x1f9   :  { %v2739_v2 = vpop.eup %2738 }
 0x1fa   :  { %v2741_v23 = vpop.eup %2740 }
 0x1fb   :  { %v2743_v29 = vpop.eup %2742  ;;  %v2537_v10 = vcombine.low %v2739_v2, %v2741_v23 }
 0x1fc   :  { %v2745_v24 = vpop.eup %2744 }
 0x1fd   :  { %v2747_v53 = vpop.eup %2746  ;;  %v2538_v56 = vcombine.low %v2743_v29, %v2745_v24  ;;  %v2547_v40 = vrot.slane %v2537_v10, %v2546_v3 }
 0x1fe   :  { %v2749_v6 = vpop.eup %2748 }
 0x1ff   :  { %v2751_v61 = vpop.eup %2750  ;;  %v2539_v25 = vcombine.low %v2747_v53, %v2749_v6  ;;  %v2554_v13 = vrot.slane %v2538_v56, %v2546_v3 }
 0x200   :  { %v2753_v47 = vpop.eup %2752 }
 0x201   :  { %v2540_v14 = vcombine.low %v2751_v61, %v2753_v47  ;;  %v2561_v63 = vrot.slane %v2539_v25, %v2546_v3  ;;  %v2569_v8 = vcombine.low %v2547_v40, %v2554_v13 }
 0x203   :  { %v2568_v49 = vrot.slane %v2540_v14, %v2546_v3  ;;  %v2577_v21 = vrot.slane %v2569_v8, %v2546_v3 }
 0x205   :  { %v2570_v0 = vcombine.low %v2561_v63, %v2568_v49 }
 0x207   :  { %v2584_v48 = vrot.slane %v2570_v0, %v2546_v3 }
 0x209   :  { %v2585_v1 = vcombine.low %v2577_v21, %v2584_v48 }
 0x20b   :  { %2587 = vst [vmem:[#allocation3] sm:$0xff] %v2585_v1 }
 0x20c   :  { %2765 = shalt.err (!%p2762_p4)
}
 0x20d   :  { %2597 = dma.vmem_to_hbm [thread:$0]  %s2595_s5, 128, %s4593_s7, [#allocation4]  }
 0x20e   :  { %2774 = dma.done.wait [#allocation4], 128  }
 0x20f   :  { %2775 = vsyncadd [#allocation4], 4294967168 }
 0x210   :  { %2601 = vsyncpa [#allocation4], 1 }

</bundles_post_ra>
